<compile_context>
chip_gen: v6e
topology: v6e:2x2x1
jax: 0.10.0
libtpu: 0.0.40
codegen_flags: <defaults>
</compile_context>

<pallas_src>
import functools
import jax
import jax.numpy as jnp
from jax.experimental import pallas as pl
from jax.experimental.pallas import tpu as pltpu

# ----------------------- small, lane-dense ViT config (synthetic) -----------------------
IMG = 32                               # image resolution (stands in for 224)
PATCH = 8                              # patch size (stands in for 14)
GRID_P = IMG // PATCH
N_PATCH = GRID_P * GRID_P              # 16
PATCH_DIM = 3 * PATCH * PATCH          # 192
SEQ = N_PATCH + 1                      # 17  (patches + class token)
SEQ_PAD = 32                           # multiple of 16 -> clean bf16 sublane packing
WIDTH = 128                            # transformer width (stands in for 1280)
HEADS = 4
HEAD_DIM = WIDTH // HEADS              # 32
LAYERS = 2
MLP_HIDDEN = 4 * WIDTH                 # 512
EMBED_DIM = 128                        # output embedding dim (stands in for 1024)
LN_EPS = 1e-5
BBLK = 2                               # images per grid step (fills MXU M rows)
M_ROWS = BBLK * SEQ_PAD                # 64 rows per big matmul


# ------------------------------ in-kernel helpers ------------------------------
def _ln(x, g, b):
    # f32 VPU math throughout (v5e has no bf16 VPU/EUP).
    mean = jnp.mean(x, axis=-1, keepdims=True)
    var = jnp.mean(jnp.square(x - mean), axis=-1, keepdims=True)
    return (x - mean) * jax.lax.rsqrt(var + LN_EPS) * g + b


# ------------------------------ fused ViT kernel ------------------------------
def _vit_kernel(
    patches_ref, conv_w_ref, tokbias_ref, lnpre_g_ref, lnpre_b_ref, mask_ref,
    ln1_g_ref, ln1_b_ref, qkv_w_ref, qkv_b_ref, out_w_ref, out_b_ref,
    ln2_g_ref, ln2_b_ref, fc1_w_ref, fc1_b_ref, fc2_w_ref, fc2_b_ref,
    lnpost_g_ref, lnpost_b_ref, proj_ref,
    emb_ref,
    resid_ref, attn_ref,
):
    l = pl.program_id(1)
    n_l = pl.num_programs(1)

    # ---------------- stem: patch-embed + cls/pos bias + ln_pre (layer 0 only) ----------
    @pl.when(l == 0)
    def _stem():
        p = patches_ref[...].astype(jnp.bfloat16)                     # (M, PATCH_DIM)
        tok = jnp.dot(p, conv_w_ref[...], preferred_element_type=jnp.float32)
        resid_ref[...] = _ln(tok + tokbias_ref[...],
                             lnpre_g_ref[...], lnpre_b_ref[...])       # (M, WIDTH) f32

    h = resid_ref[...]                                                 # residual, VMEM-resident

    # ---------------- attention ----------------
    y = _ln(h, ln1_g_ref[0], ln1_b_ref[0]).astype(jnp.bfloat16)
    # one big M=64 matmul; attention scale pre-folded into the q columns of qkv_w
    qkv = (jnp.dot(y, qkv_w_ref[0], preferred_element_type=jnp.float32)
           + qkv_b_ref[0]).astype(jnp.bfloat16)                        # single cast of the slab

    neg = mask_ref[...]                                                # (SEQ_PAD, SEQ_PAD) f32
    for bi in range(BBLK):                                             # static unroll
        r0 = bi * SEQ_PAD
        for hd in range(HEADS):                                        # static unroll
            lo = hd * HEAD_DIM
            q = qkv[r0:r0 + SEQ_PAD, lo:lo + HEAD_DIM]
            k = qkv[r0:r0 + SEQ_PAD, WIDTH + lo:WIDTH + lo + HEAD_DIM]
            v = qkv[r0:r0 + SEQ_PAD, 2 * WIDTH + lo:2 * WIDTH + lo + HEAD_DIM]

            s = jax.lax.dot_general(q, k, (((1,), (1,)), ((), ())),
                                    preferred_element_type=jnp.float32) + neg
            s = s - jnp.max(s, axis=-1, keepdims=True)
            p = jnp.exp(s)
            p = p * pl.reciprocal(jnp.sum(p, axis=-1, keepdims=True), approx=True)
            # head-merge via lane-offset store into the (M, WIDTH) scratch
            attn_ref[r0:r0 + SEQ_PAD, lo:lo + HEAD_DIM] = jnp.dot(
                p.astype(jnp.bfloat16), v, preferred_element_type=jnp.float32)

    # single K=128 out-projection over all heads / all images in the block
    attn = (jnp.dot(attn_ref[...].astype(jnp.bfloat16), out_w_ref[0],
                    preferred_element_type=jnp.float32) + out_b_ref[0])
    h1 = h + attn                                                      # residual (VMEM)

    # ---------------- MLP ----------------
    y2 = _ln(h1, ln2_g_ref[0], ln2_b_ref[0]).astype(jnp.bfloat16)
    hid = jnp.dot(y2, fc1_w_ref[0], preferred_element_type=jnp.float32) + fc1_b_ref[0]
    hid = jax.nn.gelu(hid, approximate=True).astype(jnp.bfloat16)      # tanh GELU -> EUP slot
    mlp = jnp.dot(hid, fc2_w_ref[0], preferred_element_type=jnp.float32) + fc2_b_ref[0]
    h2 = h1 + mlp
    resid_ref[...] = h2                                                # carry to next layer

    # ---------------- head: ln_post on cls token + projection (last layer only) ---------
    @pl.when(l == n_l - 1)
    def _head():
        cls = jnp.concatenate(
            [h2[bi * SEQ_PAD:bi * SEQ_PAD + 1, :] for bi in range(BBLK)], axis=0)
        x = _ln(cls, lnpost_g_ref[...], lnpost_b_ref[...]).astype(jnp.bfloat16)
        emb_ref[...] = jnp.dot(x, proj_ref[...], preferred_element_type=jnp.float32)


# ------------------------------ BlockSpec helpers ------------------------------
def _bcast(shape):
    nd = len(shape)
    return pl.BlockSpec(shape, lambda b, l, _nd=nd: (0,) * _nd)


def _stacked(shape):
    # per-layer stacked weight: leading LAYERS axis, block index follows the l grid axis
    nd = len(shape)
    return pl.BlockSpec((1,) + shape, lambda b, l, _nd=nd: (l,) + (0,) * _nd)


# ------------------------------ forward pass ------------------------------
def encode_image(params, image_nchw):
    """Equivalent of FrozenOpenCLIPCustomEmbedder.forward (model.encode_image, normalize=False)."""
    B = image_nchw.shape[0]
    assert B % BBLK == 0, "batch must be a multiple of BBLK"
    x = image_nchw.astype(jnp.float32)

    # patchify (stride == kernel == PATCH conv, bias=False) -> (B, N_PATCH, 3*p*p),
    # channel-major inside the patch; row 0 is the class-token slot (zeros), tail rows are
    # sequence padding; then flatten (batch, seq) so in-kernel matmuls see M = BBLK*SEQ_PAD.
    x = x.reshape(B, 3, GRID_P, PATCH, GRID_P, PATCH)
    x = x.transpose(0, 2, 4, 1, 3, 5).reshape(B, N_PATCH, PATCH_DIM)
    patches = jnp.pad(x, ((0, 0), (1, SEQ_PAD - SEQ), (0, 0)))
    patches = patches.reshape(B * SEQ_PAD, PATCH_DIM)

    in_specs = [
        pl.BlockSpec((M_ROWS, PATCH_DIM), lambda b, l: (b, 0)),   # patches (per-b, const over l)
        _bcast((PATCH_DIM, WIDTH)),                               # conv_w
        _bcast((M_ROWS, WIDTH)),                                  # tokbias (cls + pos, tiled)
        _bcast((1, WIDTH)), _bcast((1, WIDTH)),                   # ln_pre g/b
        _bcast((SEQ_PAD, SEQ_PAD)),                               # key-padding mask
        _stacked((1, WIDTH)), _stacked((1, WIDTH)),               # ln1 g/b
        _stacked((WIDTH, 3 * WIDTH)), _stacked((1, 3 * WIDTH)),   # qkv w/b
        _stacked((WIDTH, WIDTH)), _stacked((1, WIDTH)),           # out-proj w/b
        _stacked((1, WIDTH)), _stacked((1, WIDTH)),               # ln2 g/b
        _stacked((WIDTH, MLP_HIDDEN)), _stacked((1, MLP_HIDDEN)), # fc1 w/b
        _stacked((MLP_HIDDEN, WIDTH)), _stacked((1, WIDTH)),      # fc2 w/b
        _bcast((1, WIDTH)), _bcast((1, WIDTH)),                   # ln_post g/b
        _bcast((WIDTH, EMBED_DIM)),                               # final projection
    ]
    out_specs = pl.BlockSpec((BBLK, EMBED_DIM), lambda b, l: (b, 0))

    return pl.pallas_call(
        _vit_kernel,
        out_shape=jax.ShapeDtypeStruct((B, EMBED_DIM), jnp.float32),
        grid=(B // BBLK, LAYERS),
        in_specs=in_specs,
        out_specs=out_specs,
        scratch_shapes=[
            pltpu.VMEM((M_ROWS, WIDTH), jnp.float32),   # residual stream (resident across l)
            pltpu.VMEM((M_ROWS, WIDTH), jnp.float32),   # merged-head attention slab
        ],
        compiler_params=pltpu.CompilerParams(
            dimension_semantics=("parallel", "arbitrary"),   # batch parallel, layers sequential
            vmem_limit_bytes=48 * 1024 * 1024,               # headroom under v7x's 64 MiB/TC
        ),
    )(patches, params["conv_w"], params["tokbias"],
      params["ln_pre_g"], params["ln_pre_b"], params["mask"],
      params["ln1_g"], params["ln1_b"], params["qkv_w"], params["qkv_b"],
      params["out_w"], params["out_b"], params["ln2_g"], params["ln2_b"],
      params["fc1_w"], params["fc1_b"], params["fc2_w"], params["fc2_b"],
      params["ln_post_g"], params["ln_post_b"], params["proj"])


# ------------------------------ parameter init ------------------------------
def init_params(key):
    def nrm(k, shape, scale=0.02):
        return scale * jax.random.normal(k, shape, dtype=jnp.float32)

    keys = iter(jax.random.split(key, 16))
    scale = HEAD_DIM ** -0.5

    cls = nrm(next(keys), (WIDTH,))
    pos = nrm(next(keys), (SEQ, WIDTH))
    # fuse class-token concat + pos-embed add into a (SEQ_PAD, WIDTH) "token bias":
    # row 0 = cls + pos[0]; rows 1..SEQ-1 = pos[1:]; padded rows = 0; tiled x BBLK to match
    # the flattened (BBLK*SEQ_PAD, WIDTH) activation slab.
    tokbias = jnp.zeros((SEQ_PAD, WIDTH), jnp.float32)
    tokbias = tokbias.at[:SEQ].set(pos)
    tokbias = tokbias.at[0].add(cls)
    tokbias = jnp.tile(tokbias, (BBLK, 1))

    # key-padding mask, precomputed once (padded key positions -> -inf before softmax)
    kidx = jax.lax.broadcasted_iota(jnp.int32, (SEQ_PAD, SEQ_PAD), 1)
    mask = jnp.where(kidx < SEQ, 0.0, -1e30).astype(jnp.float32)

    # fold attention scale (head_dim^-0.5) into the q columns of the stacked qkv weights
    qkv_w = nrm(next(keys), (LAYERS, WIDTH, 3 * WIDTH))
    qkv_w = qkv_w.at[:, :, :WIDTH].multiply(scale)
    qkv_b = jnp.zeros((LAYERS, 1, 3 * WIDTH), jnp.float32)
    qkv_b = qkv_b.at[:, :, :WIDTH].multiply(scale)   # no-op for zeros; keeps fold consistent

    return {
        # patch-embedding Conv2d(3, WIDTH, PATCH, stride=PATCH, bias=False) as a matmul
        "conv_w": nrm(next(keys), (PATCH_DIM, WIDTH)).astype(jnp.bfloat16),
        "tokbias": tokbias,
        "mask": mask,
        "ln_pre_g": jnp.ones((1, WIDTH), jnp.float32),
        "ln_pre_b": jnp.zeros((1, WIDTH), jnp.float32),
        # per-layer weights stacked along a leading LAYERS axis (pipelined over grid axis l)
        "ln1_g": jnp.ones((LAYERS, 1, WIDTH), jnp.float32),
        "ln1_b": jnp.zeros((LAYERS, 1, WIDTH), jnp.float32),
        "qkv_w": qkv_w.astype(jnp.bfloat16),
        "qkv_b": qkv_b,
        "out_w": nrm(next(keys), (LAYERS, WIDTH, WIDTH)).astype(jnp.bfloat16),
        "out_b": jnp.zeros((LAYERS, 1, WIDTH), jnp.float32),
        "ln2_g": jnp.ones((LAYERS, 1, WIDTH), jnp.float32),
        "ln2_b": jnp.zeros((LAYERS, 1, WIDTH), jnp.float32),
        "fc1_w": nrm(next(keys), (LAYERS, WIDTH, MLP_HIDDEN)).astype(jnp.bfloat16),
        "fc1_b": jnp.zeros((LAYERS, 1, MLP_HIDDEN), jnp.float32),
        "fc2_w": nrm(next(keys), (LAYERS, MLP_HIDDEN, WIDTH)).astype(jnp.bfloat16),
        "fc2_b": jnp.zeros((LAYERS, 1, WIDTH), jnp.float32),
        "ln_post_g": jnp.ones((1, WIDTH), jnp.float32),
        "ln_post_b": jnp.zeros((1, WIDTH), jnp.float32),
        "proj": nrm(next(keys), (WIDTH, EMBED_DIM)).astype(jnp.bfloat16),
    }


if __name__ == "__main__":
    key = jax.random.PRNGKey(0)
    kp, kx = jax.random.split(key)
    params = init_params(kp)
    image = jax.random.normal(kx, (2, 3, IMG, IMG), dtype=jnp.float32)  # NCHW like PyTorch

    out = jax.jit(functools.partial(encode_image, params))(image)
    jax.block_until_ready(out)
    assert out.shape == (2, EMBED_DIM), out.shape
    assert bool(jnp.all(jnp.isfinite(out)))
    print("KERNEL_OK")
</pallas_src>

<mosaic_0001>
module attributes {stable_mosaic.version = 11 : i64} {
  func.func @_vit_kernel(%arg0: i32, %arg1: i32, %arg2: memref<64x192xf32, #tpu.memory_space<vmem>>, %arg3: memref<192x128xbf16, #tpu.memory_space<vmem>>, %arg4: memref<64x128xf32, #tpu.memory_space<vmem>>, %arg5: memref<1x128xf32, #tpu.memory_space<vmem>>, %arg6: memref<1x128xf32, #tpu.memory_space<vmem>>, %arg7: memref<32x32xf32, #tpu.memory_space<vmem>>, %arg8: memref<1x1x128xf32, #tpu.memory_space<vmem>>, %arg9: memref<1x1x128xf32, #tpu.memory_space<vmem>>, %arg10: memref<1x128x384xbf16, #tpu.memory_space<vmem>>, %arg11: memref<1x1x384xf32, #tpu.memory_space<vmem>>, %arg12: memref<1x128x128xbf16, #tpu.memory_space<vmem>>, %arg13: memref<1x1x128xf32, #tpu.memory_space<vmem>>, %arg14: memref<1x1x128xf32, #tpu.memory_space<vmem>>, %arg15: memref<1x1x128xf32, #tpu.memory_space<vmem>>, %arg16: memref<1x128x512xbf16, #tpu.memory_space<vmem>>, %arg17: memref<1x1x512xf32, #tpu.memory_space<vmem>>, %arg18: memref<1x512x128xbf16, #tpu.memory_space<vmem>>, %arg19: memref<1x1x128xf32, #tpu.memory_space<vmem>>, %arg20: memref<1x128xf32, #tpu.memory_space<vmem>>, %arg21: memref<1x128xf32, #tpu.memory_space<vmem>>, %arg22: memref<128x128xbf16, #tpu.memory_space<vmem>>, %arg23: memref<2x128xf32, #tpu.memory_space<vmem>>, %arg24: memref<64x128xf32, #tpu.memory_space<vmem>>, %arg25: memref<64x128xf32, #tpu.memory_space<vmem>>) attributes {dimension_semantics = [#tpu.dimension_semantics<parallel>, #tpu.dimension_semantics<arbitrary>], iteration_bounds = array<i64: 1, 2>, scalar_prefetch = 0 : i64, scratch_operands = 2 : i64, tpu.core_type = #tpu.core_type<tc>, window_params = [{transform_indices = @transform_0, window_bounds = array<i64: 64, 192>}, {pipeline_mode = #tpu.pipeline_mode<synchronous>, transform_indices = @transform_1, window_bounds = array<i64: 192, 128>}, {pipeline_mode = #tpu.pipeline_mode<synchronous>, transform_indices = @transform_2, window_bounds = array<i64: 64, 128>}, {pipeline_mode = #tpu.pipeline_mode<synchronous>, transform_indices = @transform_3, window_bounds = array<i64: 1, 128>}, {pipeline_mode = #tpu.pipeline_mode<synchronous>, transform_indices = @transform_4, window_bounds = array<i64: 1, 128>}, {pipeline_mode = #tpu.pipeline_mode<synchronous>, transform_indices = @transform_5, window_bounds = array<i64: 32, 32>}, {transform_indices = @transform_6, window_bounds = array<i64: 1, 1, 128>}, {transform_indices = @transform_7, window_bounds = array<i64: 1, 1, 128>}, {transform_indices = @transform_8, window_bounds = array<i64: 1, 128, 384>}, {transform_indices = @transform_9, window_bounds = array<i64: 1, 1, 384>}, {transform_indices = @transform_10, window_bounds = array<i64: 1, 128, 128>}, {transform_indices = @transform_11, window_bounds = array<i64: 1, 1, 128>}, {transform_indices = @transform_12, window_bounds = array<i64: 1, 1, 128>}, {transform_indices = @transform_13, window_bounds = array<i64: 1, 1, 128>}, {transform_indices = @transform_14, window_bounds = array<i64: 1, 128, 512>}, {transform_indices = @transform_15, window_bounds = array<i64: 1, 1, 512>}, {transform_indices = @transform_16, window_bounds = array<i64: 1, 512, 128>}, {transform_indices = @transform_17, window_bounds = array<i64: 1, 1, 128>}, {pipeline_mode = #tpu.pipeline_mode<synchronous>, transform_indices = @transform_18, window_bounds = array<i64: 1, 128>}, {pipeline_mode = #tpu.pipeline_mode<synchronous>, transform_indices = @transform_19, window_bounds = array<i64: 1, 128>}, {pipeline_mode = #tpu.pipeline_mode<synchronous>, transform_indices = @transform_20, window_bounds = array<i64: 128, 128>}, {transform_indices = @transform_21, window_bounds = array<i64: 2, 128>}]} {
    %c0_i32 = arith.constant 0 : i32
    %0 = arith.cmpi eq, %arg1, %c0_i32 : i32
    %1 = arith.extui %0 : i1 to i32
    %c0_i32_0 = arith.constant 0 : i32
    %2 = arith.cmpi ne, %1, %c0_i32_0 : i32
    scf.if %2 {
      %c0_107 = arith.constant 0 : index
      %c0_108 = arith.constant 0 : index
      %254 = vector.load %arg2[%c0_107, %c0_108] : memref<64x192xf32, #tpu.memory_space<vmem>>, vector<64x192xf32>
      %255 = arith.truncf %254 : vector<64x192xf32> to vector<64x192xbf16>
      %c0_109 = arith.constant 0 : index
      %c0_110 = arith.constant 0 : index
      %256 = vector.load %arg3[%c0_109, %c0_110] : memref<192x128xbf16, #tpu.memory_space<vmem>>, vector<192x128xbf16>
      %cst_111 = arith.constant dense<0.000000e+00> : vector<64x128xf32>
      %257 = tpu.matmul %255, %256, %cst_111 {dimension_numbers = #tpu.dot_dimension_numbers<[1], [0], [0], [1], [0, 0, 1, 1], [], []>} : vector<64x192xbf16>, vector<192x128xbf16>, vector<64x128xf32> -> vector<64x128xf32>
      %c0_112 = arith.constant 0 : index
      %c0_113 = arith.constant 0 : index
      %258 = vector.load %arg4[%c0_112, %c0_113] : memref<64x128xf32, #tpu.memory_space<vmem>>, vector<64x128xf32>
      %259 = arith.addf %257, %258 : vector<64x128xf32>
      %c0_114 = arith.constant 0 : index
      %c0_115 = arith.constant 0 : index
      %260 = vector.load %arg5[%c0_114, %c0_115] : memref<1x128xf32, #tpu.memory_space<vmem>>, vector<1x128xf32>
      %c0_116 = arith.constant 0 : index
      %c0_117 = arith.constant 0 : index
      %261 = vector.load %arg6[%c0_116, %c0_117] : memref<1x128xf32, #tpu.memory_space<vmem>>, vector<1x128xf32>
      %cst_118 = arith.constant dense<0.000000e+00> : vector<64xf32>
      %262 = vector.multi_reduction <add>, %259, %cst_118 [1] : vector<64x128xf32> to vector<64xf32>
      %263 = vector.shape_cast %262 : vector<64xf32> to vector<64x1xf32>
      %cst_119 = arith.constant 1.280000e+02 : f32
      %264 = vector.broadcast %cst_119 : f32 to vector<64x1xf32>
      %265 = arith.divf %263, %264 : vector<64x1xf32>
      %266 = vector.broadcast %265 : vector<64x1xf32> to vector<64x128xf32>
      %267 = arith.subf %259, %266 : vector<64x128xf32>
      %268 = arith.mulf %267, %267 : vector<64x128xf32>
      %cst_120 = arith.constant dense<0.000000e+00> : vector<64xf32>
      %269 = vector.multi_reduction <add>, %268, %cst_120 [1] : vector<64x128xf32> to vector<64xf32>
      %270 = vector.shape_cast %269 : vector<64xf32> to vector<64x1xf32>
      %cst_121 = arith.constant 1.280000e+02 : f32
      %271 = vector.broadcast %cst_121 : f32 to vector<64x1xf32>
      %272 = arith.divf %270, %271 : vector<64x1xf32>
      %273 = vector.broadcast %265 : vector<64x1xf32> to vector<64x128xf32>
      %274 = arith.subf %259, %273 : vector<64x128xf32>
      %cst_122 = arith.constant 9.99999974E-6 : f32
      %275 = vector.broadcast %cst_122 : f32 to vector<64x1xf32>
      %276 = arith.addf %272, %275 : vector<64x1xf32>
      %277 = math.rsqrt %276 : vector<64x1xf32>
      %278 = vector.broadcast %277 : vector<64x1xf32> to vector<64x128xf32>
      %279 = arith.mulf %274, %278 : vector<64x128xf32>
      %280 = vector.broadcast %260 : vector<1x128xf32> to vector<64x128xf32>
      %281 = arith.mulf %279, %280 : vector<64x128xf32>
      %282 = vector.broadcast %261 : vector<1x128xf32> to vector<64x128xf32>
      %283 = arith.addf %281, %282 : vector<64x128xf32>
      %c0_123 = arith.constant 0 : index
      %c0_124 = arith.constant 0 : index
      %284 = vector.load %arg24[%c0_123, %c0_124] : memref<64x128xf32, #tpu.memory_space<vmem>>, vector<64x128xf32>
      tpu.vector_store %arg24[%c0_123, %c0_124], %283 {strides = array<i32>} : memref<64x128xf32, #tpu.memory_space<vmem>>, vector<64x128xf32>,
    } else {
    }
    %c0 = arith.constant 0 : index
    %c0_1 = arith.constant 0 : index
    %3 = vector.load %arg24[%c0, %c0_1] : memref<64x128xf32, #tpu.memory_space<vmem>>, vector<64x128xf32>
    %c0_2 = arith.constant 0 : index
    %c0_3 = arith.constant 0 : index
    %c0_4 = arith.constant 0 : index
    %4 = vector.load %arg8[%c0_2, %c0_3, %c0_4] : memref<1x1x128xf32, #tpu.memory_space<vmem>>, vector<1x1x128xf32>
    %5 = vector.shape_cast %4 : vector<1x1x128xf32> to vector<1x128xf32>
    %c0_5 = arith.constant 0 : index
    %c0_6 = arith.constant 0 : index
    %c0_7 = arith.constant 0 : index
    %6 = vector.load %arg9[%c0_5, %c0_6, %c0_7] : memref<1x1x128xf32, #tpu.memory_space<vmem>>, vector<1x1x128xf32>
    %7 = vector.shape_cast %6 : vector<1x1x128xf32> to vector<1x128xf32>
    %cst = arith.constant dense<0.000000e+00> : vector<64xf32>
    %8 = vector.multi_reduction <add>, %3, %cst [1] : vector<64x128xf32> to vector<64xf32>
    %9 = vector.shape_cast %8 : vector<64xf32> to vector<64x1xf32>
    %cst_8 = arith.constant 1.280000e+02 : f32
    %10 = vector.broadcast %cst_8 : f32 to vector<64x1xf32>
    %11 = arith.divf %9, %10 : vector<64x1xf32>
    %12 = vector.broadcast %11 : vector<64x1xf32> to vector<64x128xf32>
    %13 = arith.subf %3, %12 : vector<64x128xf32>
    %14 = arith.mulf %13, %13 : vector<64x128xf32>
    %cst_9 = arith.constant dense<0.000000e+00> : vector<64xf32>
    %15 = vector.multi_reduction <add>, %14, %cst_9 [1] : vector<64x128xf32> to vector<64xf32>
    %16 = vector.shape_cast %15 : vector<64xf32> to vector<64x1xf32>
    %cst_10 = arith.constant 1.280000e+02 : f32
    %17 = vector.broadcast %cst_10 : f32 to vector<64x1xf32>
    %18 = arith.divf %16, %17 : vector<64x1xf32>
    %19 = vector.broadcast %11 : vector<64x1xf32> to vector<64x128xf32>
    %20 = arith.subf %3, %19 : vector<64x128xf32>
    %cst_11 = arith.constant 9.99999974E-6 : f32
    %21 = vector.broadcast %cst_11 : f32 to vector<64x1xf32>
    %22 = arith.addf %18, %21 : vector<64x1xf32>
    %23 = math.rsqrt %22 : vector<64x1xf32>
    %24 = vector.broadcast %23 : vector<64x1xf32> to vector<64x128xf32>
    %25 = arith.mulf %20, %24 : vector<64x128xf32>
    %26 = vector.broadcast %5 : vector<1x128xf32> to vector<64x128xf32>
    %27 = arith.mulf %25, %26 : vector<64x128xf32>
    %28 = vector.broadcast %7 : vector<1x128xf32> to vector<64x128xf32>
    %29 = arith.addf %27, %28 : vector<64x128xf32>
    %30 = arith.truncf %29 : vector<64x128xf32> to vector<64x128xbf16>
    %c0_12 = arith.constant 0 : index
    %c0_13 = arith.constant 0 : index
    %c0_14 = arith.constant 0 : index
    %31 = vector.load %arg10[%c0_12, %c0_13, %c0_14] : memref<1x128x384xbf16, #tpu.memory_space<vmem>>, vector<1x128x384xbf16>
    %32 = vector.shape_cast %31 : vector<1x128x384xbf16> to vector<128x384xbf16>
    %cst_15 = arith.constant dense<0.000000e+00> : vector<64x384xf32>
    %33 = tpu.matmul %30, %32, %cst_15 {dimension_numbers = #tpu.dot_dimension_numbers<[1], [0], [0], [1], [0, 0, 1, 1], [], []>} : vector<64x128xbf16>, vector<128x384xbf16>, vector<64x384xf32> -> vector<64x384xf32>
    %c0_16 = arith.constant 0 : index
    %c0_17 = arith.constant 0 : index
    %c0_18 = arith.constant 0 : index
    %34 = vector.load %arg11[%c0_16, %c0_17, %c0_18] : memref<1x1x384xf32, #tpu.memory_space<vmem>>, vector<1x1x384xf32>
    %35 = vector.shape_cast %34 : vector<1x1x384xf32> to vector<1x384xf32>
    %36 = vector.broadcast %35 : vector<1x384xf32> to vector<64x384xf32>
    %37 = arith.addf %33, %36 : vector<64x384xf32>
    %38 = arith.truncf %37 : vector<64x384xf32> to vector<64x384xbf16>
    %c0_19 = arith.constant 0 : index
    %c0_20 = arith.constant 0 : index
    %39 = vector.load %arg7[%c0_19, %c0_20] : memref<32x32xf32, #tpu.memory_space<vmem>>, vector<32x32xf32>
    %40 = vector.extract_strided_slice %38 {offsets = [0, 0], sizes = [32, 32], strides = [1, 1]} : vector<64x384xbf16> to vector<32x32xbf16>
    %41 = vector.extract_strided_slice %38 {offsets = [0, 128], sizes = [32, 32], strides = [1, 1]} : vector<64x384xbf16> to vector<32x32xbf16>
    %42 = vector.extract_strided_slice %38 {offsets = [0, 256], sizes = [32, 32], strides = [1, 1]} : vector<64x384xbf16> to vector<32x32xbf16>
    %cst_21 = arith.constant dense<0.000000e+00> : vector<32x32xf32>
    %43 = tpu.matmul %40, %41, %cst_21 {dimension_numbers = #tpu.dot_dimension_numbers<[1], [1], [0], [0], [0, 0, 1, 0], [], []>} : vector<32x32xbf16>, vector<32x32xbf16>, vector<32x32xf32> -> vector<32x32xf32>
    %44 = arith.addf %43, %39 : vector<32x32xf32>
    %cst_22 = arith.constant dense<0xFF800000> : vector<32xf32>
    %45 = vector.multi_reduction <maximumf>, %44, %cst_22 [1] : vector<32x32xf32> to vector<32xf32>
    %46 = vector.shape_cast %45 : vector<32xf32> to vector<32x1xf32>
    %47 = vector.broadcast %46 : vector<32x1xf32> to vector<32x32xf32>
    %48 = arith.subf %44, %47 : vector<32x32xf32>
    %49 = math.exp %48 : vector<32x32xf32>
    %cst_23 = arith.constant dense<0.000000e+00> : vector<32xf32>
    %50 = vector.multi_reduction <add>, %49, %cst_23 [1] : vector<32x32xf32> to vector<32xf32>
    %51 = vector.shape_cast %50 : vector<32xf32> to vector<32x1xf32>
    %52 = tpu.reciprocal %51 {approx = true} : vector<32x1xf32> -> vector<32x1xf32>
    %53 = vector.broadcast %52 : vector<32x1xf32> to vector<32x32xf32>
    %54 = arith.mulf %49, %53 : vector<32x32xf32>
    %55 = arith.truncf %54 : vector<32x32xf32> to vector<32x32xbf16>
    %cst_24 = arith.constant dense<0.000000e+00> : vector<32x32xf32>
    %56 = tpu.matmul %55, %42, %cst_24 {dimension_numbers = #tpu.dot_dimension_numbers<[1], [0], [0], [1], [0, 0, 1, 1], [], []>} : vector<32x32xbf16>, vector<32x32xbf16>, vector<32x32xf32> -> vector<32x32xf32>
    %c0_25 = arith.constant 0 : index
    %c0_26 = arith.constant 0 : index
    %57 = vector.load %arg25[%c0_25, %c0_26] : memref<64x128xf32, #tpu.memory_space<vmem>>, vector<32x32xf32>
    tpu.vector_store %arg25[%c0_25, %c0_26], %56 {strides = array<i32>} : memref<64x128xf32, #tpu.memory_space<vmem>>, vector<32x32xf32>,
    %58 = vector.extract_strided_slice %38 {offsets = [0, 32], sizes = [32, 32], strides = [1, 1]} : vector<64x384xbf16> to vector<32x32xbf16>
    %59 = vector.extract_strided_slice %38 {offsets = [0, 160], sizes = [32, 32], strides = [1, 1]} : vector<64x384xbf16> to vector<32x32xbf16>
    %60 = vector.extract_strided_slice %38 {offsets = [0, 288], sizes = [32, 32], strides = [1, 1]} : vector<64x384xbf16> to vector<32x32xbf16>
    %cst_27 = arith.constant dense<0.000000e+00> : vector<32x32xf32>
    %61 = tpu.matmul %58, %59, %cst_27 {dimension_numbers = #tpu.dot_dimension_numbers<[1], [1], [0], [0], [0, 0, 1, 0], [], []>} : vector<32x32xbf16>, vector<32x32xbf16>, vector<32x32xf32> -> vector<32x32xf32>
    %62 = arith.addf %61, %39 : vector<32x32xf32>
    %cst_28 = arith.constant dense<0xFF800000> : vector<32xf32>
    %63 = vector.multi_reduction <maximumf>, %62, %cst_28 [1] : vector<32x32xf32> to vector<32xf32>
    %64 = vector.shape_cast %63 : vector<32xf32> to vector<32x1xf32>
    %65 = vector.broadcast %64 : vector<32x1xf32> to vector<32x32xf32>
    %66 = arith.subf %62, %65 : vector<32x32xf32>
    %67 = math.exp %66 : vector<32x32xf32>
    %cst_29 = arith.constant dense<0.000000e+00> : vector<32xf32>
    %68 = vector.multi_reduction <add>, %67, %cst_29 [1] : vector<32x32xf32> to vector<32xf32>
    %69 = vector.shape_cast %68 : vector<32xf32> to vector<32x1xf32>
    %70 = tpu.reciprocal %69 {approx = true} : vector<32x1xf32> -> vector<32x1xf32>
    %71 = vector.broadcast %70 : vector<32x1xf32> to vector<32x32xf32>
    %72 = arith.mulf %67, %71 : vector<32x32xf32>
    %73 = arith.truncf %72 : vector<32x32xf32> to vector<32x32xbf16>
    %cst_30 = arith.constant dense<0.000000e+00> : vector<32x32xf32>
    %74 = tpu.matmul %73, %60, %cst_30 {dimension_numbers = #tpu.dot_dimension_numbers<[1], [0], [0], [1], [0, 0, 1, 1], [], []>} : vector<32x32xbf16>, vector<32x32xbf16>, vector<32x32xf32> -> vector<32x32xf32>
    %c0_31 = arith.constant 0 : index
    %c32 = arith.constant 32 : index
    %75 = vector.load %arg25[%c0_31, %c32] : memref<64x128xf32, #tpu.memory_space<vmem>>, vector<32x32xf32>
    tpu.vector_store %arg25[%c0_31, %c32], %74 {strides = array<i32>} : memref<64x128xf32, #tpu.memory_space<vmem>>, vector<32x32xf32>,
    %76 = vector.extract_strided_slice %38 {offsets = [0, 64], sizes = [32, 32], strides = [1, 1]} : vector<64x384xbf16> to vector<32x32xbf16>
    %77 = vector.extract_strided_slice %38 {offsets = [0, 192], sizes = [32, 32], strides = [1, 1]} : vector<64x384xbf16> to vector<32x32xbf16>
    %78 = vector.extract_strided_slice %38 {offsets = [0, 320], sizes = [32, 32], strides = [1, 1]} : vector<64x384xbf16> to vector<32x32xbf16>
    %cst_32 = arith.constant dense<0.000000e+00> : vector<32x32xf32>
    %79 = tpu.matmul %76, %77, %cst_32 {dimension_numbers = #tpu.dot_dimension_numbers<[1], [1], [0], [0], [0, 0, 1, 0], [], []>} : vector<32x32xbf16>, vector<32x32xbf16>, vector<32x32xf32> -> vector<32x32xf32>
    %80 = arith.addf %79, %39 : vector<32x32xf32>
    %cst_33 = arith.constant dense<0xFF800000> : vector<32xf32>
    %81 = vector.multi_reduction <maximumf>, %80, %cst_33 [1] : vector<32x32xf32> to vector<32xf32>
    %82 = vector.shape_cast %81 : vector<32xf32> to vector<32x1xf32>
    %83 = vector.broadcast %82 : vector<32x1xf32> to vector<32x32xf32>
    %84 = arith.subf %80, %83 : vector<32x32xf32>
    %85 = math.exp %84 : vector<32x32xf32>
    %cst_34 = arith.constant dense<0.000000e+00> : vector<32xf32>
    %86 = vector.multi_reduction <add>, %85, %cst_34 [1] : vector<32x32xf32> to vector<32xf32>
    %87 = vector.shape_cast %86 : vector<32xf32> to vector<32x1xf32>
    %88 = tpu.reciprocal %87 {approx = true} : vector<32x1xf32> -> vector<32x1xf32>
    %89 = vector.broadcast %88 : vector<32x1xf32> to vector<32x32xf32>
    %90 = arith.mulf %85, %89 : vector<32x32xf32>
    %91 = arith.truncf %90 : vector<32x32xf32> to vector<32x32xbf16>
    %cst_35 = arith.constant dense<0.000000e+00> : vector<32x32xf32>
    %92 = tpu.matmul %91, %78, %cst_35 {dimension_numbers = #tpu.dot_dimension_numbers<[1], [0], [0], [1], [0, 0, 1, 1], [], []>} : vector<32x32xbf16>, vector<32x32xbf16>, vector<32x32xf32> -> vector<32x32xf32>
    %c0_36 = arith.constant 0 : index
    %c64 = arith.constant 64 : index
    %93 = vector.load %arg25[%c0_36, %c64] : memref<64x128xf32, #tpu.memory_space<vmem>>, vector<32x32xf32>
    tpu.vector_store %arg25[%c0_36, %c64], %92 {strides = array<i32>} : memref<64x128xf32, #tpu.memory_space<vmem>>, vector<32x32xf32>,
    %94 = vector.extract_strided_slice %38 {offsets = [0, 96], sizes = [32, 32], strides = [1, 1]} : vector<64x384xbf16> to vector<32x32xbf16>
    %95 = vector.extract_strided_slice %38 {offsets = [0, 224], sizes = [32, 32], strides = [1, 1]} : vector<64x384xbf16> to vector<32x32xbf16>
    %96 = vector.extract_strided_slice %38 {offsets = [0, 352], sizes = [32, 32], strides = [1, 1]} : vector<64x384xbf16> to vector<32x32xbf16>
    %cst_37 = arith.constant dense<0.000000e+00> : vector<32x32xf32>
    %97 = tpu.matmul %94, %95, %cst_37 {dimension_numbers = #tpu.dot_dimension_numbers<[1], [1], [0], [0], [0, 0, 1, 0], [], []>} : vector<32x32xbf16>, vector<32x32xbf16>, vector<32x32xf32> -> vector<32x32xf32>
    %98 = arith.addf %97, %39 : vector<32x32xf32>
    %cst_38 = arith.constant dense<0xFF800000> : vector<32xf32>
    %99 = vector.multi_reduction <maximumf>, %98, %cst_38 [1] : vector<32x32xf32> to vector<32xf32>
    %100 = vector.shape_cast %99 : vector<32xf32> to vector<32x1xf32>
    %101 = vector.broadcast %100 : vector<32x1xf32> to vector<32x32xf32>
    %102 = arith.subf %98, %101 : vector<32x32xf32>
    %103 = math.exp %102 : vector<32x32xf32>
    %cst_39 = arith.constant dense<0.000000e+00> : vector<32xf32>
    %104 = vector.multi_reduction <add>, %103, %cst_39 [1] : vector<32x32xf32> to vector<32xf32>
    %105 = vector.shape_cast %104 : vector<32xf32> to vector<32x1xf32>
    %106 = tpu.reciprocal %105 {approx = true} : vector<32x1xf32> -> vector<32x1xf32>
    %107 = vector.broadcast %106 : vector<32x1xf32> to vector<32x32xf32>
    %108 = arith.mulf %103, %107 : vector<32x32xf32>
    %109 = arith.truncf %108 : vector<32x32xf32> to vector<32x32xbf16>
    %cst_40 = arith.constant dense<0.000000e+00> : vector<32x32xf32>
    %110 = tpu.matmul %109, %96, %cst_40 {dimension_numbers = #tpu.dot_dimension_numbers<[1], [0], [0], [1], [0, 0, 1, 1], [], []>} : vector<32x32xbf16>, vector<32x32xbf16>, vector<32x32xf32> -> vector<32x32xf32>
    %c0_41 = arith.constant 0 : index
    %c96 = arith.constant 96 : index
    %111 = vector.load %arg25[%c0_41, %c96] : memref<64x128xf32, #tpu.memory_space<vmem>>, vector<32x32xf32>
    tpu.vector_store %arg25[%c0_41, %c96], %110 {strides = array<i32>} : memref<64x128xf32, #tpu.memory_space<vmem>>, vector<32x32xf32>,
    %112 = vector.extract_strided_slice %38 {offsets = [32, 0], sizes = [32, 32], strides = [1, 1]} : vector<64x384xbf16> to vector<32x32xbf16>
    %113 = vector.extract_strided_slice %38 {offsets = [32, 128], sizes = [32, 32], strides = [1, 1]} : vector<64x384xbf16> to vector<32x32xbf16>
    %114 = vector.extract_strided_slice %38 {offsets = [32, 256], sizes = [32, 32], strides = [1, 1]} : vector<64x384xbf16> to vector<32x32xbf16>
    %cst_42 = arith.constant dense<0.000000e+00> : vector<32x32xf32>
    %115 = tpu.matmul %112, %113, %cst_42 {dimension_numbers = #tpu.dot_dimension_numbers<[1], [1], [0], [0], [0, 0, 1, 0], [], []>} : vector<32x32xbf16>, vector<32x32xbf16>, vector<32x32xf32> -> vector<32x32xf32>
    %116 = arith.addf %115, %39 : vector<32x32xf32>
    %cst_43 = arith.constant dense<0xFF800000> : vector<32xf32>
    %117 = vector.multi_reduction <maximumf>, %116, %cst_43 [1] : vector<32x32xf32> to vector<32xf32>
    %118 = vector.shape_cast %117 : vector<32xf32> to vector<32x1xf32>
    %119 = vector.broadcast %118 : vector<32x1xf32> to vector<32x32xf32>
    %120 = arith.subf %116, %119 : vector<32x32xf32>
    %121 = math.exp %120 : vector<32x32xf32>
    %cst_44 = arith.constant dense<0.000000e+00> : vector<32xf32>
    %122 = vector.multi_reduction <add>, %121, %cst_44 [1] : vector<32x32xf32> to vector<32xf32>
    %123 = vector.shape_cast %122 : vector<32xf32> to vector<32x1xf32>
    %124 = tpu.reciprocal %123 {approx = true} : vector<32x1xf32> -> vector<32x1xf32>
    %125 = vector.broadcast %124 : vector<32x1xf32> to vector<32x32xf32>
    %126 = arith.mulf %121, %125 : vector<32x32xf32>
    %127 = arith.truncf %126 : vector<32x32xf32> to vector<32x32xbf16>
    %cst_45 = arith.constant dense<0.000000e+00> : vector<32x32xf32>
    %128 = tpu.matmul %127, %114, %cst_45 {dimension_numbers = #tpu.dot_dimension_numbers<[1], [0], [0], [1], [0, 0, 1, 1], [], []>} : vector<32x32xbf16>, vector<32x32xbf16>, vector<32x32xf32> -> vector<32x32xf32>
    %c32_46 = arith.constant 32 : index
    %c0_47 = arith.constant 0 : index
    %129 = vector.load %arg25[%c32_46, %c0_47] : memref<64x128xf32, #tpu.memory_space<vmem>>, vector<32x32xf32>
    tpu.vector_store %arg25[%c32_46, %c0_47], %128 {strides = array<i32>} : memref<64x128xf32, #tpu.memory_space<vmem>>, vector<32x32xf32>,
    %130 = vector.extract_strided_slice %38 {offsets = [32, 32], sizes = [32, 32], strides = [1, 1]} : vector<64x384xbf16> to vector<32x32xbf16>
    %131 = vector.extract_strided_slice %38 {offsets = [32, 160], sizes = [32, 32], strides = [1, 1]} : vector<64x384xbf16> to vector<32x32xbf16>
    %132 = vector.extract_strided_slice %38 {offsets = [32, 288], sizes = [32, 32], strides = [1, 1]} : vector<64x384xbf16> to vector<32x32xbf16>
    %cst_48 = arith.constant dense<0.000000e+00> : vector<32x32xf32>
    %133 = tpu.matmul %130, %131, %cst_48 {dimension_numbers = #tpu.dot_dimension_numbers<[1], [1], [0], [0], [0, 0, 1, 0], [], []>} : vector<32x32xbf16>, vector<32x32xbf16>, vector<32x32xf32> -> vector<32x32xf32>
    %134 = arith.addf %133, %39 : vector<32x32xf32>
    %cst_49 = arith.constant dense<0xFF800000> : vector<32xf32>
    %135 = vector.multi_reduction <maximumf>, %134, %cst_49 [1] : vector<32x32xf32> to vector<32xf32>
    %136 = vector.shape_cast %135 : vector<32xf32> to vector<32x1xf32>
    %137 = vector.broadcast %136 : vector<32x1xf32> to vector<32x32xf32>
    %138 = arith.subf %134, %137 : vector<32x32xf32>
    %139 = math.exp %138 : vector<32x32xf32>
    %cst_50 = arith.constant dense<0.000000e+00> : vector<32xf32>
    %140 = vector.multi_reduction <add>, %139, %cst_50 [1] : vector<32x32xf32> to vector<32xf32>
    %141 = vector.shape_cast %140 : vector<32xf32> to vector<32x1xf32>
    %142 = tpu.reciprocal %141 {approx = true} : vector<32x1xf32> -> vector<32x1xf32>
    %143 = vector.broadcast %142 : vector<32x1xf32> to vector<32x32xf32>
    %144 = arith.mulf %139, %143 : vector<32x32xf32>
    %145 = arith.truncf %144 : vector<32x32xf32> to vector<32x32xbf16>
    %cst_51 = arith.constant dense<0.000000e+00> : vector<32x32xf32>
    %146 = tpu.matmul %145, %132, %cst_51 {dimension_numbers = #tpu.dot_dimension_numbers<[1], [0], [0], [1], [0, 0, 1, 1], [], []>} : vector<32x32xbf16>, vector<32x32xbf16>, vector<32x32xf32> -> vector<32x32xf32>
    %c32_52 = arith.constant 32 : index
    %c32_53 = arith.constant 32 : index
    %147 = vector.load %arg25[%c32_52, %c32_53] : memref<64x128xf32, #tpu.memory_space<vmem>>, vector<32x32xf32>
    tpu.vector_store %arg25[%c32_52, %c32_53], %146 {strides = array<i32>} : memref<64x128xf32, #tpu.memory_space<vmem>>, vector<32x32xf32>,
    %148 = vector.extract_strided_slice %38 {offsets = [32, 64], sizes = [32, 32], strides = [1, 1]} : vector<64x384xbf16> to vector<32x32xbf16>
    %149 = vector.extract_strided_slice %38 {offsets = [32, 192], sizes = [32, 32], strides = [1, 1]} : vector<64x384xbf16> to vector<32x32xbf16>
    %150 = vector.extract_strided_slice %38 {offsets = [32, 320], sizes = [32, 32], strides = [1, 1]} : vector<64x384xbf16> to vector<32x32xbf16>
    %cst_54 = arith.constant dense<0.000000e+00> : vector<32x32xf32>
    %151 = tpu.matmul %148, %149, %cst_54 {dimension_numbers = #tpu.dot_dimension_numbers<[1], [1], [0], [0], [0, 0, 1, 0], [], []>} : vector<32x32xbf16>, vector<32x32xbf16>, vector<32x32xf32> -> vector<32x32xf32>
    %152 = arith.addf %151, %39 : vector<32x32xf32>
    %cst_55 = arith.constant dense<0xFF800000> : vector<32xf32>
    %153 = vector.multi_reduction <maximumf>, %152, %cst_55 [1] : vector<32x32xf32> to vector<32xf32>
    %154 = vector.shape_cast %153 : vector<32xf32> to vector<32x1xf32>
    %155 = vector.broadcast %154 : vector<32x1xf32> to vector<32x32xf32>
    %156 = arith.subf %152, %155 : vector<32x32xf32>
    %157 = math.exp %156 : vector<32x32xf32>
    %cst_56 = arith.constant dense<0.000000e+00> : vector<32xf32>
    %158 = vector.multi_reduction <add>, %157, %cst_56 [1] : vector<32x32xf32> to vector<32xf32>
    %159 = vector.shape_cast %158 : vector<32xf32> to vector<32x1xf32>
    %160 = tpu.reciprocal %159 {approx = true} : vector<32x1xf32> -> vector<32x1xf32>
    %161 = vector.broadcast %160 : vector<32x1xf32> to vector<32x32xf32>
    %162 = arith.mulf %157, %161 : vector<32x32xf32>
    %163 = arith.truncf %162 : vector<32x32xf32> to vector<32x32xbf16>
    %cst_57 = arith.constant dense<0.000000e+00> : vector<32x32xf32>
    %164 = tpu.matmul %163, %150, %cst_57 {dimension_numbers = #tpu.dot_dimension_numbers<[1], [0], [0], [1], [0, 0, 1, 1], [], []>} : vector<32x32xbf16>, vector<32x32xbf16>, vector<32x32xf32> -> vector<32x32xf32>
    %c32_58 = arith.constant 32 : index
    %c64_59 = arith.constant 64 : index
    %165 = vector.load %arg25[%c32_58, %c64_59] : memref<64x128xf32, #tpu.memory_space<vmem>>, vector<32x32xf32>
    tpu.vector_store %arg25[%c32_58, %c64_59], %164 {strides = array<i32>} : memref<64x128xf32, #tpu.memory_space<vmem>>, vector<32x32xf32>,
    %166 = vector.extract_strided_slice %38 {offsets = [32, 96], sizes = [32, 32], strides = [1, 1]} : vector<64x384xbf16> to vector<32x32xbf16>
    %167 = vector.extract_strided_slice %38 {offsets = [32, 224], sizes = [32, 32], strides = [1, 1]} : vector<64x384xbf16> to vector<32x32xbf16>
    %168 = vector.extract_strided_slice %38 {offsets = [32, 352], sizes = [32, 32], strides = [1, 1]} : vector<64x384xbf16> to vector<32x32xbf16>
    %cst_60 = arith.constant dense<0.000000e+00> : vector<32x32xf32>
    %169 = tpu.matmul %166, %167, %cst_60 {dimension_numbers = #tpu.dot_dimension_numbers<[1], [1], [0], [0], [0, 0, 1, 0], [], []>} : vector<32x32xbf16>, vector<32x32xbf16>, vector<32x32xf32> -> vector<32x32xf32>
    %170 = arith.addf %169, %39 : vector<32x32xf32>
    %cst_61 = arith.constant dense<0xFF800000> : vector<32xf32>
    %171 = vector.multi_reduction <maximumf>, %170, %cst_61 [1] : vector<32x32xf32> to vector<32xf32>
    %172 = vector.shape_cast %171 : vector<32xf32> to vector<32x1xf32>
    %173 = vector.broadcast %172 : vector<32x1xf32> to vector<32x32xf32>
    %174 = arith.subf %170, %173 : vector<32x32xf32>
    %175 = math.exp %174 : vector<32x32xf32>
    %cst_62 = arith.constant dense<0.000000e+00> : vector<32xf32>
    %176 = vector.multi_reduction <add>, %175, %cst_62 [1] : vector<32x32xf32> to vector<32xf32>
    %177 = vector.shape_cast %176 : vector<32xf32> to vector<32x1xf32>
    %178 = tpu.reciprocal %177 {approx = true} : vector<32x1xf32> -> vector<32x1xf32>
    %179 = vector.broadcast %178 : vector<32x1xf32> to vector<32x32xf32>
    %180 = arith.mulf %175, %179 : vector<32x32xf32>
    %181 = arith.truncf %180 : vector<32x32xf32> to vector<32x32xbf16>
    %cst_63 = arith.constant dense<0.000000e+00> : vector<32x32xf32>
    %182 = tpu.matmul %181, %168, %cst_63 {dimension_numbers = #tpu.dot_dimension_numbers<[1], [0], [0], [1], [0, 0, 1, 1], [], []>} : vector<32x32xbf16>, vector<32x32xbf16>, vector<32x32xf32> -> vector<32x32xf32>
    %c32_64 = arith.constant 32 : index
    %c96_65 = arith.constant 96 : index
    %183 = vector.load %arg25[%c32_64, %c96_65] : memref<64x128xf32, #tpu.memory_space<vmem>>, vector<32x32xf32>
    tpu.vector_store %arg25[%c32_64, %c96_65], %182 {strides = array<i32>} : memref<64x128xf32, #tpu.memory_space<vmem>>, vector<32x32xf32>,
    %c0_66 = arith.constant 0 : index
    %c0_67 = arith.constant 0 : index
    %184 = vector.load %arg25[%c0_66, %c0_67] : memref<64x128xf32, #tpu.memory_space<vmem>>, vector<64x128xf32>
    %185 = arith.truncf %184 : vector<64x128xf32> to vector<64x128xbf16>
    %c0_68 = arith.constant 0 : index
    %c0_69 = arith.constant 0 : index
    %c0_70 = arith.constant 0 : index
    %186 = vector.load %arg12[%c0_68, %c0_69, %c0_70] : memref<1x128x128xbf16, #tpu.memory_space<vmem>>, vector<1x128x128xbf16>
    %187 = vector.shape_cast %186 : vector<1x128x128xbf16> to vector<128x128xbf16>
    %cst_71 = arith.constant dense<0.000000e+00> : vector<64x128xf32>
    %188 = tpu.matmul %185, %187, %cst_71 {dimension_numbers = #tpu.dot_dimension_numbers<[1], [0], [0], [1], [0, 0, 1, 1], [], []>} : vector<64x128xbf16>, vector<128x128xbf16>, vector<64x128xf32> -> vector<64x128xf32>
    %c0_72 = arith.constant 0 : index
    %c0_73 = arith.constant 0 : index
    %c0_74 = arith.constant 0 : index
    %189 = vector.load %arg13[%c0_72, %c0_73, %c0_74] : memref<1x1x128xf32, #tpu.memory_space<vmem>>, vector<1x1x128xf32>
    %190 = vector.shape_cast %189 : vector<1x1x128xf32> to vector<1x128xf32>
    %191 = vector.broadcast %190 : vector<1x128xf32> to vector<64x128xf32>
    %192 = arith.addf %188, %191 : vector<64x128xf32>
    %193 = arith.addf %3, %192 : vector<64x128xf32>
    %c0_75 = arith.constant 0 : index
    %c0_76 = arith.constant 0 : index
    %c0_77 = arith.constant 0 : index
    %194 = vector.load %arg14[%c0_75, %c0_76, %c0_77] : memref<1x1x128xf32, #tpu.memory_space<vmem>>, vector<1x1x128xf32>
    %195 = vector.shape_cast %194 : vector<1x1x128xf32> to vector<1x128xf32>
    %c0_78 = arith.constant 0 : index
    %c0_79 = arith.constant 0 : index
    %c0_80 = arith.constant 0 : index
    %196 = vector.load %arg15[%c0_78, %c0_79, %c0_80] : memref<1x1x128xf32, #tpu.memory_space<vmem>>, vector<1x1x128xf32>
    %197 = vector.shape_cast %196 : vector<1x1x128xf32> to vector<1x128xf32>
    %cst_81 = arith.constant dense<0.000000e+00> : vector<64xf32>
    %198 = vector.multi_reduction <add>, %193, %cst_81 [1] : vector<64x128xf32> to vector<64xf32>
    %199 = vector.shape_cast %198 : vector<64xf32> to vector<64x1xf32>
    %cst_82 = arith.constant 1.280000e+02 : f32
    %200 = vector.broadcast %cst_82 : f32 to vector<64x1xf32>
    %201 = arith.divf %199, %200 : vector<64x1xf32>
    %202 = vector.broadcast %201 : vector<64x1xf32> to vector<64x128xf32>
    %203 = arith.subf %193, %202 : vector<64x128xf32>
    %204 = arith.mulf %203, %203 : vector<64x128xf32>
    %cst_83 = arith.constant dense<0.000000e+00> : vector<64xf32>
    %205 = vector.multi_reduction <add>, %204, %cst_83 [1] : vector<64x128xf32> to vector<64xf32>
    %206 = vector.shape_cast %205 : vector<64xf32> to vector<64x1xf32>
    %cst_84 = arith.constant 1.280000e+02 : f32
    %207 = vector.broadcast %cst_84 : f32 to vector<64x1xf32>
    %208 = arith.divf %206, %207 : vector<64x1xf32>
    %209 = vector.broadcast %201 : vector<64x1xf32> to vector<64x128xf32>
    %210 = arith.subf %193, %209 : vector<64x128xf32>
    %cst_85 = arith.constant 9.99999974E-6 : f32
    %211 = vector.broadcast %cst_85 : f32 to vector<64x1xf32>
    %212 = arith.addf %208, %211 : vector<64x1xf32>
    %213 = math.rsqrt %212 : vector<64x1xf32>
    %214 = vector.broadcast %213 : vector<64x1xf32> to vector<64x128xf32>
    %215 = arith.mulf %210, %214 : vector<64x128xf32>
    %216 = vector.broadcast %195 : vector<1x128xf32> to vector<64x128xf32>
    %217 = arith.mulf %215, %216 : vector<64x128xf32>
    %218 = vector.broadcast %197 : vector<1x128xf32> to vector<64x128xf32>
    %219 = arith.addf %217, %218 : vector<64x128xf32>
    %220 = arith.truncf %219 : vector<64x128xf32> to vector<64x128xbf16>
    %c0_86 = arith.constant 0 : index
    %c0_87 = arith.constant 0 : index
    %c0_88 = arith.constant 0 : index
    %221 = vector.load %arg16[%c0_86, %c0_87, %c0_88] : memref<1x128x512xbf16, #tpu.memory_space<vmem>>, vector<1x128x512xbf16>
    %222 = vector.shape_cast %221 : vector<1x128x512xbf16> to vector<128x512xbf16>
    %cst_89 = arith.constant dense<0.000000e+00> : vector<64x512xf32>
    %223 = tpu.matmul %220, %222, %cst_89 {dimension_numbers = #tpu.dot_dimension_numbers<[1], [0], [0], [1], [0, 0, 1, 1], [], []>} : vector<64x128xbf16>, vector<128x512xbf16>, vector<64x512xf32> -> vector<64x512xf32>
    %c0_90 = arith.constant 0 : index
    %c0_91 = arith.constant 0 : index
    %c0_92 = arith.constant 0 : index
    %224 = vector.load %arg17[%c0_90, %c0_91, %c0_92] : memref<1x1x512xf32, #tpu.memory_space<vmem>>, vector<1x1x512xf32>
    %225 = vector.shape_cast %224 : vector<1x1x512xf32> to vector<1x512xf32>
    %226 = vector.broadcast %225 : vector<1x512xf32> to vector<64x512xf32>
    %227 = arith.addf %223, %226 : vector<64x512xf32>
    %228 = arith.mulf %227, %227 : vector<64x512xf32>
    %229 = arith.mulf %227, %228 : vector<64x512xf32>
    %cst_93 = arith.constant 4.471500e-02 : f32
    %230 = vector.broadcast %cst_93 : f32 to vector<64x512xf32>
    %231 = arith.mulf %230, %229 : vector<64x512xf32>
    %232 = arith.addf %227, %231 : vector<64x512xf32>
    %cst_94 = arith.constant 0.797884583 : f32
    %233 = vector.broadcast %cst_94 : f32 to vector<64x512xf32>
    %234 = arith.mulf %233, %232 : vector<64x512xf32>
    %235 = math.tanh %234 : vector<64x512xf32>
    %cst_95 = arith.constant 1.000000e+00 : f32
    %236 = vector.broadcast %cst_95 : f32 to vector<64x512xf32>
    %237 = arith.addf %236, %235 : vector<64x512xf32>
    %cst_96 = arith.constant 5.000000e-01 : f32
    %238 = vector.broadcast %cst_96 : f32 to vector<64x512xf32>
    %239 = arith.mulf %238, %237 : vector<64x512xf32>
    %240 = arith.mulf %227, %239 : vector<64x512xf32>
    %241 = arith.truncf %240 : vector<64x512xf32> to vector<64x512xbf16>
    %c0_97 = arith.constant 0 : index
    %c0_98 = arith.constant 0 : index
    %c0_99 = arith.constant 0 : index
    %242 = vector.load %arg18[%c0_97, %c0_98, %c0_99] : memref<1x512x128xbf16, #tpu.memory_space<vmem>>, vector<1x512x128xbf16>
    %243 = vector.shape_cast %242 : vector<1x512x128xbf16> to vector<512x128xbf16>
    %cst_100 = arith.constant dense<0.000000e+00> : vector<64x128xf32>
    %244 = tpu.matmul %241, %243, %cst_100 {dimension_numbers = #tpu.dot_dimension_numbers<[1], [0], [0], [1], [0, 0, 1, 1], [], []>} : vector<64x512xbf16>, vector<512x128xbf16>, vector<64x128xf32> -> vector<64x128xf32>
    %c0_101 = arith.constant 0 : index
    %c0_102 = arith.constant 0 : index
    %c0_103 = arith.constant 0 : index
    %245 = vector.load %arg19[%c0_101, %c0_102, %c0_103] : memref<1x1x128xf32, #tpu.memory_space<vmem>>, vector<1x1x128xf32>
    %246 = vector.shape_cast %245 : vector<1x1x128xf32> to vector<1x128xf32>
    %247 = vector.broadcast %246 : vector<1x128xf32> to vector<64x128xf32>
    %248 = arith.addf %244, %247 : vector<64x128xf32>
    %249 = arith.addf %193, %248 : vector<64x128xf32>
    %c0_104 = arith.constant 0 : index
    %c0_105 = arith.constant 0 : index
    %250 = vector.load %arg24[%c0_104, %c0_105] : memref<64x128xf32, #tpu.memory_space<vmem>>, vector<64x128xf32>
    tpu.vector_store %arg24[%c0_104, %c0_105], %249 {strides = array<i32>} : memref<64x128xf32, #tpu.memory_space<vmem>>, vector<64x128xf32>,
    %c1_i32 = arith.constant 1 : i32
    %251 = arith.cmpi eq, %arg1, %c1_i32 : i32
    %252 = arith.extui %251 : i1 to i32
    %c0_i32_106 = arith.constant 0 : i32
    %253 = arith.cmpi ne, %252, %c0_i32_106 : i32
    scf.if %253 {
      %254 = vector.extract_strided_slice %249 {offsets = [0, 0], sizes = [1, 128], strides = [1, 1]} : vector<64x128xf32> to vector<1x128xf32>
      %255 = vector.extract_strided_slice %249 {offsets = [32, 0], sizes = [1, 128], strides = [1, 1]} : vector<64x128xf32> to vector<1x128xf32>
      %256 = tpu.concatenate %254, %255 in 0 : vector<1x128xf32>, vector<1x128xf32> -> vector<2x128xf32>
      %c0_107 = arith.constant 0 : index
      %c0_108 = arith.constant 0 : index
      %257 = vector.load %arg20[%c0_107, %c0_108] : memref<1x128xf32, #tpu.memory_space<vmem>>, vector<1x128xf32>
      %c0_109 = arith.constant 0 : index
      %c0_110 = arith.constant 0 : index
      %258 = vector.load %arg21[%c0_109, %c0_110] : memref<1x128xf32, #tpu.memory_space<vmem>>, vector<1x128xf32>
      %cst_111 = arith.constant dense<0.000000e+00> : vector<2xf32>
      %259 = vector.multi_reduction <add>, %256, %cst_111 [1] : vector<2x128xf32> to vector<2xf32>
      %260 = vector.shape_cast %259 : vector<2xf32> to vector<2x1xf32>
      %cst_112 = arith.constant 1.280000e+02 : f32
      %261 = vector.broadcast %cst_112 : f32 to vector<2x1xf32>
      %262 = arith.divf %260, %261 : vector<2x1xf32>
      %263 = vector.broadcast %262 : vector<2x1xf32> to vector<2x128xf32>
      %264 = arith.subf %256, %263 : vector<2x128xf32>
      %265 = arith.mulf %264, %264 : vector<2x128xf32>
      %cst_113 = arith.constant dense<0.000000e+00> : vector<2xf32>
      %266 = vector.multi_reduction <add>, %265, %cst_113 [1] : vector<2x128xf32> to vector<2xf32>
      %267 = vector.shape_cast %266 : vector<2xf32> to vector<2x1xf32>
      %cst_114 = arith.constant 1.280000e+02 : f32
      %268 = vector.broadcast %cst_114 : f32 to vector<2x1xf32>
      %269 = arith.divf %267, %268 : vector<2x1xf32>
      %270 = vector.broadcast %262 : vector<2x1xf32> to vector<2x128xf32>
      %271 = arith.subf %256, %270 : vector<2x128xf32>
      %cst_115 = arith.constant 9.99999974E-6 : f32
      %272 = vector.broadcast %cst_115 : f32 to vector<2x1xf32>
      %273 = arith.addf %269, %272 : vector<2x1xf32>
      %274 = math.rsqrt %273 : vector<2x1xf32>
      %275 = vector.broadcast %274 : vector<2x1xf32> to vector<2x128xf32>
      %276 = arith.mulf %271, %275 : vector<2x128xf32>
      %277 = vector.broadcast %257 : vector<1x128xf32> to vector<2x128xf32>
      %278 = arith.mulf %276, %277 : vector<2x128xf32>
      %279 = vector.broadcast %258 : vector<1x128xf32> to vector<2x128xf32>
      %280 = arith.addf %278, %279 : vector<2x128xf32>
      %281 = arith.truncf %280 : vector<2x128xf32> to vector<2x128xbf16>
      %c0_116 = arith.constant 0 : index
      %c0_117 = arith.constant 0 : index
      %282 = vector.load %arg22[%c0_116, %c0_117] : memref<128x128xbf16, #tpu.memory_space<vmem>>, vector<128x128xbf16>
      %cst_118 = arith.constant dense<0.000000e+00> : vector<2x128xf32>
      %283 = tpu.matmul %281, %282, %cst_118 {dimension_numbers = #tpu.dot_dimension_numbers<[1], [0], [0], [1], [0, 0, 1, 1], [], []>} : vector<2x128xbf16>, vector<128x128xbf16>, vector<2x128xf32> -> vector<2x128xf32>
      %c0_119 = arith.constant 0 : index
      %c0_120 = arith.constant 0 : index
      %284 = vector.load %arg23[%c0_119, %c0_120] : memref<2x128xf32, #tpu.memory_space<vmem>>, vector<2x128xf32>
      tpu.vector_store %arg23[%c0_119, %c0_120], %283 {strides = array<i32>} : memref<2x128xf32, #tpu.memory_space<vmem>>, vector<2x128xf32>,
    } else {
    }
    return
  }
  func.func @transform_0(%arg0: i32, %arg1: i32) -> (i32, i32) {
    %c0_i32 = arith.constant 0 : i32
    %c0_i32_0 = arith.constant 0 : i32
    return %arg0, %c0_i32 : i32, i32
  }
  func.func @transform_1(%arg0: i32, %arg1: i32) -> (i32, i32) {
    %c0_i32 = arith.constant 0 : i32
    %c0_i32_0 = arith.constant 0 : i32
    %c0_i32_1 = arith.constant 0 : i32
    return %c0_i32, %c0_i32_0 : i32, i32
  }
  func.func @transform_2(%arg0: i32, %arg1: i32) -> (i32, i32) {
    %c0_i32 = arith.constant 0 : i32
    %c0_i32_0 = arith.constant 0 : i32
    %c0_i32_1 = arith.constant 0 : i32
    return %c0_i32, %c0_i32_0 : i32, i32
  }
  func.func @transform_3(%arg0: i32, %arg1: i32) -> (i32, i32) {
    %c0_i32 = arith.constant 0 : i32
    %c0_i32_0 = arith.constant 0 : i32
    %c0_i32_1 = arith.constant 0 : i32
    return %c0_i32, %c0_i32_0 : i32, i32
  }
  func.func @transform_4(%arg0: i32, %arg1: i32) -> (i32, i32) {
    %c0_i32 = arith.constant 0 : i32
    %c0_i32_0 = arith.constant 0 : i32
    %c0_i32_1 = arith.constant 0 : i32
    return %c0_i32, %c0_i32_0 : i32, i32
  }
  func.func @transform_5(%arg0: i32, %arg1: i32) -> (i32, i32) {
    %c0_i32 = arith.constant 0 : i32
    %c0_i32_0 = arith.constant 0 : i32
    %c0_i32_1 = arith.constant 0 : i32
    return %c0_i32, %c0_i32_0 : i32, i32
  }
  func.func @transform_6(%arg0: i32, %arg1: i32) -> (i32, i32, i32) {
    %c0_i32 = arith.constant 0 : i32
    %c0_i32_0 = arith.constant 0 : i32
    %c0_i32_1 = arith.constant 0 : i32
    return %arg1, %c0_i32, %c0_i32_0 : i32, i32, i32
  }
  func.func @transform_7(%arg0: i32, %arg1: i32) -> (i32, i32, i32) {
    %c0_i32 = arith.constant 0 : i32
    %c0_i32_0 = arith.constant 0 : i32
    %c0_i32_1 = arith.constant 0 : i32
    return %arg1, %c0_i32, %c0_i32_0 : i32, i32, i32
  }
  func.func @transform_8(%arg0: i32, %arg1: i32) -> (i32, i32, i32) {
    %c0_i32 = arith.constant 0 : i32
    %c0_i32_0 = arith.constant 0 : i32
    %c0_i32_1 = arith.constant 0 : i32
    return %arg1, %c0_i32, %c0_i32_0 : i32, i32, i32
  }
  func.func @transform_9(%arg0: i32, %arg1: i32) -> (i32, i32, i32) {
    %c0_i32 = arith.constant 0 : i32
    %c0_i32_0 = arith.constant 0 : i32
    %c0_i32_1 = arith.constant 0 : i32
    return %arg1, %c0_i32, %c0_i32_0 : i32, i32, i32
  }
  func.func @transform_10(%arg0: i32, %arg1: i32) -> (i32, i32, i32) {
    %c0_i32 = arith.constant 0 : i32
    %c0_i32_0 = arith.constant 0 : i32
    %c0_i32_1 = arith.constant 0 : i32
    return %arg1, %c0_i32, %c0_i32_0 : i32, i32, i32
  }
  func.func @transform_11(%arg0: i32, %arg1: i32) -> (i32, i32, i32) {
    %c0_i32 = arith.constant 0 : i32
    %c0_i32_0 = arith.constant 0 : i32
    %c0_i32_1 = arith.constant 0 : i32
    return %arg1, %c0_i32, %c0_i32_0 : i32, i32, i32
  }
  func.func @transform_12(%arg0: i32, %arg1: i32) -> (i32, i32, i32) {
    %c0_i32 = arith.constant 0 : i32
    %c0_i32_0 = arith.constant 0 : i32
    %c0_i32_1 = arith.constant 0 : i32
    return %arg1, %c0_i32, %c0_i32_0 : i32, i32, i32
  }
  func.func @transform_13(%arg0: i32, %arg1: i32) -> (i32, i32, i32) {
    %c0_i32 = arith.constant 0 : i32
    %c0_i32_0 = arith.constant 0 : i32
    %c0_i32_1 = arith.constant 0 : i32
    return %arg1, %c0_i32, %c0_i32_0 : i32, i32, i32
  }
  func.func @transform_14(%arg0: i32, %arg1: i32) -> (i32, i32, i32) {
    %c0_i32 = arith.constant 0 : i32
    %c0_i32_0 = arith.constant 0 : i32
    %c0_i32_1 = arith.constant 0 : i32
    return %arg1, %c0_i32, %c0_i32_0 : i32, i32, i32
  }
  func.func @transform_15(%arg0: i32, %arg1: i32) -> (i32, i32, i32) {
    %c0_i32 = arith.constant 0 : i32
    %c0_i32_0 = arith.constant 0 : i32
    %c0_i32_1 = arith.constant 0 : i32
    return %arg1, %c0_i32, %c0_i32_0 : i32, i32, i32
  }
  func.func @transform_16(%arg0: i32, %arg1: i32) -> (i32, i32, i32) {
    %c0_i32 = arith.constant 0 : i32
    %c0_i32_0 = arith.constant 0 : i32
    %c0_i32_1 = arith.constant 0 : i32
    return %arg1, %c0_i32, %c0_i32_0 : i32, i32, i32
  }
  func.func @transform_17(%arg0: i32, %arg1: i32) -> (i32, i32, i32) {
    %c0_i32 = arith.constant 0 : i32
    %c0_i32_0 = arith.constant 0 : i32
    %c0_i32_1 = arith.constant 0 : i32
    return %arg1, %c0_i32, %c0_i32_0 : i32, i32, i32
  }
  func.func @transform_18(%arg0: i32, %arg1: i32) -> (i32, i32) {
    %c0_i32 = arith.constant 0 : i32
    %c0_i32_0 = arith.constant 0 : i32
    %c0_i32_1 = arith.constant 0 : i32
    return %c0_i32, %c0_i32_0 : i32, i32
  }
  func.func @transform_19(%arg0: i32, %arg1: i32) -> (i32, i32) {
    %c0_i32 = arith.constant 0 : i32
    %c0_i32_0 = arith.constant 0 : i32
    %c0_i32_1 = arith.constant 0 : i32
    return %c0_i32, %c0_i32_0 : i32, i32
  }
  func.func @transform_20(%arg0: i32, %arg1: i32) -> (i32, i32) {
    %c0_i32 = arith.constant 0 : i32
    %c0_i32_0 = arith.constant 0 : i32
    %c0_i32_1 = arith.constant 0 : i32
    return %c0_i32, %c0_i32_0 : i32, i32
  }
  func.func @transform_21(%arg0: i32, %arg1: i32) -> (i32, i32) {
    %c0_i32 = arith.constant 0 : i32
    %c0_i32_0 = arith.constant 0 : i32
    return %arg0, %c0_i32 : i32, i32
  }
}

</mosaic_0001>

<bundles_post_ra>
// kernel: encode_image.1
= control target key start
LH: loop header
LB: loop body
LE: loop exit
PB: predicated region body
PF: predicated region fallthrough
CT: control target
= control target key end

     0   :  { %s7464_s0 = inlined_call_operand.vmem [shape: f32[64,192], index: 0, kind: input, shape index: {}]   ;;  %s7465_s1 = inlined_call_operand.vmem [shape: bf16[192,128], index: 1, kind: input, shape index: {}]   ;;  %s7466_s2 = inlined_call_operand.vmem [shape: f32[64,128], index: 2, kind: input, shape index: {}]   ;;  %s7467_s3 = inlined_call_operand.vmem [shape: f32[1,128], index: 3, kind: input, shape index: {}, may-alias: {3,18}]   ;;  %s7468_s4 = inlined_call_operand.vmem [shape: f32[1,128], index: 4, kind: input, shape index: {}, may-alias: {4,19}]   ;;  %s7469_s5 = inlined_call_operand.vmem [shape: f32[32,32], index: 5, kind: input, shape index: {}]   ;;  %s7470_s6 = inlined_call_operand.vmem [shape: f32[2,1,128], index: 6, kind: input, shape index: {}, may-alias: {6,12}]   ;;  %s7471_s7 = inlined_call_operand.vmem [shape: f32[2,1,128], index: 7, kind: input, shape index: {}, may-alias: {7,11,13,17}]   ;;  %s7472_s8 = inlined_call_operand.vmem [shape: bf16[2,128,384], index: 8, kind: input, shape index: {}]   ;;  %s7473_s9 = inlined_call_operand.vmem [shape: f32[2,1,384], index: 9, kind: input, shape index: {}]   ;;  %s7474_s10 = inlined_call_operand.vmem [shape: bf16[2,128,128], index: 10, kind: input, shape index: {}]   ;;  %s7475_s11 = inlined_call_operand.vmem [shape: f32[2,1,128], index: 11, kind: input, shape index: {}, may-alias: {7,11,13,17}]   ;;  %s7476_s12 = inlined_call_operand.vmem [shape: f32[2,1,128], index: 12, kind: input, shape index: {}, may-alias: {6,12}]   ;;  %s7477_s13 = inlined_call_operand.vmem [shape: f32[2,1,128], index: 13, kind: input, shape index: {}, may-alias: {7,11,13,17}]   ;;  %s7478_s14 = inlined_call_operand.vmem [shape: bf16[2,128,512], index: 14, kind: input, shape index: {}]   ;;  %s7479_s15 = inlined_call_operand.vmem [shape: f32[2,1,512], index: 15, kind: input, shape index: {}]   ;;  %s7480_s16 = inlined_call_operand.vmem [shape: bf16[2,512,128], index: 16, kind: input, shape index: {}]   ;;  %s7481_s17 = inlined_call_operand.vmem [shape: f32[2,1,128], index: 17, kind: input, shape index: {}, may-alias: {7,11,13,17}]   ;;  %s7482_s18 = inlined_call_operand.vmem [shape: f32[1,128], index: 18, kind: input, shape index: {}, may-alias: {3,18}]   ;;  %s7483_s19 = inlined_call_operand.vmem [shape: f32[1,128], index: 19, kind: input, shape index: {}, may-alias: {4,19}]   ;;  %s7484_s20 = inlined_call_operand.vmem [shape: bf16[128,128], index: 20, kind: input, shape index: {}]   ;;  %s7485_s21 = inlined_call_operand.hbm [shape: f32[2,128], index: 21, kind: output, shape index: {}]  }
   0x1   :  { %7493 = sst [smem:[#allocation10_spill]] %s7464_s0 }
   0x2   :  { %7494 = sst [smem:[#allocation11_spill]] %s7465_s1 }
   0x3   :  { %7495 = sst [smem:[#allocation12_spill]] %s7466_s2 }
   0x4   :  { %7496 = sst [smem:[#allocation13_spill]] %s7467_s3 }
   0x5   :  { %7497 = sst [smem:[#allocation14_spill]] %s7468_s4 }
   0x6   :  { %7498 = sst [smem:[#allocation15_spill]] %s7469_s5 }
   0x7   :  { %7499 = sst [smem:[#allocation16_spill]] %s7472_s8 }
   0x8   :  { %7500 = sst [smem:[#allocation17_spill]] %s7474_s10 }
   0x9   :  { %7501 = sst [smem:[#allocation18_spill]] %s7482_s18 }
   0xa   :  { %7502 = sst [smem:[#allocation19_spill]] %s7483_s19 }
   0xb   :  { %7503 = sst [smem:[#allocation20_spill]] %s7484_s20 }
   0xc   :  { %7504 = sst [smem:[#allocation21_spill]] %s7485_s21 }
   0xd   :  { %26 = vsyncpa [#allocation5], 0  ;;  %s6072_s2 = smov 0   ;;  %s6074_s25 = smov 0  }
   0xe   :  { %s6076_s26 = smov 0  }
   0xf LB: > { %7505 = sst [smem:[#allocation7_spill]] %s5948_s25  ;;  %s41_s3 = sadd.s32 1, %s5948_s25  ;;  %s5952_s26 = sphi %s6076_s26, %s32_s26   ;;  %s5948_s25 = sphi %s6074_s25, %s7530_s25   ;;  %s5944_s2 = sphi %s6072_s2, %s7529_s2  }
  0x10   : > { %7506 = sst [smem:[#allocation8_spill]] %s5952_s26  ;;  %p42_p0 = scmp.ge.s32.totalorder %s41_s3, 2 }
  0x11   : > { %p4875_p1 = scmp.ge.s32.totalorder %s5952_s26, 1  ;;  %p708_p2 = scmp.lt.s32.totalorder %s5952_s26, 3 }
  0x12   : > { %s7532_s3 = smov (%p42_p0, %s41_s3), 0 }
  0x13   : > { %7507 = sst [smem:[#allocation9_spill]] %s7532_s3  ;;  %p709_p3 = pnand %p4875_p1, %p708_p2 }
  0x14   : > { %p817_p4 = scmp.lt.s32.totalorder (!%p709_p3), %s5944_s2, 1  ;;  %s7508_s10 = sld [smem:[#allocation17_spill]] (!%p709_p3) }
  0x15   : > { %712 = sbr.rel (%p709_p3) target bundleno = 6817 (0x1aa1), region = 104  ;;  %s7509_s8 = sld [smem:[#allocation16_spill]] (!%p709_p3) }
  0x16   : > { %p4884_p5 = scmp.ne.s32.totalorder (!%p709_p3), %s5944_s2, 0 }
  0x1a   : > { %s6095_s28 = scalar_select %p817_p4, %s5944_s2, 1 }
  0x1b   : > { %s7511_s3 = sld [smem:[#allocation10_spill]] (!%p4884_p5) }
  0x1c   : > { %s5468_s23 = smul.u32 192, %s6095_s28  ;;  %s5052_s1 = sshll.u32 %s6095_s28, 6 }
  0x1d   : > { %s5469_s24 = smul.u32 3, %s6095_s28  ;;  %s6111_s0 = scalar_lea.vmem %s7508_s10, %s5052_s1 }
  0x1e   : > { %s6116_s21 = scalar_lea.vmem %s7509_s8, %s5468_s23  ;;  %s842_s27 = scalar_lea.vmem %s7476_s12, %s6095_s28 }
  0x1f   : > { %s6125_s22 = scalar_lea.vmem %s7473_s9, %s5469_s24  ;;  %s5053_s25 = sshll.u32 %s6095_s28, 8 }
  0x20   : > { %s6139_s8 = scalar_lea.vmem %s7478_s14, %s5053_s25  ;;  %s4881_s26 = sshll.u32 %s6095_s28, 2 }
  0x21   : > { %s6145_s24 = scalar_lea.vmem %s7479_s15, %s4881_s26  ;;  %s6150_s18 = scalar_lea.vmem %s7480_s16, %s5053_s25 }
  0x22   : > { %867 = sbr.rel (%p4884_p5) target bundleno = 610 (0x262), region = 108  ;;  %s7510_s10 = sld [smem:[#allocation11_spill]] (!%p4884_p5) }
  0x23   : > { %s7512_s20 = sld [smem:[#allocation12_spill]] (!%p4884_p5) }
  0x24   : > { %s7513_s30 = sld [smem:[#allocation13_spill]] (!%p4884_p5) }
  0x25   : > { %s7514_s29 = sld [smem:[#allocation14_spill]] (!%p4884_p5) }
  0x27   : > { %v5954_v1 = vmov 0   ;;  %v869_v5 = vld [vmem:[%s7511_s3 + $0x8] sm:$0xff]  ;;  %v871_v6 = vld [vmem:[%s7511_s3 + $0x18] sm:$0xff]  ;;  %vm996_vm0 = vcmask 523264   ;;  %v868_v19 = vld [vmem:[%s7511_s3] sm:$0xff] }
  0x28   : > { %v5508_v0 = vld [vmem:[%s7510_s10 + $0x38] sm:$0xff]   ;;  %1009 = vmatprep.subr.bf16.mxu0 %v5954_v1  ;;  %5428 = vmatprep.subr.bf16.mxu1 %v5954_v1  ;;  %v5509_v2 = vld [vmem:[%s7510_s10 + $0x30] sm:$0xff]   ;;  %v5510_v3 = vld [vmem:[%s7510_s10 + $0x28] sm:$0xff]   ;;  %v885_v8 = vpack.c.bf16 %v871_v6, %v869_v5 }
  0x29   : > { %1010 = vmatpush1.bf16.msra.mxu0 %v5508_v0  ;;  %5440 = vmatpush1.bf16.msra.mxu1 %v5508_v0  ;;  %v5511_v4 = vld [vmem:[%s7510_s10 + $0x20] sm:$0xff]   ;;  %v877_v7 = vld [vmem:[%s7511_s3 + $0x48] sm:$0xff]  ;;  %v879_v9 = vld [vmem:[%s7511_s3 + $0x58] sm:$0xff] }
  0x2a   : > { %1011 = vmatprep.subr.bf16.mxu0 %v5954_v1  ;;  %5429 = vmatprep.subr.bf16.mxu1 %v5954_v1  ;;  %v5512_v10 = vld [vmem:[%s7510_s10 + $0x18] sm:$0xff]   ;;  %v889_v11 = vpack.c.bf16 %v879_v9, %v877_v7  ;;  %v5513_v12 = vld [vmem:[%s7510_s10 + $0x10] sm:$0xff]   ;;  %v5514_v13 = vld [vmem:[%s7510_s10 + $0x8] sm:$0xff]  }
  0x2b   : > { %4897 = vmatprep.mubr.msk.bf16.mxu0 %vm996_vm0, %v885_v8  ;;  %v5515_v14 = vld [vmem:[%s7510_s10] sm:$0xff]   ;;  %v5516_v15 = vld [vmem:[%s7510_s10 + $0x58] sm:$0xff]   ;;  %v5517_v16 = vld [vmem:[%s7510_s10 + $0x50] sm:$0xff]  }
  0x2c   : > { %4899 = vmatprep.mubr.msk.bf16.mxu1 %vm996_vm0, %v889_v11  ;;  %v5518_v17 = vld [vmem:[%s7510_s10 + $0x48] sm:$0xff]   ;;  %v5519_v18 = vld [vmem:[%s7510_s10 + $0x40] sm:$0xff]   ;;  %v870_v20 = vld [vmem:[%s7511_s3 + $0x10] sm:$0xff] }
  0x2d   : > { %1012 = vmatpush1.bf16.msra.mxu0 %v5509_v2  ;;  %5441 = vmatpush1.bf16.msra.mxu1 %v5509_v2  ;;  %v876_v21 = vld [vmem:[%s7511_s3 + $0x40] sm:$0xff]  ;;  %v878_v22 = vld [vmem:[%s7511_s3 + $0x50] sm:$0xff]  ;;  %v873_v23 = vld [vmem:[%s7511_s3 + $0x28] sm:$0xff]  ;;  %v884_v27 = vpack.c.bf16 %v870_v20, %v868_v19 }
  0x2e   : > { %1013 = vmatprep.subr.bf16.mxu0 %v5954_v1  ;;  %5430 = vmatprep.subr.bf16.mxu1 %v5954_v1  ;;  %v875_v24 = vld [vmem:[%s7511_s3 + $0x38] sm:$0xff]  ;;  %v881_v25 = vld [vmem:[%s7511_s3 + $0x68] sm:$0xff]  ;;  %v888_v28 = vpack.c.bf16 %v878_v22, %v876_v21  ;;  %v872_v31 = vld [vmem:[%s7511_s3 + $0x20] sm:$0xff] }
  0x2f   : > { %v883_v26 = vld [vmem:[%s7511_s3 + $0x78] sm:$0xff]  ;;  %v887_v29 = vpack.c.bf16 %v875_v24, %v873_v23  ;;  %v874_v32 = vld [vmem:[%s7511_s3 + $0x30] sm:$0xff]  ;;  %v880_v33 = vld [vmem:[%s7511_s3 + $0x60] sm:$0xff] }
  0x30   : > { %v891_v30 = vpack.c.bf16 %v883_v26, %v881_v25  ;;  %v882_v34 = vld [vmem:[%s7511_s3 + $0x70] sm:$0xff]  ;;  %v886_v35 = vpack.c.bf16 %v874_v32, %v872_v31  ;;  %v916_v37 = vld [vmem:[%s7512_s20] sm:$0xff]  ;;  %v921_v44 = vld [vmem:[%s7512_s20 + $0x28] sm:$0xff] }
  0x31   : > { %1014 = vmatpush1.bf16.msra.mxu0 %v5510_v3  ;;  %5442 = vmatpush1.bf16.msra.mxu1 %v5510_v3  ;;  %v890_v36 = vpack.c.bf16 %v882_v34, %v880_v33  ;;  %v920_v39 = vld [vmem:[%s7512_s20 + $0x20] sm:$0xff]  ;;  %v917_v49 = vld [vmem:[%s7512_s20 + $0x8] sm:$0xff]  ;;  %v918_v52 = vld [vmem:[%s7512_s20 + $0x10] sm:$0xff] }
  0x32   : > { %1015 = vmatprep.subr.bf16.mxu0 %v5954_v1  ;;  %5431 = vmatprep.subr.bf16.mxu1 %v5954_v1  ;;  %v922_v54 = vld [vmem:[%s7512_s20 + $0x30] sm:$0xff]  ;;  %v919_v59 = vld [vmem:[%s7512_s20 + $0x18] sm:$0xff] }
  0x33   : > { %v923_v63 = vld [vmem:[%s7512_s20 + $0x38] sm:$0xff] }
  0x35   : > { %1016 = vmatpush1.bf16.msra.mxu0 %v5511_v4  ;;  %5443 = vmatpush1.bf16.msra.mxu1 %v5511_v4 }
  0x36   : > { %1017 = vmatprep.subr.bf16.mxu0 %v5954_v1  ;;  %5432 = vmatprep.subr.bf16.mxu1 %v5954_v1 }
  0x39   : > { %1018 = vmatpush1.bf16.msra.mxu0 %v5512_v10  ;;  %5444 = vmatpush1.bf16.msra.mxu1 %v5512_v10 }
  0x3a   : > { %1019 = vmatprep.subr.bf16.mxu0 %v5954_v1  ;;  %5433 = vmatprep.subr.bf16.mxu1 %v5954_v1 }
  0x3d   : > { %1020 = vmatpush1.bf16.msra.mxu0 %v5513_v12  ;;  %5445 = vmatpush1.bf16.msra.mxu1 %v5513_v12 }
  0x3e   : > { %1021 = vmatprep.subr.bf16.mxu0 %v5954_v1  ;;  %5434 = vmatprep.subr.bf16.mxu1 %v5954_v1 }
  0x41   : > { %1022 = vmatpush1.bf16.msra.mxu0 %v5514_v13  ;;  %5446 = vmatpush1.bf16.msra.mxu1 %v5514_v13 }
  0x42   : > { %1023 = vmatprep.subr.bf16.mxu0 %v5954_v1  ;;  %5435 = vmatprep.subr.bf16.mxu1 %v5954_v1 }
  0x45   : > { %1024 = vmatpush1.bf16.msra.mxu0 %v5515_v14  ;;  %5447 = vmatpush1.bf16.msra.mxu1 %v5515_v14 }
  0x46   : > { %1033 = vmatprep.subr.bf16.mxu0 %v5954_v1  ;;  %5436 = vmatprep.subr.bf16.mxu1 %v5954_v1 }
  0x49   : > { %1034 = vmatpush2.bf16.msra.mxu0 %v5516_v15  ;;  %5448 = vmatpush2.bf16.msra.mxu1 %v5516_v15 }
  0x4a   : > { %1035 = vmatprep.subr.bf16.mxu0 %v5954_v1  ;;  %5437 = vmatprep.subr.bf16.mxu1 %v5954_v1 }
  0x4d   : > { %1036 = vmatpush2.bf16.msra.mxu0 %v5517_v16  ;;  %5449 = vmatpush2.bf16.msra.mxu1 %v5517_v16 }
  0x4e   : > { %1037 = vmatprep.subr.bf16.mxu0 %v5954_v1  ;;  %5438 = vmatprep.subr.bf16.mxu1 %v5954_v1 }
  0x51   : > { %1038 = vmatpush2.bf16.msra.mxu0 %v5518_v17  ;;  %5450 = vmatpush2.bf16.msra.mxu1 %v5518_v17 }
  0x52   : > { %1039 = vmatprep.subr.bf16.mxu0 %v5954_v1  ;;  %5439 = vmatprep.subr.bf16.mxu1 %v5954_v1 }
  0x55   : > { %1040 = vmatpush2.bf16.msra.mxu0 %v5519_v18  ;;  %5451 = vmatpush2.bf16.msra.mxu1 %v5519_v18 }
  0x58   : > { %1042 = vmatmul.mubr.bf16.vlgmr.msra.gmra.mxu0 %v884_v27  ;;  %1058 = vmatmul.mubr.bf16.vlgmr.msra.gmra.mxu1 %v888_v28 }
  0x59   : > { %4898 = vmatprep.mubr.msk.bf16.mxu0 %vm996_vm0, %v887_v29  ;;  %4900 = vmatprep.mubr.msk.bf16.mxu1 %vm996_vm0, %v891_v30 }
  0x60   : > { %1050 = vmatmul.mubr.bf16.gmra.mxu0 %v886_v35  ;;  %1066 = vmatmul.mubr.bf16.gmra.mxu1 %v890_v36 }
 0x118   : > { %v1043_v38 = vpop.f32.mrf.mxu0  ;;  %v1059_v40 = vpop.f32.mrf.mxu1 }
 0x119   : > { %v1044_v41 = vadd.f32 %v1043_v38, %v916_v37  ;;  %v1060_v45 = vadd.f32 %v1059_v40, %v920_v39 }
 0x11a   : > { %v1045_v42 = vpop.f32.mrf.mxu0  ;;  %v1061_v43 = vpop.f32.mrf.mxu1 }
 0x11b   : > { %1076 = vadd.xlane.f32.xlu0 %v1044_v41 }
 0x11c   : > { %v1046_v46 = vpop.f32.mrf.mxu0  ;;  %v1062_v47 = vpop.f32.mrf.mxu1 }
 0x11d   : > { %v1063_v48 = vadd.f32 %v1062_v47, %v921_v44  ;;  %v1047_v56 = vadd.f32 %v1046_v46, %v917_v49 }
 0x11e   : > { %v1048_v50 = vpop.f32.mrf.mxu0  ;;  %v1064_v51 = vpop.f32.mrf.mxu1 }
 0x11f   : > { %1086 = vadd.xlane.f32.xlu1 %v1063_v48  ;;  %1084 = vadd.xlane.f32.xlu0 %v1060_v45 }
 0x120   : > { %v1051_v53 = vpop.f32.mrf.mxu0  ;;  %v1067_v55 = vpop.f32.mrf.mxu1 }
 0x121   : > { %v1052_v57 = vadd.f32 %v1051_v53, %v918_v52  ;;  %v1068_v61 = vadd.f32 %v1067_v55, %v922_v54 }
 0x122   : > { %v1053_v58 = vpop.f32.mrf.mxu0  ;;  %v1069_v60 = vpop.f32.mrf.mxu1 }
 0x123   : > { %1080 = vadd.xlane.f32.xlu1 %v1052_v57  ;;  %1078 = vadd.xlane.f32.xlu0 %v1047_v56  ;;  %v4901_v58 = vld [vmem:[%s7513_s30] ss:$0 sm:$0xff] }
 0x124   : > { %v1054_v62 = vpop.f32.mrf.mxu0  ;;  %v1070_v0 = vpop.f32.mrf.mxu1 }
 0x125   : > { %v1055_v1 = vadd.f32 %v1054_v62, %v919_v59  ;;  %v1071_v4 = vadd.f32 %v1070_v0, %v923_v63 }
 0x126   : > { %v1056_v2 = vpop.f32.mrf.mxu0  ;;  %v1072_v3 = vpop.f32.mrf.mxu1 }
 0x127   : > { %1082 = vadd.xlane.f32.xlu1 %v1055_v1  ;;  %1088 = vadd.xlane.f32.xlu0 %v1068_v61 }
 0x12b   : > { %1090 = vadd.xlane.f32.xlu1 %v1071_v4 }
 0x1a4   : > { %v1077_v5 = vpop.xlane.xlu0 %1076 }
 0x1a5   : > { %v1093_v6 = vmul.f32 0.0078125, %v1077_v5 }
 0x1a7   : > { %v6293_v7 = vsub.f32 %v1044_v41, %v1093_v6 }
 0x1a8   : > { %v1087_v8 = vpop.xlane.xlu1 %1086  ;;  %v1085_v9 = vpop.xlane.xlu0 %1084 }
 0x1a9   : > { %v1097_v10 = vmul.f32 0.0078125, %v1085_v9  ;;  %v1109_v11 = vmul.f32 %v6293_v7, %v6293_v7  ;;  %v1098_v13 = vmul.f32 0.0078125, %v1087_v8 }
 0x1ab   : > { %v6297_v12 = vsub.f32 %v1060_v45, %v1097_v10  ;;  %1117 = vadd.xlane.f32.xlu0 %v1109_v11  ;;  %v6305_v21 = vsub.f32 %v1063_v48, %v1098_v13 }
 0x1ac   : > { %v1081_v14 = vpop.xlane.xlu1 %1080  ;;  %v1079_v15 = vpop.xlane.xlu0 %1078 }
 0x1ad   : > { %v1095_v16 = vmul.f32 0.0078125, %v1081_v14  ;;  %v1094_v17 = vmul.f32 0.0078125, %v1079_v15  ;;  %v1113_v18 = vmul.f32 %v6297_v12, %v6297_v12  ;;  %v1114_v32 = vmul.f32 %v6305_v21, %v6305_v21 }
 0x1af   : > { %v6301_v19 = vsub.f32 %v1052_v57, %v1095_v16  ;;  %v6303_v20 = vsub.f32 %v1047_v56, %v1094_v17  ;;  %1125 = vadd.xlane.f32.xlu0 %v1113_v18 }
 0x1b0   : > { %v1083_v22 = vpop.xlane.xlu1 %1082  ;;  %v1089_v23 = vpop.xlane.xlu0 %1088 }
 0x1b1   : > { %v1096_v24 = vmul.f32 0.0078125, %v1083_v22  ;;  %v1099_v25 = vmul.f32 0.0078125, %v1089_v23  ;;  %v1111_v26 = vmul.f32 %v6301_v19, %v6301_v19  ;;  %v1110_v27 = vmul.f32 %v6303_v20, %v6303_v20 }
 0x1b3   : > { %v6311_v28 = vsub.f32 %v1068_v61, %v1099_v25  ;;  %1121 = vadd.xlane.f32.xlu0 %v1111_v26  ;;  %1119 = vadd.xlane.f32.xlu1 %v1110_v27  ;;  %v6313_v30 = vsub.f32 %v1055_v1, %v1096_v24  ;;  %v4902_v61 = vld [vmem:[%s7514_s29] ss:$0 sm:$0xff] }
 0x1b4   : > { %v1091_v29 = vpop.xlane.xlu1 %1090 }
 0x1b5   : > { %v1100_v31 = vmul.f32 0.0078125, %v1091_v29  ;;  %v1115_v33 = vmul.f32 %v6311_v28, %v6311_v28  ;;  %v1112_v35 = vmul.f32 %v6313_v30, %v6313_v30 }
 0x1b7   : > { %1127 = vadd.xlane.f32.xlu1 %v1114_v32  ;;  %1129 = vadd.xlane.f32.xlu0 %v1115_v33  ;;  %v6319_v34 = vsub.f32 %v1071_v4, %v1100_v31 }
 0x1b9   : > { %v1116_v36 = vmul.f32 %v6319_v34, %v6319_v34 }
 0x1bb   : > { %1123 = vadd.xlane.f32.xlu1 %v1112_v35 }
 0x1bf   : > { %1131 = vadd.xlane.f32.xlu1 %v1116_v36 }
 0x234   : > { %v1118_v37 = vpop.xlane.xlu0 %1117 }
 0x235   : > { %v1133_v38 = vmul.f32 0.0078125, %v1118_v37 }
 0x237   : > { %v1141_v39 = vadd.f32 1e-05, %v1133_v38 }
 0x238   : > { %v1126_v40 = vpop.xlane.xlu0 %1125 }
 0x239   : > { %5520 = vrsqrt.f32 %v1141_v39  ;;  %v1137_v41 = vmul.f32 0.0078125, %v1126_v40 }
 0x23b   : > { %v1145_v42 = vadd.f32 1e-05, %v1137_v41 }
 0x23c   : > { %v1120_v43 = vpop.xlane.xlu1 %1119  ;;  %v1122_v44 = vpop.xlane.xlu0 %1121 }
 0x23d   : > { %5522 = vrsqrt.f32 %v1145_v42  ;;  %v1134_v45 = vmul.f32 0.0078125, %v1120_v43  ;;  %v1135_v46 = vmul.f32 0.0078125, %v1122_v44 }
 0x23f   : > { %v1142_v47 = vadd.f32 1e-05, %v1134_v45  ;;  %v1143_v48 = vadd.f32 1e-05, %v1135_v46 }
 0x240   : > { %v1128_v49 = vpop.xlane.xlu1 %1127  ;;  %v1130_v50 = vpop.xlane.xlu0 %1129 }
 0x241   : > { %5524 = vrsqrt.f32 %v1142_v47  ;;  %v1138_v51 = vmul.f32 0.0078125, %v1128_v49  ;;  %v1139_v52 = vmul.f32 0.0078125, %v1130_v50 }
 0x242   : > { %5526 = vrsqrt.f32 %v1143_v48 }
 0x243   : > { %v1146_v53 = vadd.f32 1e-05, %v1138_v51  ;;  %v1147_v54 = vadd.f32 1e-05, %v1139_v52 }
 0x244   : > { %v1124_v55 = vpop.xlane.xlu1 %1123 }
 0x245   : > { %5528 = vrsqrt.f32 %v1146_v53  ;;  %v1136_v56 = vmul.f32 0.0078125, %v1124_v55 }
 0x246   : > { %v5521_v57 = vpop.eup %5520  ;;  %5530 = vrsqrt.f32 %v1147_v54 }
 0x247   : > { %v1157_v59 = vmul.f32 %v5521_v57, %v6293_v7  ;;  %v1144_v60 = vadd.f32 1e-05, %v1136_v56 }
 0x248   : > { %v1132_v62 = vpop.xlane.xlu1 %1131 }
 0x249   : > { %v1171_v63 = vmul.f32 %v4901_v58, %v1157_v59  ;;  %5532 = vrsqrt.f32 %v1144_v60  ;;  %v1140_v0 = vmul.f32 0.0078125, %v1132_v62 }
 0x24a   : > { %v5523_v1 = vpop.eup %5522 }
 0x24b   : > { %v1185_v2 = vadd.f32 %v4902_v61, %v1171_v63  ;;  %v1161_v3 = vmul.f32 %v5523_v1, %v6297_v12  ;;  %v1148_v4 = vadd.f32 1e-05, %v1140_v0 }
 0x24d   : > { %1193 = vst [vmem:[#allocation2 + $0x30] sm:$0xff] %v1185_v2  ;;  %v1175_v5 = vmul.f32 %v4901_v58, %v1161_v3  ;;  %5534 = vrsqrt.f32 %v1148_v4 }
 0x24e   : > { %v5525_v6 = vpop.eup %5524 }
 0x24f   : > { %v5527_v8 = vpop.eup %5526  ;;  %v1189_v7 = vadd.f32 %v4902_v61, %v1175_v5  ;;  %v1158_v9 = vmul.f32 %v5525_v6, %v6303_v20 }
 0x250   : > { %v1159_v10 = vmul.f32 %v5527_v8, %v6301_v19 }
 0x251   : > { %1197 = vst [vmem:[#allocation2 + $0x8] sm:$0xff] %v1189_v7  ;;  %v1172_v11 = vmul.f32 %v4901_v58, %v1158_v9 }
 0x252   : > { %v5529_v13 = vpop.eup %5528  ;;  %v1173_v14 = vmul.f32 %v4901_v58, %v1159_v10 }
 0x253   : > { %v5531_v15 = vpop.eup %5530  ;;  %v1186_v16 = vadd.f32 %v4902_v61, %v1172_v11  ;;  %v1162_v17 = vmul.f32 %v5529_v13, %v6305_v21 }
 0x254   : > { %v1187_v12 = vadd.f32 %v4902_v61, %v1173_v14  ;;  %v1163_v18 = vmul.f32 %v5531_v15, %v6311_v28 }
 0x255   : > { %1194 = vst [vmem:[#allocation2] sm:$0xff] %v1186_v16  ;;  %v1176_v22 = vmul.f32 %v4901_v58, %v1162_v17 }
 0x256   : > { %v5533_v23 = vpop.eup %5532  ;;  %1195 = vst [vmem:[#allocation2 + $0x18] sm:$0xff] %v1187_v12  ;;  %v1177_v24 = vmul.f32 %v4901_v58, %v1163_v18 }
 0x257   : > { %v1190_v25 = vadd.f32 %v4902_v61, %v1176_v22  ;;  %v1160_v20 = vmul.f32 %v5533_v23, %v6313_v30 }
 0x258   : > { %v1191_v19 = vadd.f32 %v4902_v61, %v1177_v24 }
 0x259   : > { %1198 = vst [vmem:[#allocation2 + $0x20] sm:$0xff] %v1190_v25  ;;  %v1174_v26 = vmul.f32 %v4901_v58, %v1160_v20 }
 0x25a   : > { %v5535_v27 = vpop.eup %5534  ;;  %1199 = vst [vmem:[#allocation2 + $0x28] sm:$0xff] %v1191_v19 }
 0x25b   : > { %v1188_v29 = vadd.f32 %v4902_v61, %v1174_v26  ;;  %v1164_v31 = vmul.f32 %v5535_v27, %v6319_v34 }
 0x25d   : > { %1196 = vst [vmem:[#allocation2 + $0x10] sm:$0xff] %v1188_v29  ;;  %v1178_v21 = vmul.f32 %v4901_v58, %v1164_v31 }
 0x25f   : > { %v1192_v32 = vadd.f32 %v4902_v61, %v1178_v21 }
 0x261   : > { %1200 = vst [vmem:[#allocation2 + $0x38] sm:$0xff] %v1192_v32 }
 0x262 PF: > { %v1201_v28 = vld [vmem:[#allocation2 + $0x30] sm:$0xff]  ;;  %v1203_v33 = vld [vmem:[#allocation2 + $0x18] sm:$0xff]  ;;  %v1202_v35 = vld [vmem:[#allocation2] sm:$0xff]  ;;  %v5955_v15 = vmov 0   ;;  %s7515_s19 = scalar_lea.vmem %s7470_s6, %s6095_s28  ;;  %s7516_s4 = scalar_lea.vmem %s7471_s7, %s6095_s28  ;;  %vm1663_vm1 = vcmask 261120   ;;  %vm2028_vm2 = vcmask 523520  }
 0x263   : > { %1211 = vadd.xlane.f32.xlu0 %v1201_v28  ;;  %1215 = vadd.xlane.f32.xlu1 %v1203_v33  ;;  %v5536_v36 = vld [vmem:[%s6116_s21 + $0xac] ss:$12 sps:$4 sm:$0xff]   ;;  %v5538_v37 = vld [vmem:[%s6116_s21 + $0xa8] ss:$12 sps:$4 sm:$0xff]   ;;  %v6362_v55 = vld [vmem:[#allocation2 + $0x20] sm:$0xff]  ;;  %s7517_s5 = sld [smem:[#allocation15_spill]] }
 0x264   : > { %v1204_v30 = vld [vmem:[#allocation2 + $0x10] sm:$0xff]  ;;  %1509 = vmatprep.subr.bf16.mxu0 %v5536_v36  ;;  %v6357_v53 = vld [vmem:[#allocation2 + $0x8] sm:$0xff]  ;;  %v5545_v61 = vld [vmem:[%s6116_s21 + $0x98] ss:$12 sps:$4 sm:$0xff]   ;;  %1541 = vmatprep.mubr.bf16.mxu0 %v5955_v15  ;;  %s5956_s26 = smov 96   ;;  %vm2225_vm3 = vcmask 785920  }
 0x265   : > { %1510 = vmatpush1.bf16.msra.mxu0 %v5538_v37  ;;  %v6360_v54 = vld [vmem:[#allocation2 + $0x28] sm:$0xff]  ;;  %v5539_v56 = vld [vmem:[%s6116_s21 + $0x94] ss:$12 sps:$4 sm:$0xff]   ;;  %v5541_v57 = vld [vmem:[%s6116_s21 + $0xb0] ss:$12 sps:$4 sm:$0xff]   ;;  %vm2422_vm4 = vcmask 1048320  }
 0x266   : > { %v5542_v58 = vld [vmem:[%s6116_s21 + $0x90] ss:$12 sps:$4 sm:$0xff]   ;;  %1511 = vmatprep.subr.bf16.mxu0 %v5539_v56  ;;  %5232 = vmatprep.subr.bf16.mxu1 %v5541_v57  ;;  %v5546_v62 = vld [vmem:[%s6116_s21 + $0x78] ss:$12 sps:$4 sm:$0xff]   ;;  %v5549_v0 = vld [vmem:[%s6116_s21 + $0x80] ss:$12 sps:$4 sm:$0xff]  }
 0x267   : > { %1213 = vadd.xlane.f32.xlu0 %v1202_v35  ;;  %1217 = vadd.xlane.f32.xlu1 %v1204_v30  ;;  %v5543_v60 = vld [vmem:[%s6116_s21 + $0x7c] ss:$12 sps:$4 sm:$0xff]   ;;  %v5547_v63 = vld [vmem:[%s6116_s21 + $0x64] ss:$12 sps:$4 sm:$0xff]   ;;  %v5550_v1 = vld [vmem:[%s6116_s21 + $0x60] ss:$12 sps:$4 sm:$0xff]  }
 0x268   : > { %v6369_v59 = vld [vmem:[#allocation2 + $0x38] sm:$0xff]  ;;  %5233 = vmatpush3.bf16.msra.mxu1 %v5541_v57  ;;  %v5553_v3 = vld [vmem:[%s6116_s21 + $0x68] ss:$12 sps:$4 sm:$0xff]   ;;  %v5563_v11 = vld [vmem:[%s6116_s21 + $0x4] ss:$12 sps:$4 sm:$0xff]   ;;  %p5037_p6 = scmp.ne.s32.totalorder %s5944_s2, 1 }
 0x269   : > { %1512 = vmatpush1.bf16.msra.mxu0 %v5542_v58  ;;  %5234 = vmatprep.subr.bf16.mxu1 %v5545_v61  ;;  %v5551_v2 = vld [vmem:[%s6116_s21 + $0x4c] ss:$12 sps:$4 sm:$0xff]   ;;  %v5554_v4 = vld [vmem:[%s6116_s21 + $0x48] ss:$12 sps:$4 sm:$0xff]   ;;  %v5557_v6 = vld [vmem:[%s6116_s21 + $0x50] ss:$12 sps:$4 sm:$0xff]  }
 0x26a   : > { %1513 = vmatprep.subr.bf16.mxu0 %v5543_v60  ;;  %v5555_v5 = vld [vmem:[%s6116_s21 + $0x34] ss:$12 sps:$4 sm:$0xff]   ;;  %v5558_v8 = vld [vmem:[%s6116_s21 + $0x30] ss:$12 sps:$4 sm:$0xff]   ;;  %v5561_v9 = vld [vmem:[%s6116_s21 + $0x38] ss:$12 sps:$4 sm:$0xff]  }
 0x26b   : > { %v5559_v7 = vld [vmem:[%s6116_s21 + $0x1c] ss:$12 sps:$4 sm:$0xff]   ;;  %v5562_v10 = vld [vmem:[%s6116_s21 + $0x18] ss:$12 sps:$4 sm:$0xff]   ;;  %v5565_v13 = vld [vmem:[%s6116_s21 + $0x20] ss:$12 sps:$4 sm:$0xff]  }
 0x26c   : > { %5235 = vmatpush3.bf16.msra.mxu1 %v5545_v61  ;;  %v5566_v14 = vld [vmem:[%s6116_s21] ss:$12 sps:$4 sm:$0xff]   ;;  %v5567_v16 = vld [vmem:[%s6116_s21 + $0x8] ss:$12 sps:$4 sm:$0xff]   ;;  %s7519_s21 = scalar_lea.vmem %s7477_s13, %s6095_s28  ;;  %s7522_s25 = sld [smem:[#allocation18_spill]] (!%p5037_p6) }
 0x26d   : > { %1514 = vmatpush1.bf16.msra.mxu0 %v5546_v62  ;;  %5236 = vmatprep.subr.bf16.mxu1 %v5549_v0 }
 0x26e   : > { %1515 = vmatprep.subr.bf16.mxu0 %v5547_v63 }
 0x270   : > { %5237 = vmatpush3.bf16.msra.mxu1 %v5549_v0 }
 0x271   : > { %1516 = vmatpush1.bf16.msra.mxu0 %v5550_v1  ;;  %5238 = vmatprep.subr.bf16.mxu1 %v5553_v3 }
 0x272   : > { %1517 = vmatprep.subr.bf16.mxu0 %v5551_v2 }
 0x274   : > { %5239 = vmatpush3.bf16.msra.mxu1 %v5553_v3 }
 0x275   : > { %1518 = vmatpush1.bf16.msra.mxu0 %v5554_v4  ;;  %5240 = vmatprep.subr.bf16.mxu1 %v5557_v6 }
 0x276   : > { %1519 = vmatprep.subr.bf16.mxu0 %v5555_v5 }
 0x278   : > { %5241 = vmatpush3.bf16.msra.mxu1 %v5557_v6 }
 0x279   : > { %1520 = vmatpush1.bf16.msra.mxu0 %v5558_v8  ;;  %5242 = vmatprep.subr.bf16.mxu1 %v5561_v9 }
 0x27a   : > { %1521 = vmatprep.subr.bf16.mxu0 %v5559_v7 }
 0x27c   : > { %5243 = vmatpush3.bf16.msra.mxu1 %v5561_v9 }
 0x27d   : > { %1522 = vmatpush1.bf16.msra.mxu0 %v5562_v10  ;;  %5244 = vmatprep.subr.bf16.mxu1 %v5565_v13 }
 0x27e   : > { %1523 = vmatprep.subr.bf16.mxu0 %v5563_v11 }
 0x280   : > { %5245 = vmatpush3.bf16.msra.mxu1 %v5565_v13 }
 0x281   : > { %1524 = vmatpush1.bf16.msra.mxu0 %v5566_v14  ;;  %5246 = vmatprep.subr.bf16.mxu1 %v5567_v16 }
 0x284   : > { %5247 = vmatpush3.bf16.msra.mxu1 %v5567_v16 }
 0x2ec   : > { %v1212_v34 = vpop.xlane.xlu0 %1211  ;;  %v1216_v38 = vpop.xlane.xlu1 %1215 }
 0x2ed   : > { %v1228_v39 = vmul.f32 0.0078125, %v1212_v34  ;;  %v1230_v40 = vmul.f32 0.0078125, %v1216_v38 }
 0x2ef   : > { %v6341_v41 = vsub.f32 %v1201_v28, %v1228_v39  ;;  %v6343_v42 = vsub.f32 %v1203_v33, %v1230_v40 }
 0x2f0   : > { %v1214_v43 = vpop.xlane.xlu0 %1213  ;;  %v1218_v44 = vpop.xlane.xlu1 %1217 }
 0x2f1   : > { %v1229_v45 = vmul.f32 0.0078125, %v1214_v43  ;;  %v1244_v46 = vmul.f32 %v6341_v41, %v6341_v41  ;;  %v1231_v47 = vmul.f32 0.0078125, %v1218_v44  ;;  %v1246_v48 = vmul.f32 %v6343_v42, %v6343_v42 }
 0x2f3   : > { %1252 = vadd.xlane.f32.xlu0 %v1244_v46  ;;  %v6349_v49 = vsub.f32 %v1202_v35, %v1229_v45  ;;  %v6351_v50 = vsub.f32 %v1204_v30, %v1231_v47  ;;  %v4903_v47 = vld [vmem:[%s7515_s19] ss:$0 sm:$0xff]  ;;  %s7521_s19 = sld [smem:[#allocation20_spill]] (!%p5037_p6) }
 0x2f5   : > { %v1245_v51 = vmul.f32 %v6349_v49, %v6349_v49  ;;  %v1247_v52 = vmul.f32 %v6351_v50, %v6351_v50 }
 0x2f7   : > { %1256 = vadd.xlane.f32.xlu0 %v1246_v48  ;;  %1254 = vadd.xlane.f32.xlu1 %v1245_v51 }
 0x2fb   : > { %1219 = vadd.xlane.f32.xlu0 %v6357_v53  ;;  %1258 = vadd.xlane.f32.xlu1 %v1247_v52 }
 0x2ff   : > { %1223 = vadd.xlane.f32.xlu0 %v6360_v54  ;;  %1221 = vadd.xlane.f32.xlu1 %v6362_v55 }
 0x303   : > { %1225 = vadd.xlane.f32.xlu1 %v6369_v59 }
 0x37c   : > { %v1253_v17 = vpop.xlane.xlu0 %1252 }
 0x37d   : > { %v1268_v12 = vmul.f32 0.0078125, %v1253_v17 }
 0x37f   : > { %v1276_v18 = vadd.f32 1e-05, %v1268_v12 }
 0x380   : > { %v1255_v22 = vpop.xlane.xlu1 %1254  ;;  %v1257_v23 = vpop.xlane.xlu0 %1256 }
 0x381   : > { %5656 = vrsqrt.f32 %v1276_v18  ;;  %v1269_v24 = vmul.f32 0.0078125, %v1255_v22  ;;  %v1270_v25 = vmul.f32 0.0078125, %v1257_v23 }
 0x383   : > { %v1277_v20 = vadd.f32 1e-05, %v1269_v24  ;;  %v1278_v19 = vadd.f32 1e-05, %v1270_v25 }
 0x384   : > { %v1259_v26 = vpop.xlane.xlu1 %1258  ;;  %v1220_v27 = vpop.xlane.xlu0 %1219 }
 0x385   : > { %5658 = vrsqrt.f32 %v1277_v20  ;;  %v1271_v29 = vmul.f32 0.0078125, %v1259_v26  ;;  %v1232_v31 = vmul.f32 0.0078125, %v1220_v27 }
 0x386   : > { %5660 = vrsqrt.f32 %v1278_v19 }
 0x387   : > { %v1279_v21 = vadd.f32 1e-05, %v1271_v29  ;;  %v1240_v32 = vsub.f32 %v6357_v53, %v1232_v31 }
 0x388   : > { %v1222_v28 = vpop.xlane.xlu1 %1221  ;;  %v1224_v33 = vpop.xlane.xlu0 %1223 }
 0x389   : > { %5662 = vrsqrt.f32 %v1279_v21  ;;  %v1233_v35 = vmul.f32 0.0078125, %v1222_v28  ;;  %v1234_v30 = vmul.f32 0.0078125, %v1224_v33  ;;  %v1248_v36 = vmul.f32 %v1240_v32, %v1240_v32 }
 0x38a   : > { %v1366_v28 = vlaneseq }
 0x38b   : > { %1260 = vadd.xlane.f32.xlu0 %v1248_v36  ;;  %v1241_v37 = vsub.f32 %v6362_v55, %v1233_v35  ;;  %v1242_v34 = vsub.f32 %v6360_v54, %v1234_v30  ;;  %v4904_v55 = vld [vmem:[%s7516_s4] ss:$0 sm:$0xff]  ;;  %s5957_s4 = smov 64  }
 0x38c   : > { %v1226_v38 = vpop.xlane.xlu1 %1225  ;;  %v6413_v33 = vshrl.u32 %v1366_v28, 7  ;;  %v1364_v30 = vld [vmem:[%s6125_s22] sm:$0x7]  ;;  %s5958_s22 = smov 32  }
 0x38d   : > { %v1235_v39 = vmul.f32 0.0078125, %v1226_v38  ;;  %v1249_v40 = vmul.f32 %v1241_v37, %v1241_v37  ;;  %v1250_v43 = vmul.f32 %v1242_v34, %v1242_v34 }
 0x38e   : > { %v5657_v44 = vpop.eup %5656  ;;  %v1368_v35 = vsub.s32 0, %v6413_v33 }
 0x38f   : > { %1262 = vadd.xlane.f32.xlu1 %v1249_v40  ;;  %1264 = vadd.xlane.f32.xlu0 %v1250_v43  ;;  %v1243_v45 = vsub.f32 %v6369_v59, %v1235_v39  ;;  %v1292_v46 = vmul.f32 %v5657_v44, %v6341_v41 }
 0x391   : > { %v1251_v48 = vmul.f32 %v1243_v45, %v1243_v45  ;;  %v1306_v54 = vmul.f32 %v4903_v47, %v1292_v46  ;;  %v1372_v46 = vsub.s32 1, %v6413_v33 }
 0x392   : > { %v5659_v51 = vpop.eup %5658 }
 0x393   : > { %v5661_v52 = vpop.eup %5660  ;;  %1266 = vadd.xlane.f32.xlu1 %v1251_v48  ;;  %v1293_v53 = vmul.f32 %v5659_v51, %v6349_v49  ;;  %v1320_v58 = vadd.f32 %v4904_v55, %v1306_v54 }
 0x394   : > { %v1294_v56 = vmul.f32 %v5661_v52, %v6343_v42  ;;  %v6430_v52 = vrot.slane %v1364_v30, %v1372_v46 }
 0x395   : > { %v1307_v41 = vmul.f32 %v4903_v47, %v1293_v53 }
 0x396   : > { %v5663_v57 = vpop.eup %5662  ;;  %v1308_v61 = vmul.f32 %v4903_v47, %v1294_v56 }
 0x397   : > { %v1321_v59 = vadd.f32 %v4904_v55, %v1307_v41  ;;  %v1295_v60 = vmul.f32 %v5663_v57, %v6351_v50 }
 0x398   : > { %v1322_v49 = vadd.f32 %v4904_v55, %v1308_v61 }
 0x399   : > { %v1328_v62 = vpack.c.bf16 %v1321_v59, %v1320_v58  ;;  %v1309_v63 = vmul.f32 %v4903_v47, %v1295_v60  ;;  %v1376_v58 = vsub.s32 2, %v6413_v33 }
 0x39b   : > { %1542 = vmatmul.mubr.bf16.vlgmr.msra.gmra.mxu0 %v1328_v62  ;;  %5248 = vmatprep.mubr.bf16.mxu1 %v1328_v62  ;;  %v1323_v0 = vadd.f32 %v4904_v55, %v1309_v63  ;;  %v1377_v63 = vrot.slane %v1364_v30, %v1376_v58 }
 0x39c   : > { %1551 = vmatprep.mubr.bf16.mxu0 %v5955_v15 }
 0x39d   : > { %v1329_v1 = vpack.c.bf16 %v1323_v0, %v1322_v49 }
 0x39f   : > { %5249 = vmatmul.mubr.bf16.vlgmr.msra.gmra.mxu1 %v1329_v1 }
 0x3a3   : > { %1552 = vmatmul.mubr.bf16.gmra.mxu0 %v1329_v1 }
 0x3a4   : > { %1561 = vmatprep.mubr.bf16.mxu0 %v5955_v15 }
 0x414   : > { %v1261_v42 = vpop.xlane.xlu0 %1260 }
 0x415   : > { %v1272_v2 = vmul.f32 0.0078125, %v1261_v42 }
 0x417   : > { %v1280_v3 = vadd.f32 1e-05, %v1272_v2 }
 0x418   : > { %v1263_v4 = vpop.xlane.xlu1 %1262  ;;  %v1265_v5 = vpop.xlane.xlu0 %1264 }
 0x419   : > { %5664 = vrsqrt.f32 %v1280_v3  ;;  %v1273_v50 = vmul.f32 0.0078125, %v1263_v4  ;;  %v1274_v6 = vmul.f32 0.0078125, %v1265_v5 }
 0x41b   : > { %v1281_v8 = vadd.f32 1e-05, %v1273_v50  ;;  %v1282_v7 = vadd.f32 1e-05, %v1274_v6 }
 0x41c   : > { %v1267_v9 = vpop.xlane.xlu1 %1266 }
 0x41d   : > { %5666 = vrsqrt.f32 %v1281_v8  ;;  %v1275_v10 = vmul.f32 0.0078125, %v1267_v9 }
 0x41e   : > { %5668 = vrsqrt.f32 %v1282_v7 }
 0x41f   : > { %v1283_v11 = vadd.f32 1e-05, %v1275_v10 }
 0x421   : > { %5670 = vrsqrt.f32 %v1283_v11 }
 0x426   : > { %v5665_v13 = vpop.eup %5664 }
 0x427   : > { %v1296_v14 = vmul.f32 %v5665_v13, %v1240_v32 }
 0x429   : > { %v1310_v18 = vmul.f32 %v4903_v47, %v1296_v14 }
 0x42a   : > { %v5667_v16 = vpop.eup %5666 }
 0x42b   : > { %v5669_v17 = vpop.eup %5668  ;;  %v1297_v12 = vmul.f32 %v5667_v16, %v1241_v37  ;;  %v1324_v25 = vadd.f32 %v4904_v55, %v1310_v18  ;;  %v6419_v37 = vrot.slane %v1364_v30, %v1368_v35 }
 0x42c   : > { %v1298_v22 = vmul.f32 %v5669_v17, %v1242_v34 }
 0x42d   : > { %v1311_v23 = vmul.f32 %v4903_v47, %v1297_v12 }
 0x42e   : > { %v5671_v24 = vpop.eup %5670  ;;  %v1312_v26 = vmul.f32 %v4903_v47, %v1298_v22 }
 0x42f   : > { %v1325_v20 = vadd.f32 %v4904_v55, %v1311_v23  ;;  %v1299_v19 = vmul.f32 %v5671_v24, %v1243_v45 }
 0x430   : > { %v1326_v31 = vadd.f32 %v4904_v55, %v1312_v26 }
 0x431   : > { %v1330_v27 = vpack.c.bf16 %v1325_v20, %v1324_v25  ;;  %v1313_v29 = vmul.f32 %v4903_v47, %v1299_v19 }
 0x433   : > { %1562 = vmatmul.mubr.bf16.gmra.mxu0 %v1330_v27  ;;  %5252 = vmatprep.mubr.bf16.mxu1 %v1330_v27  ;;  %v1327_v21 = vadd.f32 %v4904_v55, %v1313_v29 }
 0x434   : > { %1571 = vmatprep.mubr.bf16.mxu0 %v5955_v15 }
 0x435   : > { %v1331_v32 = vpack.c.bf16 %v1327_v21, %v1326_v31 }
 0x437   : > { %5253 = vmatmul.mubr.bf16.gmra.mxu1 %v1331_v32 }
 0x43b   : > { %1572 = vmatmul.mubr.bf16.gmra.mxu0 %v1331_v32 }
 0x45b   : > { %v1543_v36 = vpop.f32.mrf.mxu0 }
 0x45c   : > { %v1544_v39 = vadd.f32 %v1543_v36, %v6419_v37 }
 0x45d   : > { %v1545_v34 = vpop.f32.mrf.mxu0 }
 0x45e   : > { %v1546_v57 = vadd.f32 %v1545_v34, %v6430_v52 }
 0x45f   : > { %v1547_v38 = vpop.f32.mrf.mxu0  ;;  %v5250_v48 = vpop.f32.mrf.mxu1 }
 0x460   : > { %v1548_v40 = vadd.f32 %v1547_v38, %v6419_v37  ;;  %v1625_v0 = vadd.f32 %v5250_v48, %v1377_v63 }
 0x461   : > { %v1549_v43 = vpop.f32.mrf.mxu0  ;;  %v1616_v41 = vpop.f32.mrf.mxu1 }
 0x462   : > { %v6423_v44 = vpack.c.bf16 %v1548_v40, %v1544_v39  ;;  %v1550_v54 = vadd.f32 %v1549_v43, %v6430_v52  ;;  %v1617_v50 = vadd.f32 %v1616_v41, %v1377_v63  ;;  %v6486_v39 = vld [vmem:[%s7517_s5] sm:$0xff]  ;;  %v6491_v40 = vld [vmem:[%s7517_s5 + $0x10] sm:$0xff] }
 0x463   : > { %v1553_v45 = vpop.f32.mrf.mxu0  ;;  %v5251_v62 = vpop.f32.mrf.mxu1 }
 0x464   : > { %5260 = vmatprep.mubr.msk.bf16.mxu1 %vm1663_vm1, %v6423_v44  ;;  %v6439_v60 = vpack.c.bf16 %v1550_v54, %v1546_v57  ;;  %v1628_v49 = vadd.f32 %v5251_v62, %v1377_v63  ;;  %v1554_v4 = vadd.f32 %v1553_v45, %v6419_v37 }
 0x465   : > { %v1555_v47 = vpop.f32.mrf.mxu0  ;;  %v1619_v2 = vpop.f32.mrf.mxu1 }
 0x466   : > { %v1556_v55 = vadd.f32 %v1555_v47, %v6430_v52  ;;  %v6449_v1 = vpack.c.bf16 %v1628_v49, %v1625_v0  ;;  %v1671_v42 = vsel %vm1663_vm1, %v6439_v60, 0  ;;  %v1620_v5 = vadd.f32 %v1619_v2, %v1377_v63 }
 0x467   : > { %v1557_v51 = vpop.f32.mrf.mxu0 }
 0x468   : > { %v1558_v3 = vadd.f32 %v1557_v51, %v6419_v37  ;;  %v6458_v8 = vpack.c.bf16 %v1620_v5, %v1617_v50 }
 0x469   : > { %v1559_v53 = vpop.f32.mrf.mxu0 }
 0x46a   : > { %v1560_v56 = vadd.f32 %v1559_v53, %v6430_v52  ;;  %v6456_v6 = vpack.c.bf16 %v1558_v3, %v1554_v4  ;;  %v6504_v53 = vld [vmem:[%s7517_s5 + $0x18] sm:$0xff] }
 0x46c   : > { %v6437_v59 = vpack.c.bf16 %v1560_v56, %v1556_v55 }
 0x46e   : > { %5452 = vmatprep.subr.msk.bf16.mxu1 %vm1663_vm1, %v6437_v59  ;;  %v1674_v61 = vsel %vm1663_vm1, %v6437_v59, 0 }
 0x46f   : > { %5257 = vmatpush3.bf16.xpose.msra.mxu1 %v1674_v61 }
 0x470   : > { %5453 = vmatprep.subr.msk.bf16.mxu1 %vm1663_vm1, %v6439_v60 }
 0x477   : > { %5259 = vmatpush3.bf16.xpose.msra.mxu1 %v1671_v42 }
 0x478   : > { %5264 = vmatprep.subr.bf16.mxu1 %v6449_v1 }
 0x47e   : > { %5261 = vmatmul.mubr.msk.bf16.vlgmr.msra.gmra.mxu1 %vm1663_vm1, %v6456_v6 }
 0x47f   : > { %5265 = vmatpush3.bf16.msra.mxu1 %v6449_v1 }
 0x480   : > { %5266 = vmatprep.subr.bf16.mxu1 %v6458_v8 }
 0x483   : > { %5267 = vmatpush3.bf16.msra.mxu1 %v6458_v8 }
 0x4f3   : > { %v1563_v7 = vpop.f32.mrf.mxu0 }
 0x4f4   : > { %v1564_v13 = vadd.f32 %v1563_v7, %v6419_v37 }
 0x4f5   : > { %v1565_v9 = vpop.f32.mrf.mxu0 }
 0x4f6   : > { %v1566_v12 = vadd.f32 %v1565_v9, %v6430_v52 }
 0x4f7   : > { %v1567_v10 = vpop.f32.mrf.mxu0  ;;  %v5254_v11 = vpop.f32.mrf.mxu1 }
 0x4f8   : > { %v1568_v14 = vadd.f32 %v1567_v10, %v6419_v37  ;;  %v1641_v25 = vadd.f32 %v5254_v11, %v1377_v63 }
 0x4f9   : > { %v1569_v16 = vpop.f32.mrf.mxu0  ;;  %v1632_v17 = vpop.f32.mrf.mxu1 }
 0x4fa   : > { %v6468_v18 = vpack.c.bf16 %v1568_v14, %v1564_v13  ;;  %v1570_v22 = vadd.f32 %v1569_v16, %v6430_v52  ;;  %v1633_v29 = vadd.f32 %v1632_v17, %v1377_v63 }
 0x4fb   : > { %v1573_v23 = vpop.f32.mrf.mxu0  ;;  %v5255_v24 = vpop.f32.mrf.mxu1 }
 0x4fc   : > { %v6471_v20 = vpack.c.bf16 %v1570_v22, %v1566_v12  ;;  %v1644_v19 = vadd.f32 %v5255_v24, %v1377_v63  ;;  %v1574_v28 = vadd.f32 %v1573_v23, %v6419_v37 }
 0x4fd   : > { %v6473_v26 = vpop.f32.mrf.mxu0  ;;  %v1635_v27 = vpop.f32.mrf.mxu1 }
 0x4fe   : > { %v6475_v31 = vpack.c.bf16 %v1644_v19, %v1641_v25  ;;  %v1636_v21 = vadd.f32 %v1635_v27, %v1377_v63 }
 0x4ff   : > { %v1577_v32 = vpop.f32.mrf.mxu0 }
 0x500   : > { %v6478_v30 = vpack.c.bf16 %v1636_v21, %v1633_v29  ;;  %v1578_v36 = vadd.f32 %v1577_v32, %v6419_v37  ;;  %v6497_v37 = vld [vmem:[%s7517_s5 + $0x8] sm:$0xff] }
 0x502   : > { %v6481_v34 = vpack.c.bf16 %v1578_v36, %v1574_v28 }
 0x53e   : > { %v5262_v38 = vpop.f32.mrf.mxu1 }
 0x53f   : > { %v1719_v48 = vadd.f32 %v5262_v38, %v6491_v40 }
 0x540   : > { %v1710_v43 = vpop.f32.mrf.mxu1 }
 0x541   : > { %v1711_v45 = vadd.f32 %v1710_v43, %v6486_v39  ;;  %v1731_v57 = vsel %vm1663_vm1, %v1719_v48, -inf }
 0x542   : > { %v5263_v47 = vpop.f32.mrf.mxu1 }
 0x543   : > { %v1725_v51 = vsel %vm1663_vm1, %v1711_v45, -inf  ;;  %v1722_v56 = vadd.f32 %v5263_v47, %v6504_v53 }
 0x544   : > { %v1713_v54 = vpop.f32.mrf.mxu1  ;;  %1726 = vmax.xlane.f32.xlu0 %v1725_v51 }
 0x545   : > { %v1714_v55 = vadd.f32 %v1713_v54, %v6497_v37  ;;  %v1734_v61 = vsel %vm1663_vm1, %v1722_v56, -inf }
 0x547   : > { %v1728_v41 = vsel %vm1663_vm1, %v1714_v55, -inf }
 0x548   : > { %1729 = vmax.xlane.f32.xlu1 %v1728_v41  ;;  %1732 = vmax.xlane.f32.xlu0 %v1731_v57 }
 0x54c   : > { %1735 = vmax.xlane.f32.xlu1 %v1734_v61 }
 0x5cd   : > { %v1727_v62 = vpop.xlane.xlu0 %1726 }
 0x5ce   : > { %v1737_v63 = vsub.f32 %v1711_v45, %v1727_v62 }
 0x5d0   : > { %v1741_v4 = vmul.f32 1.442695, %v1737_v63 }
 0x5d1   : > { %v1730_v49 = vpop.xlane.xlu1 %1729  ;;  %v1733_v0 = vpop.xlane.xlu0 %1732 }
 0x5d2   : > { %v1739_v42 = vsub.f32 %v1719_v48, %v1733_v0  ;;  %v1738_v2 = vsub.f32 %v1714_v55, %v1730_v49 }
 0x5d4   : > { %v1745_v3 = vmul.f32 1.442695, %v1739_v42  ;;  %v1743_v7 = vmul.f32 1.442695, %v1738_v2 }
 0x5d5   : > { %v1736_v5 = vpop.xlane.xlu1 %1735 }
 0x5d6   : > { %v1740_v50 = vsub.f32 %v1722_v56, %v1736_v5  ;;  %5672 = vpow2.f32 %v1745_v3  ;;  %v6549_v5 = vpop.f32.mrf.mxu0 }
 0x5d7   : > { %5674 = vpow2.f32 %v1741_v4 }
 0x5d8   : > { %v1747_v9 = vmul.f32 1.442695, %v1740_v50 }
 0x5da   : > { %5676 = vpow2.f32 %v1747_v9 }
 0x5db   : > { %5678 = vpow2.f32 %v1743_v7 }
 0x5e3   : > { %v5673_v10 = vpop.eup %5672 }
 0x5e4   : > { %v1755_v11 = vsel %vm1663_vm1, %v5673_v10, 0.0  ;;  %v5675_v13 = vpop.eup %5674 }
 0x5e5   : > { %1756 = vadd.xlane.f32.xlu0 %v1755_v11  ;;  %v1749_v12 = vsel %vm1663_vm1, %v5675_v13, 0.0 }
 0x5e7   : > { %v5677_v14 = vpop.eup %5676 }
 0x5e8   : > { %v1758_v16 = vsel %vm1663_vm1, %v5677_v14, 0.0  ;;  %v5679_v17 = vpop.eup %5678 }
 0x5e9   : > { %1759 = vadd.xlane.f32.xlu1 %v1758_v16  ;;  %1750 = vadd.xlane.f32.xlu0 %v1749_v12  ;;  %v1752_v22 = vsel %vm1663_vm1, %v5679_v17, 0.0 }
 0x5ed   : > { %1753 = vadd.xlane.f32.xlu1 %v1752_v22 }
 0x5fe   : > { %1838 = vrot.lane.b32.xlu1 %v6439_v60, %s5956_s26 }
 0x5ff   : > { %1840 = vrot.lane.b32.xlu0 %v6437_v59, %s5956_s26 }
 0x602   : > { %2039 = vrot.lane.b32.xlu1 %v6437_v59, %s5957_s4 }
 0x603   : > { %1834 = vrot.lane.b32.xlu0 %v6456_v6, %s5956_s26 }
 0x606   : > { %1832 = vrot.lane.b32.xlu1 %v6423_v44, %s5956_s26 }
 0x607   : > { %2033 = vrot.lane.b32.xlu0 %v6423_v44, %s5957_s4 }
 0x60a   : > { %2037 = vrot.lane.b32.xlu1 %v6439_v60, %s5957_s4 }
 0x60e   : > { %2035 = vrot.lane.b32.xlu1 %v6456_v6, %s5957_s4 }
 0x66e   : > { %v1757_v23 = vpop.xlane.xlu0 %1756 }
 0x672   : > { %v1760_v24 = vpop.xlane.xlu1 %1759  ;;  %v1751_v25 = vpop.xlane.xlu0 %1750 }
 0x673   : > { %5680 = vrcp.f32 %v1760_v24 }
 0x674   : > { %5682 = vrcp.f32 %v1751_v25 }
 0x675   : > { %5684 = vrcp.f32 %v1757_v23 }
 0x676   : > { %v1754_v19 = vpop.xlane.xlu1 %1753  ;;  %v1841_v27 = vpop.permute.xlu0 %1840 }
 0x677   : > { %5686 = vrcp.f32 %v1754_v19  ;;  %5454 = vmatprep.subr.msk.bf16.mxu1 %vm1663_vm1, %v1841_v27  ;;  %v1852_v63 = vsel %vm1663_vm1, %v1841_v27, 0 }
 0x67a   : > { %v1839_v29 = vpop.permute.xlu1 %1838  ;;  %v1835_v21 = vpop.permute.xlu0 %1834 }
 0x67b   : > { %v1849_v0 = vsel %vm1663_vm1, %v1839_v29, 0 }
 0x67e   : > { %v2040_v32 = vpop.permute.xlu1 %2039  ;;  %v2034_v28 = vpop.permute.xlu0 %2033 }
 0x67f   : > { %5456 = vmatprep.subr.msk.bf16.mxu0 %vm1663_vm1, %v2040_v32  ;;  %v2051_v36 = vsel %vm1663_vm1, %v2040_v32, 0  ;;  %5292 = vmatprep.mubr.msk.bf16.mxu0 %vm1663_vm1, %v2034_v28 }
 0x680   : > { %5289 = vmatpush3.bf16.xpose.msra.mxu0 %v2051_v36  ;;  %v5681_v38 = vpop.eup %5680 }
 0x681   : > { %v5683_v43 = vpop.eup %5682  ;;  %v1768_v51 = vmul.f32 %v5681_v38, %v5677_v14 }
 0x682   : > { %v1833_v45 = vpop.permute.xlu1 %1832  ;;  %v5685_v47 = vpop.eup %5684  ;;  %v1765_v54 = vmul.f32 %v5683_v43, %v5675_v13 }
 0x683   : > { %v1767_v41 = vmul.f32 %v5685_v47, %v5673_v10 }
 0x684   : > { %v5687_v48 = vpop.eup %5686 }
 0x685   : > { %v1766_v55 = vmul.f32 %v5687_v48, %v5679_v17  ;;  %v1770_v62 = vpack.c.bf16 %v1768_v51, %v1767_v41 }
 0x686   : > { %v2038_v56 = vpop.permute.xlu1 %2037 }
 0x687   : > { %5457 = vmatprep.subr.msk.bf16.mxu0 %vm1663_vm1, %v2038_v56  ;;  %v2048_v57 = vsel %vm1663_vm1, %v2038_v56, 0  ;;  %v1769_v61 = vpack.c.bf16 %v1766_v55, %v1765_v54 }
 0x688   : > { %5291 = vmatpush3.bf16.xpose.msra.mxu0 %v2048_v57 }
 0x689   : > { %5268 = vmatprep.mubr.msk.bf16.mxu1 %vm1663_vm1, %v1769_v61 }
 0x68a   : > { %5269 = vmatmul.mubr.msk.bf16.vlgmr.msra.gmra.mxu1 %vm1663_vm1, %v1770_v62  ;;  %v2036_v49 = vpop.permute.xlu1 %2035 }
 0x68b   : > { %5273 = vmatpush3.bf16.xpose.msra.mxu1 %v1852_v63  ;;  %5276 = vmatprep.mubr.msk.bf16.mxu1 %vm1663_vm1, %v1833_v45 }
 0x68c   : > { %5455 = vmatprep.subr.msk.bf16.mxu1 %vm1663_vm1, %v1839_v29 }
 0x68f   : > { %5293 = vmatmul.mubr.msk.bf16.vlgmr.msra.gmra.mxu0 %vm1663_vm1, %v2036_v49 }
 0x693   : > { %5275 = vmatpush3.bf16.xpose.msra.mxu1 %v1849_v0 }
 0x69a   : > { %5277 = vmatmul.mubr.msk.bf16.vlgmr.msra.gmra.mxu1 %vm1663_vm1, %v1835_v21 }
 0x74a   : > { %v5270_v42 = vpop.f32.mrf.mxu1 }
 0x74b   : > { %1828 = vst.msk [vmem:[#allocation3 + $0x10] sm:$0xff] %vm1663_vm1, %v5270_v42 }
 0x74c   : > { %v1811_v2 = vpop.f32.mrf.mxu1 }
 0x74d   : > { %1826 = vst.msk [vmem:[#allocation3] sm:$0xff] %vm1663_vm1, %v1811_v2 }
 0x74e   : > { %v5271_v3 = vpop.f32.mrf.mxu1 }
 0x74f   : > { %1829 = vst.msk [vmem:[#allocation3 + $0x18] sm:$0xff] %vm1663_vm1, %v5271_v3  ;;  %v5294_v50 = vpop.f32.mrf.mxu0 }
 0x750   : > { %v1814_v4 = vpop.f32.mrf.mxu1  ;;  %v2096_v36 = vadd.f32 %v5294_v50, %v6491_v40 }
 0x751   : > { %1827 = vst.msk [vmem:[#allocation3 + $0x8] sm:$0xff] %vm1663_vm1, %v1814_v4  ;;  %v2087_v7 = vpop.f32.mrf.mxu0 }
 0x752   : > { %v2088_v29 = vadd.f32 %v2087_v7, %v6486_v39  ;;  %v2108_v45 = vsel %vm1663_vm1, %v2096_v36, -inf }
 0x753   : > { %v5295_v10 = vpop.f32.mrf.mxu0 }
 0x754   : > { %v2099_v21 = vadd.f32 %v5295_v10, %v6504_v53  ;;  %v2102_v43 = vsel %vm1663_vm1, %v2088_v29, -inf }
 0x755   : > { %v2090_v12 = vpop.f32.mrf.mxu0 }
 0x756   : > { %v2091_v24 = vadd.f32 %v2090_v12, %v6497_v37  ;;  %v2111_v38 = vsel %vm1663_vm1, %v2099_v21, -inf }
 0x758   : > { %v2105_v28 = vsel %vm1663_vm1, %v2091_v24, -inf }
 0x75a   : > { %v5278_v9 = vpop.f32.mrf.mxu1 }
 0x75b   : > { %v1897_v16 = vadd.f32 %v5278_v9, %v6491_v40 }
 0x75c   : > { %v1888_v11 = vpop.f32.mrf.mxu1 }
 0x75d   : > { %v1889_v13 = vadd.f32 %v1888_v11, %v6486_v39  ;;  %v1909_v27 = vsel %vm1663_vm1, %v1897_v16, -inf }
 0x75e   : > { %v5279_v14 = vpop.f32.mrf.mxu1 }
 0x75f   : > { %v1903_v17 = vsel %vm1663_vm1, %v1889_v13, -inf  ;;  %v6559_v25 = vadd.f32 %v5279_v14, %v6504_v53 }
 0x760   : > { %v1891_v22 = vpop.f32.mrf.mxu1  ;;  %1904 = vmax.xlane.f32.xlu0 %v1903_v17 }
 0x761   : > { %v6555_v23 = vadd.f32 %v1891_v22, %v6497_v37  ;;  %v1912_v32 = vsel %vm1663_vm1, %v6559_v25, -inf }
 0x763   : > { %v1906_v19 = vsel %vm1663_vm1, %v6555_v23, -inf }
 0x764   : > { %1907 = vmax.xlane.f32.xlu1 %v1906_v19  ;;  %1910 = vmax.xlane.f32.xlu0 %v1909_v27 }
 0x768   : > { %1913 = vmax.xlane.f32.xlu0 %v1912_v32  ;;  %2106 = vmax.xlane.f32.xlu1 %v2105_v28 }
 0x76c   : > { %2112 = vmax.xlane.f32.xlu1 %v2111_v38  ;;  %2103 = vmax.xlane.f32.xlu0 %v2102_v43 }
 0x770   : > { %2109 = vmax.xlane.f32.xlu0 %v2108_v45 }
 0x7e9   : > { %v1905_v47 = vpop.xlane.xlu0 %1904 }
 0x7ea   : > { %v1915_v50 = vsub.f32 %v1889_v13, %v1905_v47 }
 0x7ec   : > { %v1919_v9 = vmul.f32 1.442695, %v1915_v50 }
 0x7ed   : > { %v1908_v48 = vpop.xlane.xlu1 %1907  ;;  %v1911_v51 = vpop.xlane.xlu0 %1910 }
 0x7ee   : > { %v1917_v42 = vsub.f32 %v1897_v16, %v1911_v51  ;;  %v1916_v32 = vsub.f32 %v6555_v23, %v1908_v48 }
 0x7f0   : > { %v1923_v7 = vmul.f32 1.442695, %v1917_v42 }
 0x7f1   : > { %v1914_v54 = vpop.xlane.xlu0 %1913  ;;  %v2107_v55 = vpop.xlane.xlu1 %2106 }
 0x7f2   : > { %v2115_v56 = vsub.f32 %v2091_v24, %v2107_v55 }
 0x7f4   : > { %v2120_v41 = vmul.f32 1.442695, %v2115_v56 }
 0x7f5   : > { %v2113_v57 = vpop.xlane.xlu1 %2112  ;;  %v2104_v61 = vpop.xlane.xlu0 %2103 }
 0x7f6   : > { %v2117_v62 = vsub.f32 %v2099_v21, %v2113_v57  ;;  %v2114_v63 = vsub.f32 %v2088_v29, %v2104_v61  ;;  %5688 = vpow2.f32 %v2120_v41  ;;  %v1918_v21 = vsub.f32 %v6559_v25, %v1914_v54 }
 0x7f8   : > { %v2124_v49 = vmul.f32 1.442695, %v2117_v62  ;;  %v2118_v0 = vmul.f32 1.442695, %v2114_v63  ;;  %v1925_v28 = vmul.f32 1.442695, %v1918_v21 }
 0x7f9   : > { %v2110_v2 = vpop.xlane.xlu0 %2109 }
 0x7fa   : > { %5690 = vpow2.f32 %v2124_v49  ;;  %v2116_v3 = vsub.f32 %v2096_v36, %v2110_v2  ;;  %v1921_v36 = vmul.f32 1.442695, %v1916_v32 }
 0x7fb   : > { %5692 = vpow2.f32 %v2118_v0 }
 0x7fc   : > { %v2122_v4 = vmul.f32 1.442695, %v2116_v3 }
 0x7fe   : > { %5694 = vpow2.f32 %v2122_v4 }
 0x7ff   : > { %5696 = vpow2.f32 %v1923_v7 }
 0x800   : > { %5698 = vpow2.f32 %v1919_v9 }
 0x801   : > { %5700 = vpow2.f32 %v1925_v28 }
 0x802   : > { %5702 = vpow2.f32 %v1921_v36 }
 0x803   : > { %v6573_v10 = vpop.eup %5688 }
 0x804   : > { %v2129_v11 = vsel %vm1663_vm1, %v6573_v10, 0.0 }
 0x805   : > { %2130 = vadd.xlane.f32.xlu1 %v2129_v11 }
 0x807   : > { %v6577_v14 = vpop.eup %5690 }
 0x808   : > { %v6579_v16 = vpop.eup %5692  ;;  %v2135_v17 = vsel %vm1663_vm1, %v6577_v14, 0.0 }
 0x809   : > { %v2126_v13 = vsel %vm1663_vm1, %v6579_v16, 0.0  ;;  %2136 = vadd.xlane.f32.xlu1 %v2135_v17 }
 0x80a   : > { %2127 = vadd.xlane.f32.xlu0 %v2126_v13 }
 0x80b   : > { %v6585_v12 = vpop.eup %5694 }
 0x80c   : > { %v2132_v22 = vsel %vm1663_vm1, %v6585_v12, 0.0  ;;  %v5697_v24 = vpop.eup %5696 }
 0x80d   : > { %v1933_v19 = vsel %vm1663_vm1, %v5697_v24, 0.0  ;;  %v5699_v27 = vpop.eup %5698 }
 0x80e   : > { %2133 = vadd.xlane.f32.xlu0 %v2132_v22  ;;  %v1927_v29 = vsel %vm1663_vm1, %v5699_v27, 0.0  ;;  %v5701_v38 = vpop.eup %5700 }
 0x80f   : > { %v1936_v43 = vsel %vm1663_vm1, %v5701_v38, 0.0  ;;  %v5703_v25 = vpop.eup %5702 }
 0x810   : > { %v1930_v45 = vsel %vm1663_vm1, %v5703_v25, 0.0 }
 0x812   : > { %1934 = vadd.xlane.f32.xlu0 %v1933_v19 }
 0x816   : > { %1928 = vadd.xlane.f32.xlu0 %v1927_v29 }
 0x81a   : > { %1951 = vrot.lane.b32.xlu1 %v6458_v8, %s5956_s26 }
 0x81e   : > { %2150 = vrot.lane.b32.xlu1 %v6449_v1, %s5957_s4 }
 0x82c   : > { %1953 = vrot.lane.b32.xlu0 %v6449_v1, %s5956_s26 }
 0x830   : > { %2236 = vrot.lane.b32.xlu0 %v6437_v59, %s5958_s22 }
 0x834   : > { %2230 = vrot.lane.b32.xlu0 %v6423_v44, %s5958_s22 }
 0x842   : > { %1937 = vadd.xlane.f32.xlu1 %v1936_v43 }
 0x846   : > { %1931 = vadd.xlane.f32.xlu1 %v1930_v45 }
 0x857   : > { %2148 = vrot.lane.b32.xlu1 %v6458_v8, %s5957_s4 }
 0x85b   : > { %2234 = vrot.lane.b32.xlu1 %v6439_v60, %s5958_s22 }
 0x85f   : > { %2232 = vrot.lane.b32.xlu1 %v6456_v6, %s5958_s22 }
 0x88e   : > { %v2131_v44 = vpop.xlane.xlu1 %2130 }
 0x88f   : > { %5704 = vrcp.f32 %v2131_v44 }
 0x892   : > { %v2137_v48 = vpop.xlane.xlu1 %2136 }
 0x893   : > { %v2128_v59 = vpop.xlane.xlu0 %2127 }
 0x894   : > { %5706 = vrcp.f32 %v2128_v59 }
 0x896   : > { %v1952_v54 = vpop.permute.xlu1 %1951 }
 0x897   : > { %v2134_v23 = vpop.xlane.xlu0 %2133 }
 0x89a   : > { %v2151_v56 = vpop.permute.xlu1 %2150 }
 0x89b   : > { %v1935_v47 = vpop.xlane.xlu0 %1934 }
 0x89c   : > { %v5705_v6 = vpop.eup %5704 }
 0x89d   : > { %v2143_v7 = vmul.f32 %v5705_v6, %v6573_v10 }
 0x89f   : > { %v1929_v51 = vpop.xlane.xlu0 %1928 }
 0x8a1   : > { %v5707_v57 = vpop.eup %5706 }
 0x8a2   : > { %v2142_v3 = vmul.f32 %v5707_v57, %v6579_v16 }
 0x8a3   : > { %v1954_v55 = vpop.permute.xlu0 %1953 }
 0x8a4   : > { %5280 = vmatprep.subr.bf16.mxu1 %v1954_v55  ;;  %v2146_v17 = vpack.c.bf16 %v2143_v7, %v2142_v3 }
 0x8a5   : > { %5281 = vmatpush3.bf16.msra.mxu1 %v1954_v55 }
 0x8a6   : > { %5282 = vmatprep.subr.bf16.mxu1 %v1952_v54 }
 0x8a7   : > { %v2237_v19 = vpop.permute.xlu0 %2236 }
 0x8a8   : > { %v2248_v29 = vsel %vm1663_vm1, %v2237_v19, 0 }
 0x8a9   : > { %5283 = vmatpush3.bf16.msra.mxu1 %v1952_v54 }
 0x8aa   : > { %5296 = vmatprep.subr.bf16.mxu1 %v2151_v56 }
 0x8cb   : > { %v1938_v41 = vpop.xlane.xlu1 %1937 }
 0x8cc   : > { %5708 = vrcp.f32 %v1938_v41 }
 0x8cd   : > { %5710 = vrcp.f32 %v1929_v51 }
 0x8ce   : > { %5712 = vrcp.f32 %v1935_v47 }
 0x8cf   : > { %v1932_v60 = vpop.xlane.xlu1 %1931 }
 0x8d0   : > { %5714 = vrcp.f32 %v1932_v60 }
 0x8d1   : > { %5716 = vrcp.f32 %v2134_v23 }
 0x8d2   : > { %5718 = vrcp.f32 %v2137_v48 }
 0x8d3   : > { %v2149_v22 = vpop.permute.xlu1 %2148 }
 0x8d7   : > { %v2235_v21 = vpop.permute.xlu1 %2234 }
 0x8d8   : > { %v2245_v32 = vsel %vm1663_vm1, %v2235_v21, 0 }
 0x8d9   : > { %v5709_v61 = vpop.eup %5708 }
 0x8da   : > { %v5711_v62 = vpop.eup %5710  ;;  %v1946_v0 = vmul.f32 %v5709_v61, %v5701_v38 }
 0x8db   : > { %v5713_v63 = vpop.eup %5712  ;;  %v1943_v42 = vmul.f32 %v5711_v62, %v5699_v27  ;;  %v2231_v27 = vpop.permute.xlu0 %2230 }
 0x8dc   : > { %v1945_v4 = vmul.f32 %v5713_v63, %v5697_v24 }
 0x8dd   : > { %v5715_v49 = vpop.eup %5714 }
 0x8de   : > { %v1944_v2 = vmul.f32 %v5715_v49, %v5703_v25  ;;  %v1948_v9 = vpack.c.bf16 %v1946_v0, %v1945_v4  ;;  %v5717_v11 = vpop.eup %5716 }
 0x8df   : > { %v5719_v13 = vpop.eup %5718  ;;  %v2144_v16 = vmul.f32 %v5717_v11, %v6585_v12 }
 0x8e0   : > { %v1947_v50 = vpack.c.bf16 %v1944_v2, %v1943_v42  ;;  %v2145_v24 = vmul.f32 %v5719_v13, %v6577_v14  ;;  %v2233_v14 = vpop.permute.xlu1 %2232 }
 0x8e2   : > { %5284 = vmatprep.mubr.msk.bf16.mxu1 %vm1663_vm1, %v1947_v50  ;;  %v2147_v10 = vpack.c.bf16 %v2145_v24, %v2144_v16 }
 0x8e3   : > { %5285 = vmatmul.mubr.msk.bf16.vlgmr.msra.gmra.mxu1 %vm1663_vm1, %v1948_v9 }
 0x8e4   : > { %5297 = vmatpush3.bf16.msra.mxu1 %v2151_v56  ;;  %5300 = vmatprep.mubr.msk.bf16.mxu1 %vm1663_vm1, %v2146_v17 }
 0x8e5   : > { %5298 = vmatprep.subr.bf16.mxu1 %v2149_v22 }
 0x8e8   : > { %5299 = vmatpush3.bf16.msra.mxu1 %v2149_v22 }
 0x8e9   : > { %5458 = vmatprep.subr.msk.bf16.mxu1 %vm1663_vm1, %v2237_v19 }
 0x8eb   : > { %5301 = vmatmul.mubr.msk.bf16.vlgmr.msra.gmra.mxu1 %vm1663_vm1, %v2147_v10 }
 0x8ec   : > { %5305 = vmatpush3.bf16.xpose.msra.mxu1 %v2248_v29  ;;  %5308 = vmatprep.mubr.msk.bf16.mxu1 %vm1663_vm1, %v2231_v27 }
 0x8ed   : > { %5459 = vmatprep.subr.msk.bf16.mxu1 %vm1663_vm1, %v2235_v21 }
 0x8f4   : > { %5307 = vmatpush3.bf16.xpose.msra.mxu1 %v2245_v32 }
 0x8f5   : > { %5328 = vmatprep.subr.bf16.mxu1 %v6475_v31 }
 0x8fb   : > { %5309 = vmatmul.mubr.msk.bf16.vlgmr.msra.gmra.mxu1 %vm1663_vm1, %v2233_v14 }
 0x8fc   : > { %5329 = vmatpush3.bf16.msra.mxu1 %v6475_v31 }
 0x8fd   : > { %5330 = vmatprep.subr.bf16.mxu1 %v6478_v30 }
 0x900   : > { %5331 = vmatpush3.bf16.msra.mxu1 %v6478_v30 }
 0x9a3   : > { %v6629_v12 = vpop.f32.mrf.mxu1 }
 0x9a5   : > { %v6631_v28 = vpop.f32.mrf.mxu1 }
 0x9a7   : > { %v6633_v36 = vpop.f32.mrf.mxu1 }
 0x9a9   : > { %v6635_v38 = vpop.f32.mrf.mxu1 }
 0x9ab   : > { %v6637_v43 = vpop.f32.mrf.mxu1 }
 0x9ad   : > { %v6639_v25 = vpop.f32.mrf.mxu1 }
 0x9af   : > { %v6641_v45 = vpop.f32.mrf.mxu1 }
 0x9b1   : > { %v6643_v59 = vpop.f32.mrf.mxu1 }
 0x9bb   : > { %v5310_v44 = vpop.f32.mrf.mxu1 }
 0x9bc   : > { %v2293_v51 = vadd.f32 %v5310_v44, %v6491_v40  ;;  %v1580_v44 = vadd.f32 %v6549_v5, %v6430_v52 }
 0x9bd   : > { %v2284_v23 = vpop.f32.mrf.mxu1 }
 0x9be   : > { %v2285_v47 = vadd.f32 %v2284_v23, %v6486_v39  ;;  %v2305_v6 = vsel %vm1663_vm1, %v2293_v51, -inf }
 0x9bf   : > { %v5311_v48 = vpop.f32.mrf.mxu1 }
 0x9c0   : > { %v2299_v54 = vsel %vm1663_vm1, %v2285_v47, -inf  ;;  %v2296_v41 = vadd.f32 %v5311_v48, %v6504_v53 }
 0x9c1   : > { %v2287_v55 = vpop.f32.mrf.mxu1  ;;  %2300 = vmax.xlane.f32.xlu0 %v2299_v54 }
 0x9c2   : > { %v2288_v56 = vadd.f32 %v2287_v55, %v6497_v37  ;;  %v2308_v57 = vsel %vm1663_vm1, %v2296_v41, -inf }
 0x9c4   : > { %v2302_v60 = vsel %vm1663_vm1, %v2288_v56, -inf }
 0x9c5   : > { %2303 = vmax.xlane.f32.xlu1 %v2302_v60  ;;  %2306 = vmax.xlane.f32.xlu0 %v2305_v6 }
 0x9c9   : > { %2309 = vmax.xlane.f32.xlu0 %v2308_v57 }
 0xa4a   : > { %v2301_v61 = vpop.xlane.xlu0 %2300 }
 0xa4b   : > { %v2311_v62 = vsub.f32 %v2285_v47, %v2301_v61 }
 0xa4d   : > { %v2315_v3 = vmul.f32 1.442695, %v2311_v62 }
 0xa4e   : > { %v2304_v63 = vpop.xlane.xlu1 %2303  ;;  %v2307_v49 = vpop.xlane.xlu0 %2306 }
 0xa4f   : > { %v2313_v0 = vsub.f32 %v2293_v51, %v2307_v49  ;;  %v2312_v42 = vsub.f32 %v2288_v56, %v2304_v63 }
 0xa51   : > { %v2319_v2 = vmul.f32 1.442695, %v2313_v0  ;;  %v2317_v7 = vmul.f32 1.442695, %v2312_v42 }
 0xa52   : > { %v2310_v4 = vpop.xlane.xlu0 %2309 }
 0xa53   : > { %v2314_v50 = vsub.f32 %v2296_v41, %v2310_v4  ;;  %5720 = vpow2.f32 %v2319_v2 }
 0xa54   : > { %5722 = vpow2.f32 %v2315_v3 }
 0xa55   : > { %v2321_v9 = vmul.f32 1.442695, %v2314_v50 }
 0xa57   : > { %5724 = vpow2.f32 %v2321_v9 }
 0xa58   : > { %5726 = vpow2.f32 %v2317_v7 }
 0xa60   : > { %v5721_v11 = vpop.eup %5720 }
 0xa61   : > { %v2329_v17 = vsel %vm1663_vm1, %v5721_v11, 0.0  ;;  %v5723_v13 = vpop.eup %5722 }
 0xa62   : > { %2330 = vadd.xlane.f32.xlu0 %v2329_v17  ;;  %v2323_v24 = vsel %vm1663_vm1, %v5723_v13, 0.0 }
 0xa64   : > { %v5725_v22 = vpop.eup %5724 }
 0xa65   : > { %v2332_v19 = vsel %vm1663_vm1, %v5725_v22, 0.0  ;;  %v5727_v16 = vpop.eup %5726 }
 0xa66   : > { %2333 = vadd.xlane.f32.xlu1 %v2332_v19  ;;  %2324 = vadd.xlane.f32.xlu0 %v2323_v24  ;;  %v2326_v10 = vsel %vm1663_vm1, %v5727_v16, 0.0 }
 0xa6a   : > { %2327 = vadd.xlane.f32.xlu1 %v2326_v10 }
 0xa7b   : > { %2345 = vrot.lane.b32.xlu1 %v6458_v8, %s5958_s22  ;;  %v1576_v8 = vadd.f32 %v6473_v26, %v6430_v52  ;;  %v2434_v26 = vsel %vm1663_vm1, %v6471_v20, 0 }
 0xa7c   : > { %2347 = vrot.lane.b32.xlu0 %v6449_v1, %s5958_s22 }
 0xa7d   : > { %v6665_v1 = vpack.c.bf16 %v1580_v44, %v1576_v8 }
 0xa7f   : > { %v2437_v52 = vsel %vm1663_vm1, %v6665_v1, 0 }
 0xaeb   : > { %v2331_v27 = vpop.xlane.xlu0 %2330 }
 0xaef   : > { %v2334_v29 = vpop.xlane.xlu1 %2333  ;;  %v2325_v21 = vpop.xlane.xlu0 %2324 }
 0xaf0   : > { %5728 = vrcp.f32 %v2334_v29 }
 0xaf1   : > { %5730 = vrcp.f32 %v2325_v21 }
 0xaf2   : > { %5732 = vrcp.f32 %v2331_v27 }
 0xaf3   : > { %v2328_v32 = vpop.xlane.xlu1 %2327  ;;  %v2348_v14 = vpop.permute.xlu0 %2347 }
 0xaf4   : > { %5734 = vrcp.f32 %v2328_v32  ;;  %5312 = vmatprep.subr.bf16.mxu0 %v2348_v14 }
 0xaf5   : > { %5313 = vmatpush3.bf16.msra.mxu0 %v2348_v14 }
 0xaf7   : > { %v2346_v23 = vpop.permute.xlu1 %2345 }
 0xaf8   : > { %5314 = vmatprep.subr.bf16.mxu0 %v2346_v23 }
 0xaf9   : > { %5315 = vmatpush3.bf16.msra.mxu0 %v2346_v23 }
 0xafa   : > { %5460 = vmatprep.subr.msk.bf16.mxu0 %vm1663_vm1, %v6665_v1 }
 0xafd   : > { %v5729_v47 = vpop.eup %5728 }
 0xafe   : > { %v5731_v48 = vpop.eup %5730  ;;  %v2342_v55 = vmul.f32 %v5729_v47, %v5725_v22 }
 0xaff   : > { %v5733_v51 = vpop.eup %5732  ;;  %v2339_v56 = vmul.f32 %v5731_v48, %v5723_v13 }
 0xb00   : > { %v2341_v41 = vmul.f32 %v5733_v51, %v5721_v11 }
 0xb01   : > { %v5735_v54 = vpop.eup %5734 }
 0xb02   : > { %v2340_v5 = vmul.f32 %v5735_v54, %v5727_v16  ;;  %v2344_v6 = vpack.c.bf16 %v2342_v55, %v2341_v41 }
 0xb04   : > { %v2343_v60 = vpack.c.bf16 %v2340_v5, %v2339_v56 }
 0xb06   : > { %5316 = vmatprep.mubr.msk.bf16.mxu0 %vm1663_vm1, %v2343_v60 }
 0xb07   : > { %5317 = vmatmul.mubr.msk.bf16.vlgmr.msra.gmra.mxu0 %vm1663_vm1, %v2344_v6 }
 0xb08   : > { %5321 = vmatpush3.bf16.xpose.msra.mxu0 %v2437_v52  ;;  %5324 = vmatprep.mubr.msk.bf16.mxu0 %vm1663_vm1, %v6468_v18 }
 0xb09   : > { %5461 = vmatprep.subr.msk.bf16.mxu0 %vm1663_vm1, %v6471_v20 }
 0xb10   : > { %5323 = vmatpush3.bf16.xpose.msra.mxu0 %v2434_v26 }
 0xb17   : > { %5325 = vmatmul.mubr.msk.bf16.vlgmr.msra.gmra.mxu0 %vm1663_vm1, %v6481_v34 }
 0xbc7   : > { %v6681_v57 = vpop.f32.mrf.mxu0 }
 0xbc9   : > { %v6683_v61 = vpop.f32.mrf.mxu0 }
 0xbcb   : > { %v6685_v62 = vpop.f32.mrf.mxu0 }
 0xbcd   : > { %v6687_v63 = vpop.f32.mrf.mxu0 }
 0xbd7   : > { %v5326_v49 = vpop.f32.mrf.mxu0 }
 0xbd8   : > { %v2482_v9 = vadd.f32 %v5326_v49, %v6491_v40 }
 0xbd9   : > { %v2473_v0 = vpop.f32.mrf.mxu0 }
 0xbda   : > { %v2474_v42 = vadd.f32 %v2473_v0, %v6486_v39  ;;  %v2494_v13 = vsel %vm1663_vm1, %v2482_v9, -inf }
 0xbdb   : > { %v5327_v2 = vpop.f32.mrf.mxu0 }
 0xbdc   : > { %v2485_v3 = vadd.f32 %v5327_v2, %v6504_v53  ;;  %v2488_v4 = vsel %vm1663_vm1, %v2474_v42, -inf }
 0xbdd   : > { %v2476_v50 = vpop.f32.mrf.mxu0  ;;  %2489 = vmax.xlane.f32.xlu1 %v2488_v4 }
 0xbde   : > { %v2477_v7 = vadd.f32 %v2476_v50, %v6497_v37  ;;  %v2497_v17 = vsel %vm1663_vm1, %v2485_v3, -inf }
 0xbe0   : > { %v2491_v11 = vsel %vm1663_vm1, %v2477_v7, -inf }
 0xbe1   : > { %2492 = vmax.xlane.f32.xlu0 %v2491_v11  ;;  %2498 = vmax.xlane.f32.xlu1 %v2497_v17 }
 0xbe5   : > { %2495 = vmax.xlane.f32.xlu0 %v2494_v13 }
 0xc66   : > { %v2490_v22 = vpop.xlane.xlu1 %2489 }
 0xc67   : > { %v2500_v27 = vsub.f32 %v2474_v42, %v2490_v22 }
 0xc69   : > { %v2504_v44 = vmul.f32 1.442695, %v2500_v27 }
 0xc6a   : > { %v2493_v19 = vpop.xlane.xlu0 %2492  ;;  %v2499_v16 = vpop.xlane.xlu1 %2498 }
 0xc6b   : > { %v2501_v24 = vsub.f32 %v2477_v7, %v2493_v19  ;;  %v2503_v10 = vsub.f32 %v2485_v3, %v2499_v16 }
 0xc6d   : > { %v2506_v29 = vmul.f32 1.442695, %v2501_v24  ;;  %v2510_v21 = vmul.f32 1.442695, %v2503_v10 }
 0xc6e   : > { %v2496_v32 = vpop.xlane.xlu0 %2495 }
 0xc6f   : > { %5736 = vpow2.f32 %v2506_v29  ;;  %v2502_v14 = vsub.f32 %v2482_v9, %v2496_v32 }
 0xc70   : > { %5738 = vpow2.f32 %v2510_v21 }
 0xc71   : > { %v2508_v8 = vmul.f32 1.442695, %v2502_v14 }
 0xc73   : > { %5740 = vpow2.f32 %v2508_v8 }
 0xc74   : > { %5742 = vpow2.f32 %v2504_v44 }
 0xc7c   : > { %v5737_v23 = vpop.eup %5736 }
 0xc7d   : > { %v2515_v47 = vsel %vm1663_vm1, %v5737_v23, 0.0  ;;  %v5739_v48 = vpop.eup %5738 }
 0xc7e   : > { %2516 = vadd.xlane.f32.xlu1 %v2515_v47  ;;  %v2521_v55 = vsel %vm1663_vm1, %v5739_v48, 0.0 }
 0xc80   : > { %v5741_v51 = vpop.eup %5740 }
 0xc81   : > { %v2518_v54 = vsel %vm1663_vm1, %v5741_v51, 0.0  ;;  %v5743_v56 = vpop.eup %5742 }
 0xc82   : > { %2519 = vadd.xlane.f32.xlu0 %v2518_v54  ;;  %2522 = vadd.xlane.f32.xlu1 %v2521_v55  ;;  %v2512_v5 = vsel %vm1663_vm1, %v5743_v56, 0.0 }
 0xc86   : > { %2513 = vadd.xlane.f32.xlu0 %v2512_v5 }
 0xc93   : > { %2601 = vrot.lane.b32.xlu1 %v6471_v20, %s5956_s26 }
 0xc97   : > { %2595 = vrot.lane.b32.xlu1 %v6468_v18, %s5956_s26 }
 0xc9b   : > { %2597 = vrot.lane.b32.xlu1 %v6481_v34, %s5956_s26 }
 0xc9c   : > { %2603 = vrot.lane.b32.xlu0 %v6665_v1, %s5956_s26 }
 0xd07   : > { %v2517_v41 = vpop.xlane.xlu1 %2516 }
 0xd0b   : > { %v2520_v60 = vpop.xlane.xlu0 %2519  ;;  %v2523_v6 = vpop.xlane.xlu1 %2522 }
 0xd0c   : > { %5744 = vrcp.f32 %v2520_v60 }
 0xd0d   : > { %5746 = vrcp.f32 %v2523_v6 }
 0xd0e   : > { %5748 = vrcp.f32 %v2517_v41 }
 0xd0f   : > { %v2514_v52 = vpop.xlane.xlu0 %2513  ;;  %v2602_v3 = vpop.permute.xlu1 %2601 }
 0xd10   : > { %5750 = vrcp.f32 %v2514_v52  ;;  %v2612_v19 = vsel %vm1663_vm1, %v2602_v3, 0 }
 0xd13   : > { %v2604_v26 = vpop.permute.xlu0 %2603  ;;  %v2596_v22 = vpop.permute.xlu1 %2595 }
 0xd14   : > { %5462 = vmatprep.subr.msk.bf16.mxu1 %vm1663_vm1, %v2604_v26  ;;  %v2615_v13 = vsel %vm1663_vm1, %v2604_v26, 0 }
 0xd17   : > { %v2598_v16 = vpop.permute.xlu1 %2597 }
 0xd19   : > { %v5745_v49 = vpop.eup %5744 }
 0xd1a   : > { %v5747_v0 = vpop.eup %5746  ;;  %v2530_v4 = vmul.f32 %v5745_v49, %v5741_v51 }
 0xd1b   : > { %v5749_v42 = vpop.eup %5748  ;;  %v2531_v50 = vmul.f32 %v5747_v0, %v5739_v48 }
 0xd1c   : > { %v2529_v9 = vmul.f32 %v5749_v42, %v5737_v23 }
 0xd1d   : > { %v5751_v2 = vpop.eup %5750  ;;  %v2533_v17 = vpack.c.bf16 %v2531_v50, %v2530_v4 }
 0xd1e   : > { %v2528_v7 = vmul.f32 %v5751_v2, %v5743_v56 }
 0xd20   : > { %v2532_v11 = vpack.c.bf16 %v2529_v9, %v2528_v7 }
 0xd22   : > { %5332 = vmatprep.mubr.msk.bf16.mxu1 %vm1663_vm1, %v2532_v11 }
 0xd23   : > { %5333 = vmatmul.mubr.msk.bf16.vlgmr.msra.gmra.mxu1 %vm1663_vm1, %v2533_v17 }
 0xd24   : > { %5337 = vmatpush3.bf16.xpose.msra.mxu1 %v2615_v13  ;;  %5340 = vmatprep.mubr.msk.bf16.mxu1 %vm1663_vm1, %v2596_v22 }
 0xd25   : > { %5463 = vmatprep.subr.msk.bf16.mxu1 %vm1663_vm1, %v2602_v3 }
 0xd2c   : > { %5339 = vmatpush3.bf16.xpose.msra.mxu1 %v2612_v19 }
 0xd33   : > { %5341 = vmatmul.mubr.msk.bf16.vlgmr.msra.gmra.mxu1 %vm1663_vm1, %v2598_v16 }
 0xde3   : > { %v5334_v24 = vpop.f32.mrf.mxu1 }
 0xde4   : > { %2591 = vst.msk [vmem:[#allocation3 + $0x30] sm:$0xff] %vm1663_vm1, %v5334_v24 }
 0xde5   : > { %v2574_v10 = vpop.f32.mrf.mxu1 }
 0xde6   : > { %2589 = vst.msk [vmem:[#allocation3 + $0x20] sm:$0xff] %vm1663_vm1, %v2574_v10 }
 0xde7   : > { %v5335_v27 = vpop.f32.mrf.mxu1 }
 0xde8   : > { %2592 = vst.msk [vmem:[#allocation3 + $0x38] sm:$0xff] %vm1663_vm1, %v5335_v27 }
 0xde9   : > { %v2577_v29 = vpop.f32.mrf.mxu1 }
 0xdea   : > { %2590 = vst.msk [vmem:[#allocation3 + $0x28] sm:$0xff] %vm1663_vm1, %v2577_v29 }
 0xdf3   : > { %v5342_v21 = vpop.f32.mrf.mxu1 }
 0xdf4   : > { %v2660_v8 = vadd.f32 %v5342_v21, %v6491_v40 }
 0xdf5   : > { %v2651_v32 = vpop.f32.mrf.mxu1 }
 0xdf6   : > { %v2652_v14 = vadd.f32 %v2651_v32, %v6486_v39  ;;  %v2672_v55 = vsel %vm1663_vm1, %v2660_v8, -inf }
 0xdf7   : > { %v5343_v44 = vpop.f32.mrf.mxu1 }
 0xdf8   : > { %v2666_v23 = vsel %vm1663_vm1, %v2652_v14, -inf  ;;  %v2663_v51 = vadd.f32 %v5343_v44, %v6504_v53 }
 0xdf9   : > { %v2654_v47 = vpop.f32.mrf.mxu1  ;;  %2667 = vmax.xlane.f32.xlu0 %v2666_v23 }
 0xdfa   : > { %v2655_v48 = vadd.f32 %v2654_v47, %v6497_v37  ;;  %v2675_v56 = vsel %vm1663_vm1, %v2663_v51, -inf }
 0xdfc   : > { %v2669_v54 = vsel %vm1663_vm1, %v2655_v48, -inf }
 0xdfd   : > { %2670 = vmax.xlane.f32.xlu1 %v2669_v54  ;;  %2673 = vmax.xlane.f32.xlu0 %v2672_v55 }
 0xe01   : > { %2676 = vmax.xlane.f32.xlu0 %v2675_v56 }
 0xe0e   : > { %2714 = vrot.lane.b32.xlu1 %v6478_v30, %s5956_s26 }
 0xe82   : > { %v2668_v39 = vpop.xlane.xlu0 %2667 }
 0xe83   : > { %v2678_v40 = vsub.f32 %v2652_v14, %v2668_v39 }
 0xe85   : > { %v2682_v53 = vmul.f32 1.442695, %v2678_v40 }
 0xe86   : > { %v2671_v5 = vpop.xlane.xlu1 %2670  ;;  %v2674_v41 = vpop.xlane.xlu0 %2673 }
 0xe87   : > { %v2680_v60 = vsub.f32 %v2660_v8, %v2674_v41  ;;  %v2679_v37 = vsub.f32 %v2655_v48, %v2671_v5 }
 0xe89   : > { %v2686_v6 = vmul.f32 1.442695, %v2680_v60  ;;  %v2684_v49 = vmul.f32 1.442695, %v2679_v37 }
 0xe8a   : > { %v2677_v52 = vpop.xlane.xlu0 %2676  ;;  %v2715_v17 = vpop.permute.xlu1 %2714 }
 0xe8b   : > { %v2681_v26 = vsub.f32 %v2663_v51, %v2677_v52  ;;  %5752 = vpow2.f32 %v2686_v6 }
 0xe8c   : > { %5754 = vpow2.f32 %v2682_v53  ;;  %v6764_v53 = vld [vmem:[%s7517_s5] sm:$0xff] }
 0xe8d   : > { %v2688_v0 = vmul.f32 1.442695, %v2681_v26 }
 0xe8f   : > { %5756 = vpow2.f32 %v2688_v0 }
 0xe90   : > { %5758 = vpow2.f32 %v2684_v49  ;;  %v6770_v49 = vld [vmem:[%s7517_s5 + $0x10] sm:$0xff] }
 0xe98   : > { %v5753_v42 = vpop.eup %5752 }
 0xe99   : > { %v2696_v2 = vsel %vm1663_vm1, %v5753_v42, 0.0  ;;  %v5755_v3 = vpop.eup %5754 }
 0xe9a   : > { %2697 = vadd.xlane.f32.xlu0 %v2696_v2  ;;  %v2690_v9 = vsel %vm1663_vm1, %v5755_v3, 0.0 }
 0xe9c   : > { %v5757_v4 = vpop.eup %5756 }
 0xe9d   : > { %v2699_v50 = vsel %vm1663_vm1, %v5757_v4, 0.0  ;;  %v5759_v7 = vpop.eup %5758 }
 0xe9e   : > { %2700 = vadd.xlane.f32.xlu1 %v2699_v50  ;;  %2691 = vadd.xlane.f32.xlu0 %v2690_v9  ;;  %v2693_v11 = vsel %vm1663_vm1, %v5759_v7, 0.0  ;;  %v6783_v50 = vld [vmem:[%s7517_s5 + $0x18] sm:$0xff] }
 0xea2   : > { %2694 = vadd.xlane.f32.xlu1 %v2693_v11 }
 0xeb3   : > { %2801 = vrot.lane.b32.xlu1 %v6665_v1, %s5957_s4 }
 0xeb4   : > { %2716 = vrot.lane.b32.xlu0 %v6475_v31, %s5956_s26 }
 0xeb7   : > { %2799 = vrot.lane.b32.xlu1 %v6471_v20, %s5957_s4 }
 0xeb8   : > { %2795 = vrot.lane.b32.xlu0 %v6468_v18, %s5957_s4 }
 0xebb   : > { %2797 = vrot.lane.b32.xlu1 %v6481_v34, %s5957_s4 }
 0xf23   : > { %v2698_v13 = vpop.xlane.xlu0 %2697 }
 0xf27   : > { %v2701_v22 = vpop.xlane.xlu1 %2700  ;;  %v2692_v19 = vpop.xlane.xlu0 %2691 }
 0xf28   : > { %5760 = vrcp.f32 %v2701_v22 }
 0xf29   : > { %5762 = vrcp.f32 %v2692_v19 }
 0xf2a   : > { %5764 = vrcp.f32 %v2698_v13 }
 0xf2b   : > { %v2695_v16 = vpop.xlane.xlu1 %2694  ;;  %v2717_v24 = vpop.permute.xlu0 %2716 }
 0xf2c   : > { %5766 = vrcp.f32 %v2695_v16  ;;  %5344 = vmatprep.subr.bf16.mxu0 %v2717_v24 }
 0xf2d   : > { %5345 = vmatpush3.bf16.msra.mxu0 %v2717_v24 }
 0xf2e   : > { %5346 = vmatprep.subr.bf16.mxu0 %v2715_v17 }
 0xf2f   : > { %v2802_v10 = vpop.permute.xlu1 %2801  ;;  %v2796_v54 = vpop.permute.xlu0 %2795 }
 0xf30   : > { %v2813_v51 = vsel %vm1663_vm1, %v2802_v10, 0 }
 0xf31   : > { %5347 = vmatpush3.bf16.msra.mxu0 %v2715_v17 }
 0xf32   : > { %5464 = vmatprep.subr.msk.bf16.mxu0 %vm1663_vm1, %v2802_v10 }
 0xf33   : > { %v2800_v55 = vpop.permute.xlu1 %2799 }
 0xf34   : > { %v2810_v56 = vsel %vm1663_vm1, %v2800_v55, 0 }
 0xf35   : > { %v5761_v27 = vpop.eup %5760 }
 0xf36   : > { %v5763_v29 = vpop.eup %5762  ;;  %v2709_v14 = vmul.f32 %v5761_v27, %v5757_v4 }
 0xf37   : > { %v5765_v21 = vpop.eup %5764  ;;  %v2706_v44 = vmul.f32 %v5763_v29, %v5755_v3  ;;  %v2798_v39 = vpop.permute.xlu1 %2797  ;;  %v6777_v3 = vld [vmem:[%s7517_s5 + $0x8] sm:$0xff] }
 0xf38   : > { %v2708_v23 = vmul.f32 %v5765_v21, %v5753_v42 }
 0xf39   : > { %v5767_v32 = vpop.eup %5766 }
 0xf3a   : > { %v2707_v8 = vmul.f32 %v5767_v32, %v5759_v7  ;;  %v2711_v48 = vpack.c.bf16 %v2709_v14, %v2708_v23 }
 0xf3c   : > { %v2710_v47 = vpack.c.bf16 %v2707_v8, %v2706_v44 }
 0xf3e   : > { %5348 = vmatprep.mubr.msk.bf16.mxu0 %vm1663_vm1, %v2710_v47 }
 0xf3f   : > { %5349 = vmatmul.mubr.msk.bf16.vlgmr.msra.gmra.mxu0 %vm1663_vm1, %v2711_v48 }
 0xf40   : > { %5353 = vmatpush3.bf16.xpose.msra.mxu0 %v2813_v51  ;;  %5356 = vmatprep.mubr.msk.bf16.mxu0 %vm1663_vm1, %v2796_v54 }
 0xf41   : > { %5465 = vmatprep.subr.msk.bf16.mxu0 %vm1663_vm1, %v2800_v55 }
 0xf48   : > { %5355 = vmatpush3.bf16.xpose.msra.mxu0 %v2810_v56 }
 0xf4f   : > { %5357 = vmatmul.mubr.msk.bf16.vlgmr.msra.gmra.mxu0 %vm1663_vm1, %v2798_v39 }
 0xfff   : > { %v6753_v40 = vpop.f32.mrf.mxu0 }
0x1001   : > { %v6755_v5 = vpop.f32.mrf.mxu0 }
0x1003   : > { %v6757_v41 = vpop.f32.mrf.mxu0 }
0x1005   : > { %v6759_v60 = vpop.f32.mrf.mxu0 }
0x100f   : > { %v5358_v37 = vpop.f32.mrf.mxu0 }
0x1010   : > { %v2858_v0 = vadd.f32 %v6770_v49, %v5358_v37 }
0x1011   : > { %v2849_v6 = vpop.f32.mrf.mxu0 }
0x1012   : > { %v2850_v52 = vadd.f32 %v6764_v53, %v2849_v6  ;;  %v2870_v11 = vsel %vm1663_vm1, %v2858_v0, -inf }
0x1013   : > { %v5359_v26 = vpop.f32.mrf.mxu0 }
0x1014   : > { %v2864_v42 = vsel %vm1663_vm1, %v2850_v52, -inf  ;;  %v2861_v7 = vadd.f32 %v6783_v50, %v5359_v26 }
0x1015   : > { %v2852_v2 = vpop.f32.mrf.mxu0  ;;  %2865 = vmax.xlane.f32.xlu0 %v2864_v42 }
0x1016   : > { %v2853_v4 = vadd.f32 %v6777_v3, %v2852_v2  ;;  %v2873_v17 = vsel %vm1663_vm1, %v2861_v7, -inf }
0x1018   : > { %v2867_v9 = vsel %vm1663_vm1, %v2853_v4, -inf }
0x1019   : > { %2868 = vmax.xlane.f32.xlu1 %v2867_v9  ;;  %2871 = vmax.xlane.f32.xlu0 %v2870_v11 }
0x101d   : > { %2874 = vmax.xlane.f32.xlu0 %v2873_v17 }
0x102a   : > { %2910 = vrot.lane.b32.xlu1 %v6478_v30, %s5957_s4 }
0x109e   : > { %v2866_v13 = vpop.xlane.xlu0 %2865 }
0x109f   : > { %v2876_v22 = vsub.f32 %v2850_v52, %v2866_v13 }
0x10a1   : > { %v2880_v29 = vmul.f32 1.442695, %v2876_v22 }
0x10a2   : > { %v2869_v19 = vpop.xlane.xlu1 %2868  ;;  %v2872_v16 = vpop.xlane.xlu0 %2871 }
0x10a3   : > { %v2878_v24 = vsub.f32 %v2858_v0, %v2872_v16  ;;  %v2877_v10 = vsub.f32 %v2853_v4, %v2869_v19 }
0x10a5   : > { %v2884_v27 = vmul.f32 1.442695, %v2878_v24  ;;  %v2882_v14 = vmul.f32 1.442695, %v2877_v10 }
0x10a6   : > { %v2875_v21 = vpop.xlane.xlu0 %2874  ;;  %v2911_v39 = vpop.permute.xlu1 %2910 }
0x10a7   : > { %v2879_v32 = vsub.f32 %v2861_v7, %v2875_v21  ;;  %5768 = vpow2.f32 %v2884_v27 }
0x10a8   : > { %5770 = vpow2.f32 %v2880_v29 }
0x10a9   : > { %v2886_v44 = vmul.f32 1.442695, %v2879_v32 }
0x10ab   : > { %5772 = vpow2.f32 %v2886_v44 }
0x10ac   : > { %5774 = vpow2.f32 %v2882_v14 }
0x10b4   : > { %v5769_v8 = vpop.eup %5768 }
0x10b5   : > { %v2894_v23 = vsel %vm1663_vm1, %v5769_v8, 0.0  ;;  %v5771_v47 = vpop.eup %5770 }
0x10b6   : > { %2895 = vadd.xlane.f32.xlu0 %v2894_v23  ;;  %v2888_v55 = vsel %vm1663_vm1, %v5771_v47, 0.0 }
0x10b8   : > { %v5773_v48 = vpop.eup %5772 }
0x10b9   : > { %v2897_v51 = vsel %vm1663_vm1, %v5773_v48, 0.0  ;;  %v5775_v54 = vpop.eup %5774 }
0x10ba   : > { %2898 = vadd.xlane.f32.xlu1 %v2897_v51  ;;  %2889 = vadd.xlane.f32.xlu0 %v2888_v55  ;;  %v2891_v56 = vsel %vm1663_vm1, %v5775_v54, 0.0 }
0x10be   : > { %2892 = vadd.xlane.f32.xlu1 %v2891_v56 }
0x10cf   : > { %2997 = vrot.lane.b32.xlu1 %v6665_v1, %s5958_s22 }
0x10d0   : > { %2912 = vrot.lane.b32.xlu0 %v6475_v31, %s5957_s4 }
0x10d3   : > { %2995 = vrot.lane.b32.xlu1 %v6471_v20, %s5958_s22 }
0x10d4   : > { %2991 = vrot.lane.b32.xlu0 %v6468_v18, %s5958_s22 }
0x10d7   : > { %2993 = vrot.lane.b32.xlu1 %v6481_v34, %s5958_s22 }
0x113f   : > { %v2896_v37 = vpop.xlane.xlu0 %2895 }
0x1143   : > { %v2899_v6 = vpop.xlane.xlu1 %2898  ;;  %v2890_v52 = vpop.xlane.xlu0 %2889 }
0x1144   : > { %5776 = vrcp.f32 %v2899_v6 }
0x1145   : > { %5778 = vrcp.f32 %v2890_v52 }
0x1146   : > { %5780 = vrcp.f32 %v2896_v37 }
0x1147   : > { %v2893_v1 = vpop.xlane.xlu1 %2892  ;;  %v2913_v26 = vpop.permute.xlu0 %2912 }
0x1148   : > { %5782 = vrcp.f32 %v2893_v1  ;;  %5360 = vmatprep.subr.bf16.mxu1 %v2913_v26 }
0x1149   : > { %5361 = vmatpush3.bf16.msra.mxu1 %v2913_v26 }
0x114a   : > { %5362 = vmatprep.subr.bf16.mxu1 %v2911_v39 }
0x114b   : > { %v2998_v20 = vpop.permute.xlu1 %2997  ;;  %v2992_v22 = vpop.permute.xlu0 %2991 }
0x114c   : > { %v3009_v13 = vsel %vm1663_vm1, %v2998_v20, 0 }
0x114d   : > { %5363 = vmatpush3.bf16.msra.mxu1 %v2911_v39 }
0x114e   : > { %5466 = vmatprep.subr.msk.bf16.mxu1 %vm1663_vm1, %v2998_v20 }
0x114f   : > { %v2996_v19 = vpop.permute.xlu1 %2995 }
0x1150   : > { %v3006_v16 = vsel %vm1663_vm1, %v2996_v19, 0 }
0x1151   : > { %v5777_v18 = vpop.eup %5776 }
0x1152   : > { %v5779_v0 = vpop.eup %5778  ;;  %v2907_v2 = vmul.f32 %v5777_v18, %v5773_v48 }
0x1153   : > { %v5781_v34 = vpop.eup %5780  ;;  %v2904_v4 = vmul.f32 %v5779_v0, %v5771_v47  ;;  %v2994_v24 = vpop.permute.xlu1 %2993 }
0x1154   : > { %v2906_v9 = vmul.f32 %v5781_v34, %v5769_v8 }
0x1155   : > { %v5783_v42 = vpop.eup %5782 }
0x1156   : > { %v2905_v7 = vmul.f32 %v5783_v42, %v5775_v54  ;;  %v2909_v17 = vpack.c.bf16 %v2907_v2, %v2906_v9 }
0x1158   : > { %v2908_v11 = vpack.c.bf16 %v2905_v7, %v2904_v4 }
0x115a   : > { %5364 = vmatprep.mubr.msk.bf16.mxu1 %vm1663_vm1, %v2908_v11 }
0x115b   : > { %5365 = vmatmul.mubr.msk.bf16.vlgmr.msra.gmra.mxu1 %vm1663_vm1, %v2909_v17 }
0x115c   : > { %5369 = vmatpush3.bf16.xpose.msra.mxu1 %v3009_v13  ;;  %5372 = vmatprep.mubr.msk.bf16.mxu1 %vm1663_vm1, %v2992_v22 }
0x115d   : > { %5467 = vmatprep.subr.msk.bf16.mxu1 %vm1663_vm1, %v2996_v19 }
0x1164   : > { %5371 = vmatpush3.bf16.xpose.msra.mxu1 %v3006_v16 }
0x116b   : > { %5373 = vmatmul.mubr.msk.bf16.vlgmr.msra.gmra.mxu1 %vm1663_vm1, %v2994_v24 }
0x116c   : > { %3711 = vmatprep.mubr.bf16.mxu1 %v5955_v15 }
0x121b   : > { %v6814_v10 = vpop.f32.mrf.mxu1 }
0x121d   : > { %v6816_v27 = vpop.f32.mrf.mxu1 }
0x121f   : > { %v6818_v29 = vpop.f32.mrf.mxu1 }
0x1221   : > { %v6820_v21 = vpop.f32.mrf.mxu1 }
0x122b   : > { %v5374_v32 = vpop.f32.mrf.mxu1 }
0x122c   : > { %v3054_v23 = vadd.f32 %v6770_v49, %v5374_v32  ;;  %v5570_v32 = vld [vmem:[%s6111_s0 + $0x28] sm:$0xff]  }
0x122d   : > { %v3045_v14 = vpop.f32.mrf.mxu1 }
0x122e   : > { %v3046_v44 = vadd.f32 %v6764_v53, %v3045_v14  ;;  %v3066_v56 = vsel %vm1663_vm1, %v3054_v23, -inf }
0x122f   : > { %v5375_v8 = vpop.f32.mrf.mxu1 }
0x1230   : > { %v3060_v47 = vsel %vm1663_vm1, %v3046_v44, -inf  ;;  %v3057_v54 = vadd.f32 %v6783_v50, %v5375_v8  ;;  %v5571_v8 = vld [vmem:[%s6111_s0 + $0x20] sm:$0xff]  }
0x1231   : > { %v3048_v48 = vpop.f32.mrf.mxu1  ;;  %3061 = vmax.xlane.f32.xlu0 %v3060_v47 }
0x1232   : > { %v3049_v51 = vadd.f32 %v6777_v3, %v3048_v48  ;;  %v3069_v39 = vsel %vm1663_vm1, %v3057_v54, -inf  ;;  %v5572_v48 = vld [vmem:[%s6111_s0 + $0x18] sm:$0xff]  }
0x1234   : > { %v3063_v55 = vsel %vm1663_vm1, %v3049_v51, -inf }
0x1235   : > { %3064 = vmax.xlane.f32.xlu1 %v3063_v55  ;;  %3067 = vmax.xlane.f32.xlu0 %v3066_v56  ;;  %v5573_v55 = vld [vmem:[%s6111_s0 + $0x10] sm:$0xff]  }
0x1239   : > { %3070 = vmax.xlane.f32.xlu0 %v3069_v39 }
0x12ba   : > { %v3062_v53 = vpop.xlane.xlu0 %3061 }
0x12bb   : > { %v3072_v37 = vsub.f32 %v3046_v44, %v3062_v53 }
0x12bd   : > { %v3076_v20 = vmul.f32 1.442695, %v3072_v37 }
0x12be   : > { %v3065_v49 = vpop.xlane.xlu1 %3064  ;;  %v3068_v6 = vpop.xlane.xlu0 %3067 }
0x12bf   : > { %v3074_v52 = vsub.f32 %v3054_v23, %v3068_v6  ;;  %v3073_v1 = vsub.f32 %v3049_v51, %v3065_v49  ;;  %v5574_v6 = vld [vmem:[%s6111_s0 + $0x8] sm:$0xff]  }
0x12c1   : > { %v3080_v26 = vmul.f32 1.442695, %v3074_v52  ;;  %v3078_v50 = vmul.f32 1.442695, %v3073_v1  ;;  %v5575_v1 = vld [vmem:[%s6111_s0] sm:$0xff]  }
0x12c2   : > { %v3071_v3 = vpop.xlane.xlu0 %3070 }
0x12c3   : > { %v3075_v18 = vsub.f32 %v3057_v54, %v3071_v3  ;;  %5784 = vpow2.f32 %v3080_v26 }
0x12c4   : > { %5786 = vpow2.f32 %v3076_v20 }
0x12c5   : > { %v3082_v0 = vmul.f32 1.442695, %v3075_v18 }
0x12c7   : > { %5788 = vpow2.f32 %v3082_v0 }
0x12c8   : > { %5790 = vpow2.f32 %v3078_v50 }
0x12d0   : > { %v6830_v34 = vpop.eup %5784 }
0x12d1   : > { %v3090_v42 = vsel %vm1663_vm1, %v6830_v34, 0.0  ;;  %v6834_v2 = vpop.eup %5786 }
0x12d2   : > { %3091 = vadd.xlane.f32.xlu0 %v3090_v42  ;;  %v3084_v11 = vsel %vm1663_vm1, %v6834_v2, 0.0 }
0x12d4   : > { %v5789_v4 = vpop.eup %5788 }
0x12d5   : > { %v3093_v7 = vsel %vm1663_vm1, %v5789_v4, 0.0  ;;  %v6837_v9 = vpop.eup %5790 }
0x12d6   : > { %3094 = vadd.xlane.f32.xlu1 %v3093_v7  ;;  %3085 = vadd.xlane.f32.xlu0 %v3084_v11  ;;  %v3087_v17 = vsel %vm1663_vm1, %v6837_v9, 0.0 }
0x12da   : > { %3088 = vadd.xlane.f32.xlu1 %v3087_v17 }
0x12eb   : > { %3106 = vrot.lane.b32.xlu1 %v6478_v30, %s5958_s22 }
0x12ec   : > { %3108 = vrot.lane.b32.xlu0 %v6475_v31, %s5958_s22 }
0x12ef   : > { %2016 = vrot.lane.b32.xlu1 %v6631_v28, %s5958_s22 }
0x12f0   : > { %2020 = vrot.lane.b32.xlu0 %v6629_v12, %s5958_s22 }
0x12f3   : > { %2018 = vrot.lane.b32.xlu1 %v6635_v38, %s5958_s22 }
0x12f4   : > { %2213 = vrot.lane.b32.xlu0 %v6639_v25, %s5957_s4 }
0x12f7   : > { %2022 = vrot.lane.b32.xlu1 %v6633_v36, %s5958_s22 }
0x12f8   : > { %2217 = vrot.lane.b32.xlu0 %v6637_v43, %s5957_s4  ;;  %v5568_v43 = vld [vmem:[%s6111_s0 + $0x38] sm:$0xff]  }
0x12fb   : > { %2215 = vrot.lane.b32.xlu1 %v6643_v59, %s5957_s4 }
0x12fc   : > { %2410 = vrot.lane.b32.xlu0 %v6683_v61, %s5956_s26 }
0x12ff   : > { %2219 = vrot.lane.b32.xlu1 %v6641_v45, %s5957_s4 }
0x1300   : > { %2414 = vrot.lane.b32.xlu0 %v6681_v57, %s5956_s26 }
0x1303   : > { %2412 = vrot.lane.b32.xlu1 %v6687_v63, %s5956_s26 }
0x1304   : > { %2779 = vrot.lane.b32.xlu0 %v6755_v5, %s5958_s22 }
0x1307   : > { %2416 = vrot.lane.b32.xlu1 %v6685_v62, %s5956_s26 }
0x1308   : > { %2783 = vrot.lane.b32.xlu0 %v6753_v40, %s5958_s22 }
0x130b   : > { %2781 = vrot.lane.b32.xlu1 %v6759_v60, %s5958_s22 }
0x130c   : > { %2975 = vrot.lane.b32.xlu0 %v6816_v27, %s5957_s4  ;;  %v5569_v27 = vld [vmem:[%s6111_s0 + $0x30] sm:$0xff]   ;;  %s7523_s0 = sld [smem:[#allocation19_spill]] (!%p5037_p6) }
0x130f   : > { %2785 = vrot.lane.b32.xlu1 %v6757_v41, %s5958_s22  ;;  %s7518_s22 = scalar_lea.vmem %s7475_s11, %s6095_s28 }
0x1310   : > { %2979 = vrot.lane.b32.xlu0 %v6814_v10, %s5957_s4  ;;  %v4961_v7 = vld [vmem:[%s7518_s22] ss:$0 sm:$0xff] }
0x1313   : > { %2977 = vrot.lane.b32.xlu1 %v6820_v21, %s5957_s4 }
0x1317   : > { %2981 = vrot.lane.b32.xlu1 %v6818_v29, %s5957_s4 }
0x135b   : > { %v3092_v31 = vpop.xlane.xlu0 %3091 }
0x135f   : > { %v3095_v30 = vpop.xlane.xlu1 %3094  ;;  %v3086_v12 = vpop.xlane.xlu0 %3085 }
0x1360   : > { %5792 = vrcp.f32 %v3095_v30  ;;  %v5884_v30 = vld [vmem:[#allocation2 + $0x30] sm:$0xff] }
0x1361   : > { %5794 = vrcp.f32 %v3086_v12 }
0x1362   : > { %5796 = vrcp.f32 %v3092_v31 }
0x1363   : > { %v3089_v28 = vpop.xlane.xlu1 %3088  ;;  %v3109_v36 = vpop.permute.xlu0 %3108 }
0x1364   : > { %5798 = vrcp.f32 %v3089_v28  ;;  %5376 = vmatprep.subr.bf16.mxu0 %v3109_v36 }
0x1365   : > { %5377 = vmatpush3.bf16.msra.mxu0 %v3109_v36  ;;  %v5885_v36 = vld [vmem:[#allocation2 + $0x18] sm:$0xff] }
0x1367   : > { %v3107_v38 = vpop.permute.xlu1 %3106  ;;  %v2021_v25 = vpop.permute.xlu0 %2020 }
0x1368   : > { %5378 = vmatprep.subr.bf16.mxu0 %v3107_v38  ;;  %2031 = vst.msk [vmem:[#allocation3 + $0x10] sm:$0xff] %vm2028_vm2, %v2021_v25 }
0x1369   : > { %5379 = vmatpush3.bf16.msra.mxu0 %v3107_v38 }
0x136a   : > { %5384 = vmatprep.subr.bf16.mxu0 %v5568_v43 }
0x136b   : > { %v2017_v45 = vpop.permute.xlu1 %2016  ;;  %v2214_v59 = vpop.permute.xlu0 %2213 }
0x136c   : > { %2029 = vst.msk [vmem:[#allocation3] sm:$0xff] %vm2028_vm2, %v2017_v45  ;;  %v5886_v45 = vld [vmem:[#allocation2 + $0x10] sm:$0xff] }
0x136d   : > { %2226 = vst.msk [vmem:[#allocation3] sm:$0xff] %vm2225_vm3, %v2214_v59  ;;  %v5793_v57 = vpop.eup %5792 }
0x136e   : > { %v5795_v61 = vpop.eup %5794  ;;  %v3103_v41 = vmul.f32 %v5793_v57, %v5789_v4  ;;  %v5887_v57 = vld [vmem:[#allocation2] sm:$0xff] }
0x136f   : > { %v2019_v62 = vpop.permute.xlu1 %2018  ;;  %v5797_v63 = vpop.eup %5796  ;;  %v3100_v60 = vmul.f32 %v5795_v61, %v6834_v2 }
0x1370   : > { %2030 = vst.msk [vmem:[#allocation3 + $0x8] sm:$0xff] %vm2028_vm2, %v2019_v62  ;;  %v2218_v40 = vpop.permute.xlu0 %2217  ;;  %v3102_v19 = vmul.f32 %v5797_v63, %v6830_v34 }
0x1371   : > { %v5799_v5 = vpop.eup %5798  ;;  %2228 = vst.msk [vmem:[#allocation3 + $0x10] sm:$0xff] %vm2225_vm3, %v2218_v40 }
0x1372   : > { %v3101_v13 = vmul.f32 %v5799_v5, %v6837_v9  ;;  %v3105_v10 = vpack.c.bf16 %v3103_v41, %v3102_v19 }
0x1373   : > { %v2023_v22 = vpop.permute.xlu1 %2022 }
0x1374   : > { %2032 = vst.msk [vmem:[#allocation3 + $0x18] sm:$0xff] %vm2028_vm2, %v2023_v22  ;;  %v2411_v16 = vpop.permute.xlu0 %2410  ;;  %v3104_v24 = vpack.c.bf16 %v3101_v13, %v3100_v60 }
0x1375   : > { %2423 = vst.msk [vmem:[#allocation3] sm:$0xff] %vm2422_vm4, %v2411_v16 }
0x1376   : > { %5380 = vmatprep.mubr.msk.bf16.mxu0 %vm1663_vm1, %v3104_v24 }
0x1377   : > { %v2216_v29 = vpop.permute.xlu1 %2215  ;;  %5381 = vmatmul.mubr.msk.bf16.vlgmr.msra.gmra.mxu0 %vm1663_vm1, %v3105_v10 }
0x1378   : > { %2227 = vst.msk [vmem:[#allocation3 + $0x8] sm:$0xff] %vm2225_vm3, %v2216_v29  ;;  %5385 = vmatpush3.bf16.msra.mxu0 %v5568_v43  ;;  %v2415_v21 = vpop.permute.xlu0 %2414 }
0x1379   : > { %2425 = vst.msk [vmem:[#allocation3 + $0x10] sm:$0xff] %vm2422_vm4, %v2415_v21  ;;  %5386 = vmatprep.subr.bf16.mxu0 %v5569_v27 }
0x137b   : > { %v2220_v14 = vpop.permute.xlu1 %2219 }
0x137c   : > { %2229 = vst.msk [vmem:[#allocation3 + $0x18] sm:$0xff] %vm2225_vm3, %v2220_v14  ;;  %5387 = vmatpush3.bf16.msra.mxu0 %v5569_v27  ;;  %v2780_v44 = vpop.permute.xlu0 %2779  ;;  %v3187_v39 = vld [vmem:[#allocation3] sm:$0xff] }
0x137d   : > { %2791 = vst.msk [vmem:[#allocation3 + $0x20] sm:$0xff] %vm2028_vm2, %v2780_v44  ;;  %5388 = vmatprep.subr.bf16.mxu0 %v5570_v32 }
0x137f   : > { %v2413_v23 = vpop.permute.xlu1 %2412 }
0x1380   : > { %2424 = vst.msk [vmem:[#allocation3 + $0x8] sm:$0xff] %vm2422_vm4, %v2413_v23  ;;  %5389 = vmatpush3.bf16.msra.mxu0 %v5570_v32  ;;  %v2784_v47 = vpop.permute.xlu0 %2783  ;;  %v3189_v18 = vld [vmem:[#allocation3 + $0x10] sm:$0xff] }
0x1381   : > { %2793 = vst.msk [vmem:[#allocation3 + $0x30] sm:$0xff] %vm2028_vm2, %v2784_v47  ;;  %5390 = vmatprep.subr.bf16.mxu0 %v5571_v8 }
0x1383   : > { %v2417_v51 = vpop.permute.xlu1 %2416 }
0x1384   : > { %2426 = vst.msk [vmem:[#allocation3 + $0x18] sm:$0xff] %vm2422_vm4, %v2417_v51  ;;  %5391 = vmatpush3.bf16.msra.mxu0 %v5571_v8  ;;  %v2976_v54 = vpop.permute.xlu0 %2975  ;;  %v5888_v8 = vld [vmem:[#allocation2 + $0x8] sm:$0xff] }
0x1385   : > { %2987 = vst.msk [vmem:[#allocation3 + $0x20] sm:$0xff] %vm2225_vm3, %v2976_v54  ;;  %5392 = vmatprep.subr.bf16.mxu0 %v5572_v48 }
0x1387   : > { %v2782_v56 = vpop.permute.xlu1 %2781  ;;  %v3188_v53 = vld [vmem:[#allocation3 + $0x8] sm:$0xff] }
0x1388   : > { %2792 = vst.msk [vmem:[#allocation3 + $0x28] sm:$0xff] %vm2028_vm2, %v2782_v56  ;;  %5393 = vmatpush3.bf16.msra.mxu0 %v5572_v48  ;;  %v2980_v37 = vpop.permute.xlu0 %2979  ;;  %v3195_v49 = vpack.c.bf16 %v3188_v53, %v3187_v39  ;;  %v5889_v39 = vld [vmem:[#allocation2 + $0x28] sm:$0xff] }
0x1389   : > { %2989 = vst.msk [vmem:[#allocation3 + $0x30] sm:$0xff] %vm2225_vm3, %v2980_v37  ;;  %5394 = vmatprep.subr.bf16.mxu0 %v5573_v55 }
0x138a   : > { %5400 = vmatprep.mubr.bf16.mxu0 %v3195_v49  ;;  %v5890_v49 = vld [vmem:[#allocation2 + $0x20] sm:$0xff] }
0x138b   : > { %v2786_v52 = vpop.permute.xlu1 %2785  ;;  %v3190_v20 = vld [vmem:[#allocation3 + $0x18] sm:$0xff] }
0x138c   : > { %2794 = vst.msk [vmem:[#allocation3 + $0x38] sm:$0xff] %vm2028_vm2, %v2786_v52  ;;  %5395 = vmatpush3.bf16.msra.mxu0 %v5573_v55  ;;  %v3196_v50 = vpack.c.bf16 %v3190_v20, %v3189_v18  ;;  %v5891_v18 = vld [vmem:[#allocation2 + $0x38] sm:$0xff] }
0x138d   : > { %5396 = vmatprep.subr.bf16.mxu0 %v5574_v6 }
0x138f   : > { %v2978_v26 = vpop.permute.xlu1 %2977 }
0x1390   : > { %2988 = vst.msk [vmem:[#allocation3 + $0x28] sm:$0xff] %vm2225_vm3, %v2978_v26  ;;  %5397 = vmatpush3.bf16.msra.mxu0 %v5574_v6 }
0x1391   : > { %5398 = vmatprep.subr.bf16.mxu0 %v5575_v1 }
0x1393   : > { %v2982_v3 = vpop.permute.xlu1 %2981 }
0x1394   : > { %2990 = vst.msk [vmem:[#allocation3 + $0x38] sm:$0xff] %vm2225_vm3, %v2982_v3  ;;  %5399 = vmatpush3.bf16.msra.mxu0 %v5575_v1 }
0x1397   : > { %5401 = vmatmul.mubr.bf16.vlgmr.msra.gmra.mxu0 %v3196_v50 }
0x1437   : > { %v5382_v0 = vpop.f32.mrf.mxu0 }
0x1439   : > { %v3152_v34 = vpop.f32.mrf.mxu0 }
0x143a   : > { %3171 = vrot.lane.b32.xlu0 %v3152_v34, %s5956_s26 }
0x143b   : > { %v5383_v42 = vpop.f32.mrf.mxu0 }
0x143d   : > { %v3155_v2 = vpop.f32.mrf.mxu0 }
0x143e   : > { %3175 = vrot.lane.b32.xlu0 %v5382_v0, %s5956_s26  ;;  %3173 = vrot.lane.b32.xlu1 %v3155_v2, %s5956_s26 }
0x1442   : > { %3177 = vrot.lane.b32.xlu1 %v5383_v42, %s5956_s26 }
0x1457   : > { %v5402_v4 = vpop.f32.mrf.mxu0 }
0x1458   : > { %v3313_v31 = vadd.f32 %v5402_v4, %v4961_v7  ;;  %v5578_v4 = vld [vmem:[%s6139_s8 + $0xe4] ss:$16 sps:$4 sm:$0xff]  }
0x1459   : > { %v3304_v9 = vpop.f32.mrf.mxu0  ;;  %3679 = vmatprep.subr.bf16.mxu1 %v5578_v4 }
0x145a   : > { %v3305_v11 = vadd.f32 %v4961_v7, %v3304_v9  ;;  %v6932_v38 = vadd.f32 %v5885_v36, %v3313_v31  ;;  %v5576_v9 = vld [vmem:[%s6139_s8 + $0xe0] ss:$16 sps:$4 sm:$0xff]   ;;  %v5587_v31 = vld [vmem:[%s6139_s8 + $0xcc] ss:$16 sps:$4 sm:$0xff]   ;;  %v5590_v36 = vld [vmem:[%s6139_s8 + $0xa4] ss:$16 sps:$4 sm:$0xff]  }
0x145b   : > { %v5403_v17 = vpop.f32.mrf.mxu0  ;;  %3680 = vmatpush1.bf16.msra.mxu1 %v5576_v9 }
0x145c   : > { %v6929_v12 = vadd.f32 %v5884_v30, %v3305_v11  ;;  %v3316_v43 = vadd.f32 %v5403_v17, %v4961_v7  ;;  %v5579_v11 = vld [vmem:[%s6139_s8 + $0xe8] ss:$16 sps:$4 sm:$0xff]   ;;  %v5584_v17 = vld [vmem:[%s6139_s8 + $0xc4] ss:$16 sps:$4 sm:$0xff]   ;;  %v5582_v30 = vld [vmem:[%s6139_s8 + $0xc0] ss:$16 sps:$4 sm:$0xff]  }
0x145d   : > { %v3307_v28 = vpop.f32.mrf.mxu0  ;;  %3681 = vmatprep.subr.bf16.mxu1 %v5584_v17 }
0x145e   : > { %3345 = vadd.xlane.f32.xlu0 %v6929_v12  ;;  %v3308_v25 = vadd.f32 %v4961_v7, %v3307_v28  ;;  %v6935_v59 = vadd.f32 %v5886_v45, %v3316_v43  ;;  %v5585_v28 = vld [vmem:[%s6139_s8 + $0xc8] ss:$16 sps:$4 sm:$0xff]   ;;  %v5593_v43 = vld [vmem:[%s6139_s8 + $0xac] ss:$16 sps:$4 sm:$0xff]  }
0x145f   : > { %3682 = vmatpush1.bf16.msra.mxu1 %v5582_v30  ;;  %v5591_v45 = vld [vmem:[%s6139_s8 + $0xa8] ss:$16 sps:$4 sm:$0xff]  }
0x1460   : > { %v6937_v61 = vadd.f32 %v5887_v57, %v3308_v25  ;;  %v5588_v25 = vld [vmem:[%s6139_s8 + $0xa0] ss:$16 sps:$4 sm:$0xff]   ;;  %3683 = vmatprep.subr.bf16.mxu1 %v5590_v36  ;;  %v5596_v57 = vld [vmem:[%s6139_s8 + $0x84] ss:$16 sps:$4 sm:$0xff]  }
0x1462   : > { %3349 = vadd.xlane.f32.xlu0 %v6932_v38 }
0x1463   : > { %3684 = vmatpush1.bf16.msra.mxu1 %v5588_v25 }
0x1464   : > { %3685 = vmatprep.subr.bf16.mxu1 %v5596_v57 }
0x1466   : > { %3351 = vadd.xlane.f32.xlu0 %v6935_v59  ;;  %3347 = vadd.xlane.f32.xlu1 %v6937_v61 }
0x14ac   : > { %v3172_v62 = vpop.permute.xlu0 %3171 }
0x14ad   : > { %3183 = vst.msk [vmem:[#allocation3 + $0x20] sm:$0xff] %vm2422_vm4, %v3172_v62  ;;  %v5599_v62 = vld [vmem:[%s6139_s8 + $0x8c] ss:$16 sps:$4 sm:$0xff]  }
0x14b0   : > { %v3174_v63 = vpop.permute.xlu1 %3173  ;;  %v3176_v40 = vpop.permute.xlu0 %3175 }
0x14b1   : > { %3184 = vst.msk [vmem:[#allocation3 + $0x28] sm:$0xff] %vm2422_vm4, %v3174_v63  ;;  %3185 = vst.msk [vmem:[#allocation3 + $0x30] sm:$0xff] %vm2422_vm4, %v3176_v40  ;;  %v5594_v63 = vld [vmem:[%s6139_s8 + $0x80] ss:$16 sps:$4 sm:$0xff]   ;;  %v5597_v40 = vld [vmem:[%s6139_s8 + $0x88] ss:$16 sps:$4 sm:$0xff]  }
0x14b2   : > { %3686 = vmatpush1.bf16.msra.mxu1 %v5594_v63 }
0x14b4   : > { %v3178_v5 = vpop.permute.xlu1 %3177  ;;  %v3191_v41 = vld [vmem:[#allocation3 + $0x20] sm:$0xff] }
0x14b5   : > { %3186 = vst.msk [vmem:[#allocation3 + $0x38] sm:$0xff] %vm2422_vm4, %v3178_v5  ;;  %v5600_v5 = vld [vmem:[%s6139_s8 + $0x60] ss:$16 sps:$4 sm:$0xff]  }
0x14b8   : > { %v3192_v60 = vld [vmem:[#allocation3 + $0x28] sm:$0xff]  ;;  %v3193_v22 = vld [vmem:[#allocation3 + $0x30] sm:$0xff] }
0x14b9   : > { %v3197_v13 = vpack.c.bf16 %v3192_v60, %v3191_v41  ;;  %v5602_v41 = vld [vmem:[%s6139_s8 + $0x64] ss:$16 sps:$4 sm:$0xff]   ;;  %v5603_v60 = vld [vmem:[%s6139_s8 + $0x68] ss:$16 sps:$4 sm:$0xff]  }
0x14ba   : > { %3687 = vmatprep.subr.bf16.mxu1 %v5602_v41 }
0x14bb   : > { %5404 = vmatprep.mubr.bf16.mxu0 %v3197_v13  ;;  %v5605_v13 = vld [vmem:[%s6139_s8 + $0x6c] ss:$16 sps:$4 sm:$0xff]   ;;  %3688 = vmatpush1.bf16.msra.mxu1 %v5600_v5 }
0x14bc   : > { %v3194_v19 = vld [vmem:[#allocation3 + $0x38] sm:$0xff] }
0x14bd   : > { %v3198_v16 = vpack.c.bf16 %v3194_v19, %v3193_v22  ;;  %v5608_v22 = vld [vmem:[%s6139_s8 + $0x44] ss:$16 sps:$4 sm:$0xff]   ;;  %v5611_v19 = vld [vmem:[%s6139_s8 + $0x4c] ss:$16 sps:$4 sm:$0xff]  }
0x14be   : > { %3689 = vmatprep.subr.bf16.mxu1 %v5608_v22  ;;  %v7045_v22 = vld [vmem:[%s7519_s21] ss:$0 sm:$0xff] }
0x14bf   : > { %5405 = vmatmul.mubr.bf16.gmra.mxu0 %v3198_v16  ;;  %v5606_v16 = vld [vmem:[%s6139_s8 + $0x40] ss:$16 sps:$4 sm:$0xff]  }
0x14c0   : > { %3784 = vmatprep.mubr.bf16.mxu0 %v5955_v15  ;;  %3690 = vmatpush1.bf16.msra.mxu1 %v5606_v16 }
0x14e7   : > { %v3346_v24 = vpop.xlane.xlu0 %3345 }
0x14e8   : > { %v3361_v21 = vmul.f32 0.0078125, %v3346_v24  ;;  %v5609_v24 = vld [vmem:[%s6139_s8 + $0x48] ss:$16 sps:$4 sm:$0xff]  }
0x14ea   : > { %v6950_v54 = vsub.f32 %v6929_v12, %v3361_v21  ;;  %v5615_v21 = vld [vmem:[%s6139_s8 + $0x28] ss:$16 sps:$4 sm:$0xff]  }
0x14eb   : > { %v3350_v32 = vpop.xlane.xlu0 %3349 }
0x14ec   : > { %v3363_v55 = vmul.f32 0.0078125, %v3350_v32  ;;  %v3377_v1 = vmul.f32 %v6950_v54, %v6950_v54  ;;  %v5620_v32 = vld [vmem:[%s6139_s8 + $0x4] ss:$16 sps:$4 sm:$0xff]  }
0x14ee   : > { %v6961_v26 = vsub.f32 %v6932_v38, %v3363_v55 }
0x14ef   : > { %v3348_v47 = vpop.xlane.xlu1 %3347  ;;  %v3352_v52 = vpop.xlane.xlu0 %3351 }
0x14f0   : > { %v3362_v56 = vmul.f32 0.0078125, %v3348_v47  ;;  %v3364_v20 = vmul.f32 0.0078125, %v3352_v52  ;;  %v3379_v42 = vmul.f32 %v6961_v26, %v6961_v26 }
0x14f2   : > { %v6964_v3 = vsub.f32 %v6937_v61, %v3362_v56  ;;  %v6970_v0 = vsub.f32 %v6935_v59, %v3364_v20 }
0x14f4   : > { %v3378_v34 = vmul.f32 %v6964_v3, %v6964_v3  ;;  %v3380_v2 = vmul.f32 %v6970_v0, %v6970_v0 }
0x157f   : > { %v5406_v10 = vpop.f32.mrf.mxu0 }
0x1580   : > { %v3329_v44 = vadd.f32 %v5406_v10, %v4961_v7  ;;  %v5614_v10 = vld [vmem:[%s6139_s8 + $0x24] ss:$16 sps:$4 sm:$0xff]  }
0x1581   : > { %v3320_v27 = vpop.f32.mrf.mxu0  ;;  %3691 = vmatprep.subr.bf16.mxu1 %v5614_v10 }
0x1582   : > { %v3321_v29 = vadd.f32 %v4961_v7, %v3320_v27  ;;  %v6952_v53 = vadd.f32 %v5889_v39, %v3329_v44  ;;  %v5617_v27 = vld [vmem:[%s6139_s8 + $0x2c] ss:$16 sps:$4 sm:$0xff]   ;;  %v5618_v44 = vld [vmem:[%s6139_s8] ss:$16 sps:$4 sm:$0xff]  }
0x1583   : > { %v5407_v14 = vpop.f32.mrf.mxu0 }
0x1584   : > { %v6946_v23 = vadd.f32 %v5888_v8, %v3321_v29  ;;  %v3332_v37 = vadd.f32 %v5407_v14, %v4961_v7  ;;  %v5612_v29 = vld [vmem:[%s6139_s8 + $0x20] ss:$16 sps:$4 sm:$0xff]   ;;  %v5623_v14 = vld [vmem:[%s6139_s8 + $0xc] ss:$16 sps:$4 sm:$0xff]   ;;  %v5621_v8 = vld [vmem:[%s6139_s8 + $0x8] ss:$16 sps:$4 sm:$0xff]  }
0x1585   : > { %v3323_v48 = vpop.f32.mrf.mxu0  ;;  %3692 = vmatpush1.bf16.msra.mxu1 %v5612_v29 }
0x1586   : > { %v3324_v51 = vadd.f32 %v4961_v7, %v3323_v48  ;;  %3353 = vadd.xlane.f32.xlu0 %v6946_v23  ;;  %v6966_v50 = vadd.f32 %v5891_v18, %v3332_v37  ;;  %v5581_v7 = vld [vmem:[%s6139_s8 + $0xec] ss:$16 sps:$4 sm:$0xff]   ;;  %3693 = vmatprep.subr.bf16.mxu1 %v5620_v32 }
0x1587   : > { %3752 = vmatprep.subr.bf16.mxu0 %v5581_v7 }
0x1588   : > { %v6954_v6 = vadd.f32 %v5890_v49, %v3324_v51  ;;  %3753 = vmatpush1.bf16.msra.mxu0 %v5579_v11 }
0x1589   : > { %3754 = vmatprep.subr.bf16.mxu0 %v5587_v31  ;;  %3694 = vmatpush1.bf16.msra.mxu1 %v5618_v44  ;;  %v5625_v44 = vld [vmem:[%s6150_s18 + $0xf8] sm:$0xff]  }
0x158a   : > { %3355 = vadd.xlane.f32.xlu1 %v6954_v6  ;;  %3357 = vadd.xlane.f32.xlu0 %v6952_v53 }
0x158c   : > { %3755 = vmatpush1.bf16.msra.mxu0 %v5585_v28 }
0x158d   : > { %3756 = vmatprep.subr.bf16.mxu0 %v5593_v43 }
0x158e   : > { %3359 = vadd.xlane.f32.xlu1 %v6966_v50  ;;  %3385 = vadd.xlane.f32.xlu0 %v3377_v1 }
0x1590   : > { %3757 = vmatpush1.bf16.msra.mxu0 %v5591_v45 }
0x1591   : > { %3758 = vmatprep.subr.bf16.mxu0 %v5599_v62 }
0x1592   : > { %3387 = vadd.xlane.f32.xlu1 %v3378_v34  ;;  %3389 = vadd.xlane.f32.xlu0 %v3379_v42 }
0x1594   : > { %3759 = vmatpush1.bf16.msra.mxu0 %v5597_v40  ;;  %v7036_v40 = vld [vmem:[%s842_s27] ss:$0 sm:$0xff] }
0x1595   : > { %3760 = vmatprep.subr.bf16.mxu0 %v5605_v13 }
0x1596   : > { %3391 = vadd.xlane.f32.xlu1 %v3380_v2 }
0x1598   : > { %3761 = vmatpush1.bf16.msra.mxu0 %v5603_v60 }
0x1599   : > { %3762 = vmatprep.subr.bf16.mxu0 %v5611_v19 }
0x159c   : > { %3763 = vmatpush1.bf16.msra.mxu0 %v5609_v24 }
0x159d   : > { %3764 = vmatprep.subr.bf16.mxu0 %v5617_v27 }
0x15a0   : > { %3765 = vmatpush1.bf16.msra.mxu0 %v5615_v21 }
0x15a1   : > { %3766 = vmatprep.subr.bf16.mxu0 %v5623_v14  ;;  %v5624_v14 = vld [vmem:[%s6150_s18 + $0x78] sm:$0xff]  }
0x15a2   : > { %5143 = vmatprep.subr.bf16.mxu1 %v5624_v14 }
0x15a4   : > { %3767 = vmatpush1.bf16.msra.mxu0 %v5621_v8  ;;  %v5626_v8 = vld [vmem:[%s6150_s18 + $0x38] sm:$0xff]  }
0x15a5   : > { %5183 = vmatprep.subr.bf16.mxu0 %v5625_v44 }
0x160f   : > { %v3354_v47 = vpop.xlane.xlu0 %3353 }
0x1610   : > { %v3365_v48 = vmul.f32 0.0078125, %v3354_v47  ;;  %v5627_v47 = vld [vmem:[%s6150_s18 + $0xb8] sm:$0xff]  }
0x1612   : > { %v7011_v51 = vsub.f32 %v6946_v23, %v3365_v48  ;;  %v5628_v48 = vld [vmem:[%s6150_s18 + $0x70] sm:$0xff]  }
0x1613   : > { %v3356_v55 = vpop.xlane.xlu1 %3355  ;;  %v3358_v56 = vpop.xlane.xlu0 %3357 }
0x1614   : > { %v3366_v39 = vmul.f32 0.0078125, %v3356_v55  ;;  %v3367_v37 = vmul.f32 0.0078125, %v3358_v56  ;;  %v3381_v49 = vmul.f32 %v7011_v51, %v7011_v51  ;;  %v5629_v55 = vld [vmem:[%s6150_s18 + $0xf0] sm:$0xff]  }
0x1615   : > { %v5630_v56 = vld [vmem:[%s6150_s18 + $0x30] sm:$0xff]  }
0x1616   : > { %v7016_v52 = vsub.f32 %v6954_v6, %v3366_v39  ;;  %v7019_v1 = vsub.f32 %v6952_v53, %v3367_v37  ;;  %3393 = vadd.xlane.f32.xlu0 %v3381_v49  ;;  %v5631_v39 = vld [vmem:[%s6150_s18 + $0xb0] sm:$0xff]   ;;  %v5632_v37 = vld [vmem:[%s6150_s18 + $0x68] sm:$0xff]  }
0x1617   : > { %v3360_v20 = vpop.xlane.xlu1 %3359  ;;  %v3386_v18 = vpop.xlane.xlu0 %3385  ;;  %v5633_v49 = vld [vmem:[%s6150_s18 + $0xe8] sm:$0xff]  }
0x1618   : > { %v3368_v34 = vmul.f32 0.0078125, %v3360_v20  ;;  %v3401_v42 = vmul.f32 0.0078125, %v3386_v18  ;;  %v3382_v2 = vmul.f32 %v7016_v52, %v7016_v52  ;;  %v3383_v4 = vmul.f32 %v7019_v1, %v7019_v1  ;;  %v5634_v20 = vld [vmem:[%s6150_s18 + $0x28] sm:$0xff]  }
0x1619   : > { %v5635_v18 = vld [vmem:[%s6150_s18 + $0xa8] sm:$0xff]  }
0x161a   : > { %v7026_v7 = vsub.f32 %v6966_v50, %v3368_v34  ;;  %v3409_v9 = vadd.f32 1e-05, %v3401_v42  ;;  %3395 = vadd.xlane.f32.xlu1 %v3382_v2  ;;  %3397 = vadd.xlane.f32.xlu0 %v3383_v4  ;;  %v5636_v34 = vld [vmem:[%s6150_s18 + $0x60] sm:$0xff]  }
0x161b   : > { %v3388_v11 = vpop.xlane.xlu1 %3387  ;;  %v3390_v17 = vpop.xlane.xlu0 %3389  ;;  %v5637_v42 = vld [vmem:[%s6150_s18 + $0xe0] sm:$0xff]  }
0x161c   : > { %5800 = vrsqrt.f32 %v3409_v9  ;;  %v3402_v31 = vmul.f32 0.0078125, %v3388_v11  ;;  %v3403_v30 = vmul.f32 0.0078125, %v3390_v17  ;;  %v3384_v28 = vmul.f32 %v7026_v7, %v7026_v7  ;;  %v5638_v2 = vld [vmem:[%s6150_s18 + $0x20] sm:$0xff]   ;;  %v5640_v9 = vld [vmem:[%s6150_s18 + $0x58] sm:$0xff]  }
0x161d   : > { %v5639_v4 = vld [vmem:[%s6150_s18 + $0xa0] sm:$0xff]   ;;  %v5641_v11 = vld [vmem:[%s6150_s18 + $0xd8] sm:$0xff]  }
0x161e   : > { %v3410_v36 = vadd.f32 1e-05, %v3402_v31  ;;  %v3411_v43 = vadd.f32 1e-05, %v3403_v30  ;;  %3399 = vadd.xlane.f32.xlu1 %v3384_v28  ;;  %v5642_v17 = vld [vmem:[%s6150_s18 + $0x18] sm:$0xff]   ;;  %v5644_v30 = vld [vmem:[%s6150_s18 + $0x50] sm:$0xff]  }
0x161f   : > { %v3392_v25 = vpop.xlane.xlu1 %3391  ;;  %v5643_v31 = vld [vmem:[%s6150_s18 + $0x98] sm:$0xff]   ;;  %v5645_v28 = vld [vmem:[%s6150_s18 + $0xd0] sm:$0xff]  }
0x1620   : > { %5802 = vrsqrt.f32 %v3410_v36  ;;  %v3404_v45 = vmul.f32 0.0078125, %v3392_v25  ;;  %v5646_v36 = vld [vmem:[%s6150_s18 + $0x10] sm:$0xff]   ;;  %v5648_v25 = vld [vmem:[%s6150_s18 + $0x48] sm:$0xff]  }
0x1621   : > { %5804 = vrsqrt.f32 %v3411_v43  ;;  %v5647_v43 = vld [vmem:[%s6150_s18 + $0x90] sm:$0xff]  }
0x1622   : > { %v3412_v57 = vadd.f32 1e-05, %v3404_v45  ;;  %v5649_v45 = vld [vmem:[%s6150_s18 + $0xc8] sm:$0xff]  }
0x1624   : > { %5806 = vrsqrt.f32 %v3412_v57  ;;  %v5650_v57 = vld [vmem:[%s6150_s18 + $0x8] sm:$0xff]  }
0x1629   : > { %v5801_v62 = vpop.eup %5800 }
0x162a   : > { %v3425_v63 = vmul.f32 %v5801_v62, %v6950_v54  ;;  %v5651_v62 = vld [vmem:[%s6150_s18 + $0x88] sm:$0xff]  }
0x162c   : > { %v3439_v60 = vmul.f32 %v7036_v40, %v3425_v63 }
0x162d   : > { %v5803_v5 = vpop.eup %5802 }
0x162e   : > { %v3426_v41 = vmul.f32 %v5803_v5, %v6964_v3  ;;  %v5805_v13 = vpop.eup %5804  ;;  %v3453_v16 = vadd.f32 %v7045_v22, %v3439_v60  ;;  %v5652_v5 = vld [vmem:[%s6150_s18 + $0x40] sm:$0xff]  }
0x162f   : > { %v3427_v10 = vmul.f32 %v5805_v13, %v6961_v26 }
0x1630   : > { %v3440_v54 = vmul.f32 %v7036_v40, %v3426_v41  ;;  %v5653_v41 = vld [vmem:[%s6150_s18 + $0xc0] sm:$0xff]  }
0x1631   : > { %v5807_v19 = vpop.eup %5806  ;;  %v3441_v21 = vmul.f32 %v7036_v40, %v3427_v10 }
0x1632   : > { %v3454_v24 = vadd.f32 %v7045_v22, %v3440_v54  ;;  %v3428_v3 = vmul.f32 %v5807_v19, %v6970_v0  ;;  %v5654_v54 = vld [vmem:[%s6150_s18] sm:$0xff]  }
0x1633   : > { %v3455_v0 = vadd.f32 %v7045_v22, %v3441_v21  ;;  %v5655_v19 = vld [vmem:[%s6150_s18 + $0x80] sm:$0xff]   ;;  %s7520_s18 = scalar_lea.vmem %s7481_s17, %s6095_s28 }
0x1634   : > { %v3461_v27 = vpack.c.bf16 %v3454_v24, %v3453_v16  ;;  %v3442_v29 = vmul.f32 %v7036_v40, %v3428_v3 }
0x1636   : > { %3712 = vmatmul.mubr.bf16.vlgmr.msra.gmra.mxu1 %v3461_v27  ;;  %3785 = vmatmul.mubr.bf16.vlgmr.msra.gmra.mxu0 %v3461_v27  ;;  %v3456_v26 = vadd.f32 %v7045_v22, %v3442_v29 }
0x1637   : > { %3721 = vmatprep.mubr.bf16.mxu1 %v5955_v15  ;;  %3794 = vmatprep.mubr.bf16.mxu0 %v5955_v15 }
0x1638   : > { %v3462_v32 = vpack.c.bf16 %v3456_v26, %v3455_v0  ;;  %5144 = vmatpush3.bf16.msra.mxu1 %v5626_v8  ;;  %5184 = vmatpush3.bf16.msra.mxu0 %v5627_v47 }
0x1639   : > { %5145 = vmatprep.subr.bf16.mxu1 %v5628_v48  ;;  %5185 = vmatprep.subr.bf16.mxu0 %v5629_v55 }
0x163c   : > { %5146 = vmatpush3.bf16.msra.mxu1 %v5630_v56  ;;  %5186 = vmatpush3.bf16.msra.mxu0 %v5631_v39 }
0x163d   : > { %5147 = vmatprep.subr.bf16.mxu1 %v5632_v37  ;;  %5187 = vmatprep.subr.bf16.mxu0 %v5633_v49 }
0x163e   : > { %3722 = vmatmul.mubr.bf16.gmra.mxu1 %v3462_v32  ;;  %3795 = vmatmul.mubr.bf16.gmra.mxu0 %v3462_v32 }
0x163f   : > { %3731 = vmatprep.mubr.bf16.mxu1 %v5955_v15  ;;  %3804 = vmatprep.mubr.bf16.mxu0 %v5955_v15 }
0x1640   : > { %5148 = vmatpush3.bf16.msra.mxu1 %v5634_v20  ;;  %5188 = vmatpush3.bf16.msra.mxu0 %v5635_v18 }
0x1641   : > { %5149 = vmatprep.subr.bf16.mxu1 %v5636_v34  ;;  %5189 = vmatprep.subr.bf16.mxu0 %v5637_v42 }
0x1644   : > { %5150 = vmatpush3.bf16.msra.mxu1 %v5638_v2  ;;  %5190 = vmatpush3.bf16.msra.mxu0 %v5639_v4 }
0x1645   : > { %5151 = vmatprep.subr.bf16.mxu1 %v5640_v9  ;;  %5191 = vmatprep.subr.bf16.mxu0 %v5641_v11 }
0x1648   : > { %5152 = vmatpush3.bf16.msra.mxu1 %v5642_v17  ;;  %5192 = vmatpush3.bf16.msra.mxu0 %v5643_v31 }
0x1649   : > { %5153 = vmatprep.subr.bf16.mxu1 %v5644_v30  ;;  %5193 = vmatprep.subr.bf16.mxu0 %v5645_v28 }
0x164c   : > { %5154 = vmatpush3.bf16.msra.mxu1 %v5646_v36  ;;  %5194 = vmatpush3.bf16.msra.mxu0 %v5647_v43 }
0x164d   : > { %5155 = vmatprep.subr.bf16.mxu1 %v5648_v25  ;;  %5195 = vmatprep.subr.bf16.mxu0 %v5649_v45 }
0x1650   : > { %5156 = vmatpush3.bf16.msra.mxu1 %v5650_v57  ;;  %5196 = vmatpush3.bf16.msra.mxu0 %v5651_v62 }
0x1651   : > { %5157 = vmatprep.subr.bf16.mxu1 %v5652_v5  ;;  %5197 = vmatprep.subr.bf16.mxu0 %v5653_v41 }
0x1654   : > { %5158 = vmatpush3.bf16.msra.mxu1 %v5654_v54  ;;  %5198 = vmatpush3.bf16.msra.mxu0 %v5655_v19 }
0x169f   : > { %v3394_v63 = vpop.xlane.xlu0 %3393 }
0x16a0   : > { %v3405_v60 = vmul.f32 0.0078125, %v3394_v63 }
0x16a2   : > { %v3413_v13 = vadd.f32 1e-05, %v3405_v60 }
0x16a3   : > { %v3396_v16 = vpop.xlane.xlu1 %3395  ;;  %v3398_v24 = vpop.xlane.xlu0 %3397 }
0x16a4   : > { %5808 = vrsqrt.f32 %v3413_v13  ;;  %v3406_v10 = vmul.f32 0.0078125, %v3396_v16  ;;  %v3407_v3 = vmul.f32 0.0078125, %v3398_v24 }
0x16a6   : > { %v3414_v27 = vadd.f32 1e-05, %v3406_v10  ;;  %v3415_v29 = vadd.f32 1e-05, %v3407_v3 }
0x16a7   : > { %v3400_v21 = vpop.xlane.xlu1 %3399 }
0x16a8   : > { %5810 = vrsqrt.f32 %v3414_v27  ;;  %v3408_v26 = vmul.f32 0.0078125, %v3400_v21 }
0x16a9   : > { %5812 = vrsqrt.f32 %v3415_v29 }
0x16aa   : > { %v3416_v0 = vadd.f32 1e-05, %v3408_v26 }
0x16ac   : > { %5814 = vrsqrt.f32 %v3416_v0 }
0x16b1   : > { %v5809_v32 = vpop.eup %5808 }
0x16b2   : > { %v3429_v14 = vmul.f32 %v5809_v32, %v7011_v51 }
0x16b4   : > { %v3443_v47 = vmul.f32 %v7036_v40, %v3429_v14 }
0x16b5   : > { %v5811_v44 = vpop.eup %5810 }
0x16b6   : > { %v3430_v8 = vmul.f32 %v5811_v44, %v7016_v52  ;;  %v5813_v48 = vpop.eup %5812  ;;  %v3457_v39 = vadd.f32 %v7045_v22, %v3443_v47 }
0x16b7   : > { %v3431_v49 = vmul.f32 %v5813_v48, %v7019_v1  ;;  %v3497_v1 = vld [vmem:[%s6145_s24] sm:$0xf] }
0x16b8   : > { %v3444_v55 = vmul.f32 %v7036_v40, %v3430_v8  ;;  %v7110_v4 = vrot.slane %v3497_v1, %v1368_v35 }
0x16b9   : > { %v5815_v56 = vpop.eup %5814  ;;  %v3445_v52 = vmul.f32 %v7036_v40, %v3431_v49 }
0x16ba   : > { %v3458_v37 = vadd.f32 %v7045_v22, %v3444_v55  ;;  %v3432_v20 = vmul.f32 %v5815_v56, %v7026_v7  ;;  %v3513_v7 = vsub.s32 3, %v6413_v33 }
0x16bb   : > { %v3459_v42 = vadd.f32 %v7045_v22, %v3445_v52 }
0x16bc   : > { %v3463_v18 = vpack.c.bf16 %v3458_v37, %v3457_v39  ;;  %v3446_v51 = vmul.f32 %v7036_v40, %v3432_v20  ;;  %v7114_v40 = vrot.slane %v3497_v1, %v1376_v58  ;;  %v7120_v9 = vrot.slane %v3497_v1, %v3513_v7 }
0x16be   : > { %3732 = vmatmul.mubr.bf16.gmra.mxu1 %v3463_v18  ;;  %3805 = vmatmul.mubr.bf16.gmra.mxu0 %v3463_v18  ;;  %v3460_v34 = vadd.f32 %v7045_v22, %v3446_v51 }
0x16bf   : > { %3741 = vmatprep.mubr.bf16.mxu1 %v5955_v15  ;;  %3814 = vmatprep.mubr.bf16.mxu0 %v5955_v15  ;;  %v7118_v15 = vrot.slane %v3497_v1, %v1372_v46 }
0x16c0   : > { %v3464_v2 = vpack.c.bf16 %v3460_v34, %v3459_v42 }
0x16c6   : > { %3742 = vmatmul.mubr.bf16.gmra.mxu1 %v3464_v2  ;;  %3815 = vmatmul.mubr.bf16.gmra.mxu0 %v3464_v2 }
0x16f6   : > { %v3713_v22 = vpop.f32.mrf.mxu1  ;;  %v3786_v11 = vpop.f32.mrf.mxu0 }
0x16f7   : > { %v7123_v17 = vadd.f32 %v3713_v22, %v7110_v4  ;;  %v7126_v31 = vadd.f32 %v3786_v11, %v7114_v40 }
0x16f8   : > { %v3715_v35 = vpop.f32.mrf.mxu1  ;;  %v3788_v30 = vpop.f32.mrf.mxu0 }
0x16f9   : > { %v3825_v58 = vmul.f32 %v7123_v17, %v7123_v17  ;;  %v3827_v33 = vmul.f32 %v7126_v31, %v7126_v31  ;;  %v7133_v46 = vadd.f32 %v3715_v35, %v7118_v15  ;;  %v7136_v28 = vadd.f32 %v3788_v30, %v7120_v9 }
0x16fa   : > { %v3717_v36 = vpop.f32.mrf.mxu1  ;;  %v3790_v43 = vpop.f32.mrf.mxu0 }
0x16fb   : > { %v3857_v25 = vmul.f32 %v3825_v58, %v7123_v17  ;;  %v3859_v45 = vmul.f32 %v3827_v33, %v7126_v31  ;;  %v3826_v57 = vmul.f32 %v7133_v46, %v7133_v46  ;;  %v3828_v62 = vmul.f32 %v7136_v28, %v7136_v28 }
0x16fc   : > { %v7145_v63 = vadd.f32 %v3717_v36, %v7110_v4  ;;  %v7148_v5 = vadd.f32 %v3790_v43, %v7114_v40  ;;  %v3719_v41 = vpop.f32.mrf.mxu1  ;;  %v3792_v60 = vpop.f32.mrf.mxu0 }
0x16fd   : > { %v3889_v13 = vmul.f32 0.044715, %v3857_v25  ;;  %v3891_v54 = vmul.f32 0.044715, %v3859_v45  ;;  %v3858_v19 = vmul.f32 %v3826_v57, %v7133_v46  ;;  %v3860_v16 = vmul.f32 %v3828_v62, %v7136_v28 }
0x16fe   : > { %v3829_v24 = vmul.f32 %v7145_v63, %v7145_v63  ;;  %v3831_v10 = vmul.f32 %v7148_v5, %v7148_v5  ;;  %v7157_v3 = vadd.f32 %v3719_v41, %v7118_v15  ;;  %v7160_v27 = vadd.f32 %v3792_v60, %v7120_v9  ;;  %v3723_v29 = vpop.f32.mrf.mxu1  ;;  %v3796_v21 = vpop.f32.mrf.mxu0 }
0x16ff   : > { %v3921_v26 = vadd.f32 %v3889_v13, %v7123_v17  ;;  %v3923_v0 = vadd.f32 %v3891_v54, %v7126_v31  ;;  %v3890_v32 = vmul.f32 0.044715, %v3858_v19  ;;  %v3892_v14 = vmul.f32 0.044715, %v3860_v16 }
0x1700   : > { %v3861_v44 = vmul.f32 %v3829_v24, %v7145_v63  ;;  %v3863_v8 = vmul.f32 %v3831_v10, %v7148_v5  ;;  %v3830_v47 = vmul.f32 %v7157_v3, %v7157_v3  ;;  %v3832_v48 = vmul.f32 %v7160_v27, %v7160_v27  ;;  %v3725_v49 = vpop.f32.mrf.mxu1  ;;  %v3798_v34 = vpop.f32.mrf.mxu0 }
0x1701   : > { %v3953_v55 = vmul.f32 0.7978846, %v3921_v26  ;;  %v3955_v56 = vmul.f32 0.7978846, %v3923_v0  ;;  %v3922_v39 = vadd.f32 %v3890_v32, %v7133_v46  ;;  %v3924_v37 = vadd.f32 %v3892_v14, %v7136_v28 }
0x1702   : > { %v3893_v20 = vmul.f32 0.044715, %v3861_v44  ;;  %v3895_v18 = vmul.f32 0.044715, %v3863_v8  ;;  %v3862_v51 = vmul.f32 %v3830_v47, %v7157_v3  ;;  %v3864_v52 = vmul.f32 %v3832_v48, %v7160_v27  ;;  %v3727_v33 = vpop.f32.mrf.mxu1  ;;  %v3800_v45 = vpop.f32.mrf.mxu0 }
0x1703   : > { %5816 = vtanh.f32 %v3953_v55  ;;  %v3954_v42 = vmul.f32 0.7978846, %v3922_v39  ;;  %v3956_v2 = vmul.f32 0.7978846, %v3924_v37  ;;  %v7175_v1 = vadd.f32 %v3723_v29, %v7110_v4 }
0x1704   : > { %5818 = vtanh.f32 %v3955_v56  ;;  %v3925_v7 = vadd.f32 %v3893_v20, %v7145_v63  ;;  %v3927_v22 = vadd.f32 %v3895_v18, %v7148_v5  ;;  %v3894_v11 = vmul.f32 0.044715, %v3862_v51  ;;  %v3729_v29 = vpop.f32.mrf.mxu1  ;;  %v3802_v32 = vpop.f32.mrf.mxu0 }
0x1705   : > { %5820 = vtanh.f32 %v3954_v42  ;;  %v3896_v35 = vmul.f32 0.044715, %v3864_v52  ;;  %v3833_v30 = vmul.f32 %v7175_v1, %v7175_v1  ;;  %v7182_v58 = vadd.f32 %v3796_v21, %v7114_v40 }
0x1706   : > { %5822 = vtanh.f32 %v3956_v2  ;;  %v3957_v36 = vmul.f32 0.7978846, %v3925_v7  ;;  %v3959_v43 = vmul.f32 0.7978846, %v3927_v22  ;;  %v3926_v25 = vadd.f32 %v3894_v11, %v7157_v3 }
0x1707   : > { %v3928_v57 = vadd.f32 %v3896_v35, %v7160_v27  ;;  %v3865_v62 = vmul.f32 %v3833_v30, %v7175_v1  ;;  %v3835_v41 = vmul.f32 %v7182_v58, %v7182_v58  ;;  %v7190_v60 = vadd.f32 %v3725_v49, %v7118_v15 }
0x1708   : > { %5824 = vtanh.f32 %v3957_v36  ;;  %v3958_v13 = vmul.f32 0.7978846, %v3926_v25  ;;  %v7193_v54 = vadd.f32 %v3798_v34, %v7120_v9  ;;  %v7196_v19 = vadd.f32 %v3727_v33, %v7110_v4 }
0x1709   : > { %5826 = vtanh.f32 %v3959_v43  ;;  %v3960_v16 = vmul.f32 0.7978846, %v3928_v57  ;;  %v3897_v24 = vmul.f32 0.044715, %v3865_v62  ;;  %v3867_v10 = vmul.f32 %v3835_v41, %v7182_v58 }
0x170a   : > { %5828 = vtanh.f32 %v3958_v13  ;;  %v3834_v21 = vmul.f32 %v7190_v60, %v7190_v60  ;;  %v3836_v26 = vmul.f32 %v7193_v54, %v7193_v54  ;;  %v3837_v0 = vmul.f32 %v7196_v19, %v7196_v19 }
0x170b   : > { %5830 = vtanh.f32 %v3960_v16  ;;  %v3929_v14 = vadd.f32 %v3897_v24, %v7175_v1  ;;  %v3899_v44 = vmul.f32 0.044715, %v3867_v10  ;;  %v7207_v8 = vadd.f32 %v3800_v45, %v7114_v40 }
0x170c   : > { %v3866_v47 = vmul.f32 %v3834_v21, %v7190_v60  ;;  %v3868_v48 = vmul.f32 %v3836_v26, %v7193_v54  ;;  %v3869_v55 = vmul.f32 %v3837_v0, %v7196_v19  ;;  %v7213_v56 = vadd.f32 %v3729_v29, %v7118_v15 }
0x170d   : > { %v3961_v39 = vmul.f32 0.7978846, %v3929_v14  ;;  %v3931_v37 = vadd.f32 %v3899_v44, %v7182_v58  ;;  %v3839_v49 = vmul.f32 %v7207_v8, %v7207_v8  ;;  %v7219_v20 = vadd.f32 %v3802_v32, %v7120_v9 }
0x170e   : > { %v3898_v18 = vmul.f32 0.044715, %v3866_v47  ;;  %v3900_v51 = vmul.f32 0.044715, %v3868_v48  ;;  %v3901_v52 = vmul.f32 0.044715, %v3869_v55  ;;  %v3838_v34 = vmul.f32 %v7213_v56, %v7213_v56 }
0x170f   : > { %v3963_v42 = vmul.f32 0.7978846, %v3931_v37  ;;  %v3871_v2 = vmul.f32 %v3839_v49, %v7207_v8  ;;  %v3840_v7 = vmul.f32 %v7219_v20, %v7219_v20  ;;  %5832 = vtanh.f32 %v3961_v39 }
0x1710   : > { %v5817_v22 = vpop.eup %5816  ;;  %v3930_v11 = vadd.f32 %v3898_v18, %v7190_v60  ;;  %v3932_v35 = vadd.f32 %v3900_v51, %v7193_v54  ;;  %v3933_v30 = vadd.f32 %v3901_v52, %v7196_v19  ;;  %v3870_v33 = vmul.f32 %v3838_v34, %v7213_v56 }
0x1711   : > { %v5819_v36 = vpop.eup %5818  ;;  %v3903_v43 = vmul.f32 0.044715, %v3871_v2  ;;  %v3872_v25 = vmul.f32 %v3840_v7, %v7219_v20  ;;  %5834 = vtanh.f32 %v3963_v42  ;;  %v4017_v26 = vadd.f32 1.0, %v5817_v22 }
0x1712   : > { %v5821_v45 = vpop.eup %5820  ;;  %v3962_v57 = vmul.f32 0.7978846, %v3930_v11  ;;  %v3964_v62 = vmul.f32 0.7978846, %v3932_v35  ;;  %v3965_v13 = vmul.f32 0.7978846, %v3933_v30 }
0x1713   : > { %v5823_v41 = vpop.eup %5822  ;;  %v3935_v16 = vadd.f32 %v3903_v43, %v7207_v8  ;;  %v3902_v24 = vmul.f32 0.044715, %v3870_v33  ;;  %v3904_v10 = vmul.f32 0.044715, %v3872_v25  ;;  %v4018_v29 = vadd.f32 1.0, %v5821_v45 }
0x1714   : > { %5836 = vtanh.f32 %v3962_v57  ;;  %v4019_v44 = vadd.f32 1.0, %v5819_v36  ;;  %v4020_v42 = vadd.f32 1.0, %v5823_v41  ;;  %v4049_v2 = vmul.f32 0.5, %v4017_v26 }
0x1715   : > { %v5825_v21 = vpop.eup %5824  ;;  %5838 = vtanh.f32 %v3964_v62  ;;  %v3967_v0 = vmul.f32 0.7978846, %v3935_v16  ;;  %v3934_v32 = vadd.f32 %v3902_v24, %v7213_v56  ;;  %v3936_v48 = vadd.f32 %v3904_v10, %v7219_v20 }
0x1716   : > { %v5827_v14 = vpop.eup %5826  ;;  %v4021_v47 = vadd.f32 1.0, %v5825_v21  ;;  %5840 = vtanh.f32 %v3965_v13  ;;  %v4050_v49 = vmul.f32 0.5, %v4018_v29  ;;  %v4051_v11 = vmul.f32 0.5, %v4019_v44 }
0x1717   : > { %v5829_v55 = vpop.eup %5828  ;;  %v4023_v39 = vadd.f32 1.0, %v5827_v14  ;;  %5842 = vtanh.f32 %v3967_v0  ;;  %v3966_v37 = vmul.f32 0.7978846, %v3934_v32  ;;  %v3968_v52 = vmul.f32 0.7978846, %v3936_v48 }
0x1718   : > { %v5831_v18 = vpop.eup %5830  ;;  %v4053_v51 = vmul.f32 0.5, %v4021_v47  ;;  %v4022_v34 = vadd.f32 1.0, %v5829_v55  ;;  %v4052_v30 = vmul.f32 0.5, %v4020_v42  ;;  %v4082_v25 = vmul.f32 %v4050_v49, %v7133_v46 }
0x1719   : > { %v4055_v7 = vmul.f32 0.5, %v4023_v39  ;;  %5844 = vtanh.f32 %v3966_v37  ;;  %v4024_v22 = vadd.f32 1.0, %v5831_v18  ;;  %v4081_v57 = vmul.f32 %v4049_v2, %v7123_v17 }
0x171a   : > { %5846 = vtanh.f32 %v3968_v52  ;;  %v4054_v35 = vmul.f32 0.5, %v4022_v34  ;;  %v4085_v33 = vmul.f32 %v4053_v51, %v7145_v63  ;;  %v4084_v62 = vmul.f32 %v4052_v30, %v7136_v28 }
0x171b   : > { %v4056_v36 = vmul.f32 0.5, %v4024_v22  ;;  %v4087_v43 = vmul.f32 %v4055_v7, %v7148_v5  ;;  %v4083_v13 = vmul.f32 %v4051_v11, %v7126_v31 }
0x171c   : > { %v4086_v45 = vmul.f32 %v4054_v35, %v7157_v3  ;;  %v5833_v24 = vpop.eup %5832  ;;  %v4113_v10 = vpack.c.bf16 %v4085_v33, %v4081_v57 }
0x171d   : > { %v4088_v41 = vmul.f32 %v4056_v36, %v7160_v27  ;;  %v4115_v21 = vpack.c.bf16 %v4087_v43, %v4083_v13  ;;  %v4025_v0 = vadd.f32 1.0, %v5833_v24 }
0x171e   : > { %v4114_v16 = vpack.c.bf16 %v4086_v45, %v4082_v25  ;;  %v5835_v63 = vpop.eup %5834 }
0x171f   : > { %v4116_v29 = vpack.c.bf16 %v4088_v41, %v4084_v62  ;;  %v4027_v32 = vadd.f32 1.0, %v5835_v63  ;;  %v4057_v18 = vmul.f32 0.5, %v4025_v0 }
0x1720   : > { %4424 = vmatprep.mubr.bf16.mxu1 %v4114_v16 }
0x1721   : > { %v5837_v5 = vpop.eup %5836  ;;  %4489 = vmatprep.mubr.bf16.mxu0 %v4116_v29  ;;  %4425 = vmatmul.mubr.bf16.vlgmr.msra.gmra.mxu1 %v4113_v10  ;;  %v4059_v52 = vmul.f32 0.5, %v4027_v32  ;;  %v4089_v30 = vmul.f32 %v4057_v18, %v7175_v1 }
0x1722   : > { %v5839_v46 = vpop.eup %5838  ;;  %4490 = vmatmul.mubr.bf16.vlgmr.msra.gmra.mxu0 %v4115_v21  ;;  %v4026_v17 = vadd.f32 1.0, %v5837_v5 }
0x1723   : > { %v5841_v3 = vpop.eup %5840  ;;  %v4028_v28 = vadd.f32 1.0, %v5839_v46  ;;  %v4091_v36 = vmul.f32 %v4059_v52, %v7182_v58 }
0x1724   : > { %v5843_v26 = vpop.eup %5842  ;;  %v4029_v27 = vadd.f32 1.0, %v5841_v3  ;;  %v4058_v55 = vmul.f32 0.5, %v4026_v17 }
0x1725   : > { %v4031_v31 = vadd.f32 1.0, %v5843_v26  ;;  %v4060_v49 = vmul.f32 0.5, %v4028_v28 }
0x1726   : > { %v5845_v14 = vpop.eup %5844  ;;  %v4061_v44 = vmul.f32 0.5, %v4029_v27  ;;  %v4090_v2 = vmul.f32 %v4058_v55, %v7190_v60 }
0x1727   : > { %v5847_v47 = vpop.eup %5846  ;;  %v4030_v48 = vadd.f32 1.0, %v5845_v14  ;;  %v4063_v39 = vmul.f32 0.5, %v4031_v31  ;;  %v4092_v11 = vmul.f32 %v4060_v49, %v7193_v54 }
0x1728   : > { %v4032_v37 = vadd.f32 1.0, %v5847_v47  ;;  %v4093_v42 = vmul.f32 %v4061_v44, %v7196_v19 }
0x1729   : > { %v4062_v51 = vmul.f32 0.5, %v4030_v48  ;;  %v4095_v22 = vmul.f32 %v4063_v39, %v7207_v8 }
0x172a   : > { %v4064_v34 = vmul.f32 0.5, %v4032_v37  ;;  %v4117_v25 = vpack.c.bf16 %v4093_v42, %v4089_v30 }
0x172b   : > { %v4094_v7 = vmul.f32 %v4062_v51, %v7213_v56  ;;  %v4119_v45 = vpack.c.bf16 %v4095_v22, %v4091_v36 }
0x172c   : > { %v4096_v35 = vmul.f32 %v4064_v34, %v7219_v20 }
0x172d   : > { %v4118_v33 = vpack.c.bf16 %v4094_v7, %v4090_v2 }
0x172e   : > { %v4120_v43 = vpack.c.bf16 %v4096_v35, %v4092_v11 }
0x172f   : > { %4432 = vmatprep.mubr.bf16.mxu1 %v4118_v33 }
0x1730   : > { %4497 = vmatprep.mubr.bf16.mxu0 %v4120_v43  ;;  %4433 = vmatmul.mubr.bf16.gmra.mxu1 %v4117_v25 }
0x1731   : > { %4498 = vmatmul.mubr.bf16.gmra.mxu0 %v4119_v45 }
0x177e   : > { %v3733_v60 = vpop.f32.mrf.mxu1  ;;  %v3806_v19 = vpop.f32.mrf.mxu0 }
0x177f   : > { %v7251_v8 = vadd.f32 %v3733_v60, %v7110_v4  ;;  %v7254_v54 = vadd.f32 %v3806_v19, %v7114_v40 }
0x1780   : > { %v3735_v56 = vpop.f32.mrf.mxu1  ;;  %v3808_v1 = vpop.f32.mrf.mxu0 }
0x1781   : > { %v3841_v58 = vmul.f32 %v7251_v8, %v7251_v8  ;;  %v3843_v20 = vmul.f32 %v7254_v54, %v7254_v54  ;;  %v7261_v57 = vadd.f32 %v3735_v56, %v7118_v15  ;;  %v7264_v62 = vadd.f32 %v3808_v1, %v7120_v9 }
0x1782   : > { %v3737_v41 = vpop.f32.mrf.mxu1  ;;  %v3810_v13 = vpop.f32.mrf.mxu0 }
0x1783   : > { %v3873_v16 = vmul.f32 %v3841_v58, %v7251_v8  ;;  %v3875_v24 = vmul.f32 %v3843_v20, %v7254_v54  ;;  %v3842_v10 = vmul.f32 %v7261_v57, %v7261_v57  ;;  %v3844_v29 = vmul.f32 %v7264_v62, %v7264_v62 }
0x1784   : > { %v7273_v63 = vadd.f32 %v3737_v41, %v7110_v4  ;;  %v7276_v21 = vadd.f32 %v3810_v13, %v7114_v40  ;;  %v3739_v5 = vpop.f32.mrf.mxu1  ;;  %v3812_v46 = vpop.f32.mrf.mxu0 }
0x1785   : > { %v3905_v3 = vmul.f32 0.044715, %v3873_v16  ;;  %v3907_v17 = vmul.f32 0.044715, %v3875_v24  ;;  %v3874_v26 = vmul.f32 %v3842_v10, %v7261_v57  ;;  %v3876_v28 = vmul.f32 %v3844_v29, %v7264_v62 }
0x1786   : > { %v3845_v0 = vmul.f32 %v7273_v63, %v7273_v63  ;;  %v3847_v27 = vmul.f32 %v7276_v21, %v7276_v21  ;;  %v7285_v32 = vadd.f32 %v3739_v5, %v7118_v15  ;;  %v7288_v31 = vadd.f32 %v3812_v46, %v7120_v9  ;;  %v3743_v14 = vpop.f32.mrf.mxu1  ;;  %v3816_v44 = vpop.f32.mrf.mxu0 }
0x1787   : > { %v3937_v47 = vadd.f32 %v3905_v3, %v7251_v8  ;;  %v3939_v48 = vadd.f32 %v3907_v17, %v7254_v54  ;;  %v3906_v55 = vmul.f32 0.044715, %v3874_v26  ;;  %v3908_v39 = vmul.f32 0.044715, %v3876_v28 }
0x1788   : > { %v3877_v37 = vmul.f32 %v3845_v0, %v7273_v63  ;;  %v3879_v49 = vmul.f32 %v3847_v27, %v7276_v21  ;;  %v3846_v18 = vmul.f32 %v7285_v32, %v7285_v32  ;;  %v3848_v51 = vmul.f32 %v7288_v31, %v7288_v31  ;;  %v3745_v7 = vpop.f32.mrf.mxu1  ;;  %v3818_v33 = vpop.f32.mrf.mxu0 }
0x1789   : > { %v3969_v52 = vmul.f32 0.7978846, %v3937_v47  ;;  %v3971_v34 = vmul.f32 0.7978846, %v3939_v48  ;;  %v3938_v42 = vadd.f32 %v3906_v55, %v7261_v57  ;;  %v3940_v2 = vadd.f32 %v3908_v39, %v7264_v62 }
0x178a   : > { %v3909_v22 = vmul.f32 0.044715, %v3877_v37  ;;  %v3911_v11 = vmul.f32 0.044715, %v3879_v49  ;;  %v3878_v35 = vmul.f32 %v3846_v18, %v7285_v32  ;;  %v3880_v30 = vmul.f32 %v3848_v51, %v7288_v31  ;;  %v3747_v20 = vpop.f32.mrf.mxu1  ;;  %v3820_v24 = vpop.f32.mrf.mxu0 }
0x178b   : > { %5848 = vtanh.f32 %v3969_v52  ;;  %v3970_v36 = vmul.f32 0.7978846, %v3938_v42  ;;  %v3972_v43 = vmul.f32 0.7978846, %v3940_v2  ;;  %v7303_v25 = vadd.f32 %v3743_v14, %v7110_v4 }
0x178c   : > { %5850 = vtanh.f32 %v3971_v34  ;;  %v3941_v45 = vadd.f32 %v3909_v22, %v7273_v63  ;;  %v3943_v60 = vadd.f32 %v3911_v11, %v7276_v21  ;;  %v3910_v19 = vmul.f32 0.044715, %v3878_v35  ;;  %v3749_v14 = vpop.f32.mrf.mxu1  ;;  %v3822_v55 = vpop.f32.mrf.mxu0 }
0x178d   : > { %5852 = vtanh.f32 %v3970_v36  ;;  %v3912_v56 = vmul.f32 0.044715, %v3880_v30  ;;  %v3849_v1 = vmul.f32 %v7303_v25, %v7303_v25  ;;  %v7310_v58 = vadd.f32 %v3816_v44, %v7114_v40 }
0x178e   : > { %5854 = vtanh.f32 %v3972_v43  ;;  %v3973_v41 = vmul.f32 0.7978846, %v3941_v45  ;;  %v3975_v13 = vmul.f32 0.7978846, %v3943_v60  ;;  %v3942_v16 = vadd.f32 %v3910_v19, %v7285_v32 }
0x178f   : > { %v3944_v10 = vadd.f32 %v3912_v56, %v7288_v31  ;;  %v3881_v29 = vmul.f32 %v3849_v1, %v7303_v25  ;;  %v3851_v5 = vmul.f32 %v7310_v58, %v7310_v58  ;;  %v7318_v46 = vadd.f32 %v3745_v7, %v7118_v15 }
0x1790   : > { %5856 = vtanh.f32 %v3973_v41  ;;  %v3974_v3 = vmul.f32 0.7978846, %v3942_v16  ;;  %v7321_v17 = vadd.f32 %v3818_v33, %v7120_v9  ;;  %v7324_v26 = vadd.f32 %v3747_v20, %v7110_v4 }
0x1791   : > { %5858 = vtanh.f32 %v3975_v13  ;;  %v3976_v28 = vmul.f32 0.7978846, %v3944_v10  ;;  %v3913_v0 = vmul.f32 0.044715, %v3881_v29  ;;  %v3883_v27 = vmul.f32 %v3851_v5, %v7310_v58 }
0x1792   : > { %5860 = vtanh.f32 %v3974_v3  ;;  %v3850_v44 = vmul.f32 %v7318_v46, %v7318_v46  ;;  %v3852_v47 = vmul.f32 %v7321_v17, %v7321_v17  ;;  %v3853_v48 = vmul.f32 %v7324_v26, %v7324_v26 }
0x1793   : > { %5862 = vtanh.f32 %v3976_v28  ;;  %v3945_v4 = vadd.f32 %v3913_v0, %v7303_v25  ;;  %v3915_v39 = vmul.f32 0.044715, %v3883_v27  ;;  %v7335_v37 = vadd.f32 %v3820_v24, %v7114_v40 }
0x1794   : > { %v3882_v49 = vmul.f32 %v3850_v44, %v7318_v46  ;;  %v3884_v18 = vmul.f32 %v3852_v47, %v7321_v17  ;;  %v3885_v51 = vmul.f32 %v3853_v48, %v7324_v26  ;;  %v7341_v52 = vadd.f32 %v3749_v14, %v7118_v15 }
0x1795   : > { %v3977_v34 = vmul.f32 0.7978846, %v3945_v4  ;;  %v3947_v42 = vadd.f32 %v3915_v39, %v7310_v58  ;;  %v3855_v2 = vmul.f32 %v7335_v37, %v7335_v37  ;;  %v7347_v7 = vadd.f32 %v3822_v55, %v7120_v9 }
0x1796   : > { %v3914_v40 = vmul.f32 0.044715, %v3882_v49  ;;  %v3916_v22 = vmul.f32 0.044715, %v3884_v18  ;;  %v3917_v11 = vmul.f32 0.044715, %v3885_v51  ;;  %v3854_v35 = vmul.f32 %v7341_v52, %v7341_v52 }
0x1797   : > { %v3979_v30 = vmul.f32 0.7978846, %v3947_v42  ;;  %v3887_v33 = vmul.f32 %v3855_v2, %v7335_v37  ;;  %v3856_v15 = vmul.f32 %v7347_v7, %v7347_v7  ;;  %5864 = vtanh.f32 %v3977_v34 }
0x1798   : > { %v5849_v36 = vpop.eup %5848  ;;  %v3946_v43 = vadd.f32 %v3914_v40, %v7318_v46  ;;  %v3948_v45 = vadd.f32 %v3916_v22, %v7321_v17  ;;  %v3949_v9 = vadd.f32 %v3917_v11, %v7324_v26  ;;  %v3886_v60 = vmul.f32 %v3854_v35, %v7341_v52 }
0x1799   : > { %v5851_v19 = vpop.eup %5850  ;;  %v3919_v56 = vmul.f32 0.044715, %v3887_v33  ;;  %v3888_v1 = vmul.f32 %v3856_v15, %v7347_v7  ;;  %5866 = vtanh.f32 %v3979_v30  ;;  %v4033_v0 = vadd.f32 1.0, %v5849_v36 }
0x179a   : > { %v5853_v20 = vpop.eup %5852  ;;  %v3978_v41 = vmul.f32 0.7978846, %v3946_v43  ;;  %v3980_v13 = vmul.f32 0.7978846, %v3948_v45  ;;  %v3981_v16 = vmul.f32 0.7978846, %v3949_v9 }
0x179b   : > { %v5855_v24 = vpop.eup %5854  ;;  %v3951_v10 = vadd.f32 %v3919_v56, %v7335_v37  ;;  %v3918_v29 = vmul.f32 0.044715, %v3886_v60  ;;  %v3920_v5 = vmul.f32 0.044715, %v3888_v1  ;;  %v4034_v3 = vadd.f32 1.0, %v5853_v20 }
0x179c   : > { %5868 = vtanh.f32 %v3978_v41  ;;  %v4036_v28 = vadd.f32 1.0, %v5855_v24  ;;  %v4035_v4 = vadd.f32 1.0, %v5851_v19  ;;  %v4065_v2 = vmul.f32 0.5, %v4033_v0 }
0x179d   : > { %v5857_v27 = vpop.eup %5856  ;;  %5870 = vtanh.f32 %v3980_v13  ;;  %v3983_v14 = vmul.f32 0.7978846, %v3951_v10  ;;  %v3950_v44 = vadd.f32 %v3918_v29, %v7341_v52  ;;  %v3952_v47 = vadd.f32 %v3920_v5, %v7347_v7 }
0x179e   : > { %v5859_v48 = vpop.eup %5858  ;;  %5872 = vtanh.f32 %v3981_v16  ;;  %v4037_v55 = vadd.f32 1.0, %v5857_v27  ;;  %v4066_v42 = vmul.f32 0.5, %v4034_v3  ;;  %v4068_v11 = vmul.f32 0.5, %v4036_v28 }
0x179f   : > { %v5861_v39 = vpop.eup %5860  ;;  %5874 = vtanh.f32 %v3983_v14  ;;  %v3982_v49 = vmul.f32 0.7978846, %v3950_v44  ;;  %v3984_v18 = vmul.f32 0.7978846, %v3952_v47  ;;  %v4039_v35 = vadd.f32 1.0, %v5859_v48 }
0x17a0   : > { %v5863_v51 = vpop.eup %5862  ;;  %v4038_v34 = vadd.f32 1.0, %v5861_v39  ;;  %v4069_v40 = vmul.f32 0.5, %v4037_v55  ;;  %v4067_v33 = vmul.f32 0.5, %v4035_v4  ;;  %v4098_v45 = vmul.f32 %v4066_v42, %v7261_v57 }
0x17a1   : > { %5876 = vtanh.f32 %v3982_v49  ;;  %v4040_v22 = vadd.f32 1.0, %v5863_v51  ;;  %v4071_v43 = vmul.f32 0.5, %v4039_v35  ;;  %v4100_v60 = vmul.f32 %v4068_v11, %v7264_v62 }
0x17a2   : > { %5878 = vtanh.f32 %v3984_v18  ;;  %v4070_v30 = vmul.f32 0.5, %v4038_v34  ;;  %v4101_v36 = vmul.f32 %v4069_v40, %v7273_v63  ;;  %v4097_v56 = vmul.f32 %v4065_v2, %v7251_v8 }
0x17a3   : > { %v4072_v15 = vmul.f32 0.5, %v4040_v22  ;;  %v4103_v1 = vmul.f32 %v4071_v43, %v7276_v21  ;;  %v4099_v41 = vmul.f32 %v4067_v33, %v7254_v54 }
0x17a4   : > { %v4102_v9 = vmul.f32 %v4070_v30, %v7285_v32  ;;  %v5865_v13 = vpop.eup %5864  ;;  %v4121_v24 = vpack.c.bf16 %v4101_v36, %v4097_v56 }
0x17a5   : > { %v4104_v19 = vmul.f32 %v4072_v15, %v7288_v31  ;;  %v4123_v10 = vpack.c.bf16 %v4103_v1, %v4099_v41  ;;  %v4041_v5 = vadd.f32 1.0, %v5865_v13 }
0x17a6   : > { %v4122_v20 = vpack.c.bf16 %v4102_v9, %v4098_v45  ;;  %v5867_v63 = vpop.eup %5866 }
0x17a7   : > { %v4124_v16 = vpack.c.bf16 %v4104_v19, %v4100_v60  ;;  %v4043_v3 = vadd.f32 1.0, %v5867_v63  ;;  %v4073_v4 = vmul.f32 0.5, %v4041_v5 }
0x17a8   : > { %4440 = vmatprep.mubr.bf16.mxu1 %v4122_v20 }
0x17a9   : > { %v5869_v57 = vpop.eup %5868  ;;  %4505 = vmatprep.mubr.bf16.mxu0 %v4124_v16  ;;  %4441 = vmatmul.mubr.bf16.gmra.mxu1 %v4121_v24  ;;  %v4075_v49 = vmul.f32 0.5, %v4043_v3  ;;  %v4105_v11 = vmul.f32 %v4073_v4, %v7303_v25 }
0x17aa   : > { %v5871_v32 = vpop.eup %5870  ;;  %4506 = vmatmul.mubr.bf16.gmra.mxu0 %v4123_v10  ;;  %v4042_v31 = vadd.f32 1.0, %v5869_v57 }
0x17ab   : > { %v5873_v62 = vpop.eup %5872  ;;  %v4044_v8 = vadd.f32 1.0, %v5871_v32  ;;  %v4107_v30 = vmul.f32 %v4075_v49, %v7310_v58 }
0x17ac   : > { %v5875_v29 = vpop.eup %5874  ;;  %v4045_v21 = vadd.f32 1.0, %v5873_v62  ;;  %v4074_v44 = vmul.f32 0.5, %v4042_v31 }
0x17ad   : > { %v4047_v28 = vadd.f32 1.0, %v5875_v29  ;;  %v4076_v55 = vmul.f32 0.5, %v4044_v8 }
0x17ae   : > { %v5877_v54 = vpop.eup %5876  ;;  %v4077_v0 = vmul.f32 0.5, %v4045_v21  ;;  %v4106_v34 = vmul.f32 %v4074_v44, %v7318_v46 }
0x17af   : > { %v5879_v27 = vpop.eup %5878  ;;  %v4046_v14 = vadd.f32 1.0, %v5877_v54  ;;  %v4079_v47 = vmul.f32 0.5, %v4047_v28  ;;  %v4108_v40 = vmul.f32 %v4076_v55, %v7321_v17  ;;  %v7383_v17 = vld [vmem:[%s7520_s18] ss:$0 sm:$0xff] }
0x17b0   : > { %v4048_v48 = vadd.f32 1.0, %v5879_v27  ;;  %v4109_v51 = vmul.f32 %v4077_v0, %v7324_v26 }
0x17b1   : > { %v4078_v39 = vmul.f32 0.5, %v4046_v14  ;;  %v4111_v2 = vmul.f32 %v4079_v47, %v7335_v37 }
0x17b2   : > { %v4080_v18 = vmul.f32 0.5, %v4048_v48  ;;  %v4125_v15 = vpack.c.bf16 %v4109_v51, %v4105_v11 }
0x17b3   : > { %v4110_v42 = vmul.f32 %v4078_v39, %v7341_v52  ;;  %v4127_v26 = vpack.c.bf16 %v4111_v2, %v4107_v30 }
0x17b4   : > { %v4112_v22 = vmul.f32 %v4080_v18, %v7347_v7 }
0x17b5   : > { %v4126_v35 = vpack.c.bf16 %v4110_v42, %v4106_v34 }
0x17b6   : > { %v4128_v33 = vpack.c.bf16 %v4112_v22, %v4108_v40 }
0x17b7   : > { %4448 = vmatprep.mubr.bf16.mxu1 %v4126_v35 }
0x17b8   : > { %4513 = vmatprep.mubr.bf16.mxu0 %v4128_v33  ;;  %4449 = vmatmul.mubr.bf16.gmra.mxu1 %v4125_v15 }
0x17b9   : > { %4514 = vmatmul.mubr.bf16.gmra.mxu0 %v4127_v26 }
0x17e1   : > { %v5159_v46 = vpop.f32.mrf.mxu1 }
0x17e2   : > { %v5199_v52 = vpop.f32.mrf.mxu0 }
0x17e3   : > { %v5160_v37 = vpop.f32.mrf.mxu1 }
0x17e4   : > { %v5161_v25 = vadd.f32 %v5160_v37, %v5159_v46  ;;  %v5200_v7 = vpop.f32.mrf.mxu0 }
0x17e5   : > { %v5162_v36 = vpop.f32.mrf.mxu1  ;;  %v5201_v43 = vadd.f32 %v5200_v7, %v5199_v52 }
0x17e6   : > { %v4427_v58 = vadd.f32 %v5161_v25, %v7383_v17  ;;  %v5202_v45 = vpop.f32.mrf.mxu0 }
0x17e7   : > { %v5163_v9 = vpop.f32.mrf.mxu1 }
0x17e8   : > { %v4492_v60 = vadd.f32 %v5201_v43, %v4427_v58  ;;  %v5164_v19 = vadd.f32 %v5163_v9, %v5162_v36  ;;  %v5203_v56 = vpop.f32.mrf.mxu0 }
0x17e9   : > { %v5204_v41 = vadd.f32 %v5203_v56, %v5202_v45 }
0x17ea   : > { %v7387_v1 = vadd.f32 %v4492_v60, %v6929_v12  ;;  %v4430_v20 = vadd.f32 %v5164_v19, %v7383_v17 }
0x17ec   : > { %4530 = vst [vmem:[#allocation2 + $0x30] sm:$0xff] %v7387_v1  ;;  %v4495_v13 = vadd.f32 %v5204_v41, %v4430_v20 }
0x17ee   : > { %v4523_v16 = vadd.f32 %v4495_v13, %v6937_v61 }
0x17f0   : > { %4531 = vst [vmem:[#allocation2] sm:$0xff] %v4523_v16  ;;  %v5165_v24 = vpop.f32.mrf.mxu1 }
0x17f1   : > { %v5205_v63 = vpop.f32.mrf.mxu0 }
0x17f2   : > { %v5166_v10 = vpop.f32.mrf.mxu1 }
0x17f3   : > { %v5167_v57 = vadd.f32 %v5166_v10, %v5165_v24  ;;  %v5206_v32 = vpop.f32.mrf.mxu0 }
0x17f4   : > { %v5168_v62 = vpop.f32.mrf.mxu1  ;;  %v5207_v29 = vadd.f32 %v5206_v32, %v5205_v63 }
0x17f5   : > { %v4435_v31 = vadd.f32 %v5167_v57, %v7383_v17  ;;  %v5208_v12 = vpop.f32.mrf.mxu0 }
0x17f6   : > { %v5169_v8 = vpop.f32.mrf.mxu1 }
0x17f7   : > { %v4500_v5 = vadd.f32 %v5207_v29, %v4435_v31  ;;  %v5170_v21 = vadd.f32 %v5169_v8, %v5168_v62  ;;  %v5209_v3 = vpop.f32.mrf.mxu0 }
0x17f8   : > { %v5210_v61 = vadd.f32 %v5209_v3, %v5208_v12 }
0x17f9   : > { %v4524_v28 = vadd.f32 %v4500_v5, %v6932_v38  ;;  %v4438_v54 = vadd.f32 %v5170_v21, %v7383_v17 }
0x17fb   : > { %4532 = vst [vmem:[#allocation2 + $0x18] sm:$0xff] %v4524_v28  ;;  %v4503_v0 = vadd.f32 %v5210_v61, %v4438_v54 }
0x17fd   : > { %v4525_v27 = vadd.f32 %v4503_v0, %v6935_v59 }
0x17ff   : > { %4533 = vst [vmem:[#allocation2 + $0x10] sm:$0xff] %v4525_v27 }
0x1869   : > { %v5171_v14 = vpop.f32.mrf.mxu1 }
0x186a   : > { %v5211_v44 = vpop.f32.mrf.mxu0 }
0x186b   : > { %v5172_v47 = vpop.f32.mrf.mxu1 }
0x186c   : > { %v5173_v48 = vadd.f32 %v5172_v47, %v5171_v14  ;;  %v5212_v55 = vpop.f32.mrf.mxu0 }
0x186d   : > { %v5174_v4 = vpop.f32.mrf.mxu1  ;;  %v5213_v49 = vadd.f32 %v5212_v55, %v5211_v44 }
0x186e   : > { %v4443_v39 = vadd.f32 %v5173_v48, %v7383_v17  ;;  %v5214_v18 = vpop.f32.mrf.mxu0 }
0x186f   : > { %v5175_v51 = vpop.f32.mrf.mxu1 }
0x1870   : > { %v4508_v38 = vadd.f32 %v5213_v49, %v4443_v39  ;;  %v5176_v34 = vadd.f32 %v5175_v51, %v5174_v4  ;;  %v5215_v42 = vpop.f32.mrf.mxu0 }
0x1871   : > { %v5216_v59 = vadd.f32 %v5215_v42, %v5214_v18 }
0x1872   : > { %v4526_v2 = vadd.f32 %v4508_v38, %v6946_v23  ;;  %v4446_v40 = vadd.f32 %v5176_v34, %v7383_v17 }
0x1874   : > { %4534 = vst [vmem:[#allocation2 + $0x8] sm:$0xff] %v4526_v2  ;;  %v4511_v22 = vadd.f32 %v5216_v59, %v4446_v40 }
0x1876   : > { %v4527_v11 = vadd.f32 %v4511_v22, %v6954_v6 }
0x1878   : > { %4535 = vst [vmem:[#allocation2 + $0x20] sm:$0xff] %v4527_v11  ;;  %v5177_v35 = vpop.f32.mrf.mxu1 }
0x1879   : > { %v5217_v30 = vpop.f32.mrf.mxu0 }
0x187a   : > { %v5178_v33 = vpop.f32.mrf.mxu1 }
0x187b   : > { %v5179_v15 = vadd.f32 %v5178_v33, %v5177_v35  ;;  %v5218_v26 = vpop.f32.mrf.mxu0 }
0x187c   : > { %v5180_v46 = vpop.f32.mrf.mxu1  ;;  %v5219_v37 = vadd.f32 %v5218_v26, %v5217_v30 }
0x187d   : > { %v4451_v52 = vadd.f32 %v5179_v15, %v7383_v17  ;;  %v5220_v25 = vpop.f32.mrf.mxu0 }
0x187e   : > { %v5181_v7 = vpop.f32.mrf.mxu1 }
0x187f   : > { %v4516_v23 = vadd.f32 %v5219_v37, %v4451_v52  ;;  %v5182_v36 = vadd.f32 %v5181_v7, %v5180_v46  ;;  %v5221_v58 = vpop.f32.mrf.mxu0 }
0x1880   : > { %v5222_v6 = vadd.f32 %v5221_v58, %v5220_v25 }
0x1881   : > { %v4528_v43 = vadd.f32 %v4516_v23, %v6952_v53  ;;  %v4454_v45 = vadd.f32 %v5182_v36, %v7383_v17 }
0x1883   : > { %4536 = vst [vmem:[#allocation2 + $0x28] sm:$0xff] %v4528_v43  ;;  %v4519_v9 = vadd.f32 %v5222_v6, %v4454_v45  ;;  %4541 = sbr.rel (%p5037_p6) target bundleno = 6792 (0x1a88), region = 112 }
0x1885   : > { %v4529_v60 = vadd.f32 %v4519_v9, %v6966_v50 }
0x1887   : > { %4537 = vst [vmem:[#allocation2 + $0x38] sm:$0xff] %v4529_v60 }
0x1888   : > { %v4543_v19 = vrot.slane %v4526_v2, 7  ;;  %vm4545_vm5 = vcmask 1040384   ;;  %vm4549_vm6 = vcmask 1041408   ;;  %v5892_v53 = vld [vmem:[%s7521_s19 + $0x38] sm:$0xff]   ;;  %v5959_v17 = vmov 0.0   ;;  %v5893_v50 = vld [vmem:[%s7521_s19 + $0x30] sm:$0xff]  }
0x1889   : > { %5408 = vmatprep.subr.bf16.mxu0 %v5959_v17  ;;  %v5894_v63 = vld [vmem:[%s7521_s19 + $0x28] sm:$0xff]   ;;  %v5895_v10 = vld [vmem:[%s7521_s19 + $0x20] sm:$0xff]   ;;  %vm5960_vm7 = vmmov 0   ;;  %v5896_v57 = vld [vmem:[%s7521_s19 + $0x18] sm:$0xff]  }
0x188a   : > { %v4546_v56 = vsel %vm4545_vm5, %v7387_v1, %v4543_v19  ;;  %5409 = vmatpush3.bf16.msra.mxu0 %v5892_v53  ;;  %5424 = vmatprep.mubr.msk.bf16.mxu0 %vm5960_vm7, %v5959_v17  ;;  %v5897_v32 = vld [vmem:[%s7521_s19 + $0x10] sm:$0xff]   ;;  %v5898_v62 = vld [vmem:[%s7521_s19 + $0x8] sm:$0xff]   ;;  %v5899_v31 = vld [vmem:[%s7521_s19] sm:$0xff]  }
0x188b   : > { %v4550_v20 = vsel %vm4549_vm6, %v4546_v56, 0.0  ;;  %5410 = vmatprep.subr.bf16.mxu0 %v5959_v17  ;;  %v5038_v21 = vld [vmem:[%s7522_s25] ss:$0 sm:$0xff] }
0x188c   : > { %4551 = vadd.xlane.f32.xlu0 %v4550_v20  ;;  %v5039_v28 = vld [vmem:[%s7523_s0] ss:$0 sm:$0xff] }
0x188e   : > { %5411 = vmatpush3.bf16.msra.mxu0 %v5893_v50 }
0x188f   : > { %5412 = vmatprep.subr.bf16.mxu0 %v5959_v17 }
0x1892   : > { %5413 = vmatpush3.bf16.msra.mxu0 %v5894_v63 }
0x1893   : > { %5414 = vmatprep.subr.bf16.mxu0 %v5959_v17 }
0x1896   : > { %5415 = vmatpush3.bf16.msra.mxu0 %v5895_v10 }
0x1897   : > { %5416 = vmatprep.subr.bf16.mxu0 %v5959_v17 }
0x189a   : > { %5417 = vmatpush3.bf16.msra.mxu0 %v5896_v57 }
0x189b   : > { %5418 = vmatprep.subr.bf16.mxu0 %v5959_v17 }
0x189e   : > { %5419 = vmatpush3.bf16.msra.mxu0 %v5897_v32 }
0x189f   : > { %5420 = vmatprep.subr.bf16.mxu0 %v5959_v17 }
0x18a2   : > { %5421 = vmatpush3.bf16.msra.mxu0 %v5898_v62 }
0x18a3   : > { %5422 = vmatprep.subr.bf16.mxu0 %v5959_v17 }
0x18a6   : > { %5423 = vmatpush3.bf16.msra.mxu0 %v5899_v31 }
0x1915   : > { %v4552_v41 = vpop.xlane.xlu0 %4551 }
0x1916   : > { %v4553_v13 = vmul.f32 0.0078125, %v4552_v41 }
0x1918   : > { %v4554_v1 = vsub.f32 %v4546_v56, %v4553_v13 }
0x191a   : > { %v4555_v16 = vmul.f32 %v4554_v1, %v4554_v1 }
0x191c   : > { %v4556_v24 = vsel %vm4549_vm6, %v4555_v16, 0.0 }
0x191d   : > { %4557 = vadd.xlane.f32.xlu0 %v4556_v24 }
0x19a6   : > { %v4558_v29 = vpop.xlane.xlu0 %4557 }
0x19a7   : > { %v4559_v12 = vmul.f32 0.0078125, %v4558_v29 }
0x19a9   : > { %v4560_v8 = vadd.f32 1e-05, %v4559_v12 }
0x19ab   : > { %5900 = vrsqrt.f32 %v4560_v8 }
0x19b8   : > { %v5901_v5 = vpop.eup %5900 }
0x19b9   : > { %v4562_v3 = vmul.f32 %v5901_v5, %v4554_v1 }
0x19bb   : > { %v4569_v54 = vmul.f32 %v5038_v21, %v4562_v3 }
0x19bd   : > { %v4576_v61 = vadd.f32 %v5039_v28, %v4569_v54 }
0x19bf   : > { %v4577_v0 = vpack.c.bf16 %v4576_v61, %v4576_v61 }
0x19c1   : > { %5425 = vmatmul.mubr.bf16.vlgmr.msra.gmra.mxu0 %v4577_v0 }
0x1a81   : > { %v4676_v27 = vpop.f32.mrf.mxu0 }
0x1a82   : > { %4682 = vst [vmem:[#allocation4] sm:$0x3] %v4676_v27 }
0x1a83   : > { %v5426_v14 = vpop.f32.mrf.mxu0 }
0x1a85   : > { %v4679_v44 = vpop.f32.mrf.mxu0 }
0x1a87   : > { %v5427_v47 = vpop.f32.mrf.mxu0 }
0x1a88 PF: > { %s7524_s4 = sld [smem:[#allocation8_spill]]  ;;  %s5961_s26 = smov [#allocation4]  }
0x1a89   : > { %s4692_s1 = sshll.u32 %s5961_s26, 4  ;;  %s4693_s1 = int_to_ptr.vmem [resolvable:$true] %s4692_s1 }
0x1a8a   : > { %s5902_s29 = scalar_lea.vmem %s4693_s1, 32  ;;  %p5909_p11 = scmp.lt.s32.totalorder %s4693_s1, %s4693_s1 }
0x1a8b   : > { %p5903_p8 = scmp.ne.s32.totalorder %s4693_s1, %s5902_s29  ;;  %p5910_p12 = scmp.lt.s32.totalorder %s5902_s29, %s5902_s29 }
0x1a8d   : > { %p5911_p13 = por %p5910_p12, %p5909_p11 }
0x1a8e   : > { %s7525_s22 = sadd.s32 4294967295, %s7524_s4  }
0x1a8f   : > { %p7440_p7 = scmp.eq.s32.totalorder %s7525_s22, 1 }
0x1a91   : > { %p5904_p9 = pnand %p5903_p8, %p7440_p7 }
0x1a93   : > { %p5905_p10 = pneg %p5904_p9 }
0x1a95   : > { %p5912_p0 = pnand %p5911_p13, %p5905_p10 }
0x1a97   : > { %5915 = shalt.err (!%p5912_p0)
}
0x1a98   : > { %s7527_s24 = sld [smem:[#allocation21_spill]] }
0x1a9e   : > { %5471 = dma.vmem_to_hbm [thread:$0]  (%p7440_p7), %s4693_s1, 32, %s7527_s24, [#allocation5]  }
0x1a9f   : > { %5939 = dma.done.wait (%p7440_p7), [#allocation5], 32  }
0x1aa0   : > { %5941 = vsyncadd (%p7440_p7), [#allocation5], 4294967264 }
0x1aa1 PF: > { %s7528_s18 = sld [smem:[#allocation8_spill]] }
0x1aa2   : > { %s7529_s2 = sld [smem:[#allocation7_spill]] }
0x1aa3   : > { %s7530_s25 = sld [smem:[#allocation9_spill]] }
0x1aa7   : > { %s32_s26 = sadd.s32 1, %s7528_s18  }
0x1aa8   : > { %p29_p1 = scmp.ge.s32.totalorder %s32_s26, 4  }
0x1aaa   :  { %31 = sbr.rel (!%p29_p1) target bundleno = 15 (0xf), region = 176 }
0x1aaf   :  { %4705 = vsyncpa [#allocation5], 1 }
0x1ab0   :  { %4707 = vsyncpa [#allocation5 + $0x1], 1 }

</bundles_post_ra>
